<compile_context>
chip_gen: v7x
topology: tpu7x:2x2x1
jax: 0.10.0
libtpu: 0.0.40
codegen_flags: <defaults>
</compile_context>

<pallas_src>
import functools

import jax
import jax.numpy as jnp
from jax.experimental import pallas as pl
from jax.experimental.pallas import tpu as pltpu


# ----------------------------------------------------------------------------
# small helpers
# ----------------------------------------------------------------------------
def _tpu_vmem_capacity_bytes():
    """Physical VMEM per core (fallback: 128 MiB for v5e/v6e-class parts)."""
    try:
        return int(pltpu.get_tpu_info().vmem_capacity_bytes)
    except Exception:
        return 128 * 1024 * 1024


def _pick_tile(t, per_u_bytes, budget_bytes):
    """Largest tile (t itself, or a divisor of t) whose block fits the budget."""
    if t * per_u_bytes <= budget_bytes:
        return t
    cap = max(1, min(t, budget_bytes // max(1, per_u_bytes)))
    for d in range(cap, 0, -1):
        if t % d == 0:
            return d
    # TODO(synk): for prime t larger than the budget, a masked tail block (or
    # padding t) would avoid degrading to tiny tiles / many 0.35us grid steps.
    return 1


def _vmem_limit(need_bytes, hi_bytes):
    """Explicit scoped-VMEM budget: ~1.5x the estimated working set, clamped."""
    return int(min(hi_bytes, max(16 * 1024 * 1024, (3 * need_bytes) // 2)))


# ----------------------------------------------------------------------------
# Pallas kernel 1: conv1 (1x1, BN-scale folded) + bias + ReLU fused with both
# adaptive max pools.
#   x block : (bs, tu, W, C)  rows h = a*t + (global_j*tu + u) of batch b, NHWC bf16
#   outputs : rp (1, 1, bs, G) = max over (u, w) per row-block a
#             cp (1, 1, bs, G) = max over (h, v) per col-block d
# Grid: (B, n_split, nj); j (last axis) is the pool reduction -> running-max
# scratch; the n_split axis is parallel (keeps both v7x cores busy at B == 1).
# ----------------------------------------------------------------------------
def _conv1_pool_kernel(x_ref, w1_ref, b1_ref, rp_ref, cp_ref, rp_acc, cp_acc):
    bs, tu, W, C = x_ref.shape
    G = w1_ref.shape[1]
    s = W // bs
    j = pl.program_id(2)

    @pl.when(j == 0)
    def _():
        rp_acc[...] = jnp.full_like(rp_acc, -jnp.inf)
        cp_acc[...] = jnp.full_like(cp_acc, -jnp.inf)

    x2d = x_ref[...].reshape(bs * tu * W, C)                       # bf16 rows
    y = jnp.dot(x2d, w1_ref[...], preferred_element_type=jnp.float32)
    y = jnp.maximum(y + b1_ref[...], 0.0)                          # bias + ReLU (f32)

    # adaptive_max_pool2d(out, (bs, 1)): per row-block a, max over (u, w)
    rp_t = jnp.max(y.reshape(bs, tu * W, G), axis=1)               # (bs, G)
    # adaptive_max_pool2d(out, (1, bs)): per col-block d, max over (rows, v)
    yc = y.reshape(bs * tu, bs, s, G)
    cp_t = jnp.max(jnp.max(yc, axis=0), axis=1)                    # (bs, G)

    rp_acc[...] = jnp.maximum(rp_acc[...], rp_t)
    cp_acc[...] = jnp.maximum(cp_acc[...], cp_t)

    @pl.when(j == pl.num_programs(2) - 1)
    def _():
        rp_ref[...] = rp_acc[...].reshape(1, 1, bs, G)
        cp_ref[...] = cp_acc[...].reshape(1, 1, bs, G)


def conv1_pool(x4, w1, b1, bs, tu, n_split, hi_bytes):
    Bbs, t, W, C = x4.shape
    B = Bbs // bs
    G = w1.shape[1]
    nj = (t // tu) // n_split
    blk = bs * tu * W * C * 2                                      # bf16 x block
    need = 2 * blk + bs * tu * W * G * 4 + (2 << 20)
    rp, cp = pl.pallas_call(
        _conv1_pool_kernel,
        out_shape=(jax.ShapeDtypeStruct((B, n_split, bs, G), jnp.float32),
                   jax.ShapeDtypeStruct((B, n_split, bs, G), jnp.float32)),
        grid=(B, n_split, nj),
        in_specs=[
            pl.BlockSpec((bs, tu, W, C), lambda b, spl, j: (b, spl * nj + j, 0, 0)),
            pl.BlockSpec((C, G), lambda b, spl, j: (0, 0)),
            pl.BlockSpec((1, G), lambda b, spl, j: (0, 0)),
        ],
        out_specs=(pl.BlockSpec((1, 1, bs, G), lambda b, spl, j: (b, spl, 0, 0)),
                   pl.BlockSpec((1, 1, bs, G), lambda b, spl, j: (b, spl, 0, 0))),
        scratch_shapes=[pltpu.VMEM((bs, G), jnp.float32),
                        pltpu.VMEM((bs, G), jnp.float32)],
        compiler_params=pltpu.CompilerParams(
            dimension_semantics=("parallel", "parallel", "arbitrary"),
            vmem_limit_bytes=_vmem_limit(need, hi_bytes)),
    )(x4, w1, b1.reshape(1, G))
    return rp, cp


# ----------------------------------------------------------------------------
# Pallas kernel 2: y = kron(p,I_t) @ x @ kron(q,I_s) fused with conv2+BN+ReLU.
#   x block : (bs, tu, W, C)  bf16 (row-block a, within-block row u, w, c)
#   p/q     : (1, bs, bs, C)  bf16 per-channel block-mixing matrices
#   y1[a,u,w,c]   = sum_b p[a,b,c] * x[b,u,w,c]          (P = kron(p, I_t))
#   y2[a,u,d,v,c] = sum_e q[e,d,c] * y1[a,u,e*s+v,c]     (Q = kron(q, I_s))
#   o[a]          = relu(y2_a @ W2 + b2)                 (conv2 1x1, BN folded)
# The mix runs in bf16 on the VPU (binding slot); only the MXU matmul
# accumulates in f32. Each row-block a is stored directly (no concatenate).
# Grid: (B, t // tu), both axes parallel.
# ----------------------------------------------------------------------------
def _bilinear_conv2_kernel(x_ref, p_ref, q_ref, w2_ref, b2_ref, o_ref):
    bs, tu, W, C = x_ref.shape
    s = W // bs

    p = p_ref[0]                                                   # (bs, bs, C) bf16
    q = q_ref[0]                                                   # (bs, bs, C) bf16
    w2 = w2_ref[...]                                               # (C, C) bf16
    b2 = b2_ref[...]                                               # (1, C) f32

    for a in range(bs):
        # row-block mix with p (bf16, lane-dense in C)
        y1 = p[a, 0][None, None, :] * x_ref[0]
        for b in range(1, bs):
            y1 = y1 + p[a, b][None, None, :] * x_ref[b]
        # column-block mix with q
        y1 = y1.reshape(tu, bs, s, C)
        y2 = q[0][None, :, None, :] * y1[:, 0][:, None, :, :]
        for e in range(1, bs):
            y2 = y2 + q[e][None, :, None, :] * y1[:, e][:, None, :, :]
        # conv2 (1x1) on the MXU: bf16 inputs, f32 accumulation, bias + ReLU.
        # TODO(synk): conv2 out-channel axis is not tiled; fine up to a few K
        # channels (the (C, C) weight must fit VMEM).
        z = jnp.dot(y2.reshape(tu * W, C), w2, preferred_element_type=jnp.float32)
        z = jnp.maximum(z + b2, 0.0)
        o_ref[a] = z.reshape(tu, W, C).astype(o_ref.dtype)


def bilinear_conv2(x4, p_cc, q_cc, w2, b2, bs, tu, hi_bytes):
    Bbs, t, W, C = x4.shape
    B = Bbs // bs
    blk = bs * tu * W * C * 2                                      # bf16 block
    single_w2 = (C * C * 2) >= (4 << 20)                           # big weight -> 1 buffer
    w2_bufs = 1 if single_w2 else 2
    need = (4 * blk                       # x in (double-buffered, bf16)
            + 4 * blk                     # out (double-buffered, bf16)
            + 16 * (blk // bs)            # per-row-block temporaries (y1/y2/z)
            + w2_bufs * C * C * 2         # conv2 weight
            + 8 * bs * bs * C             # p_cc / q_cc (bf16, double-buffered)
            + (2 << 20))
    if single_w2:
        w2_spec = pl.BlockSpec((C, C), lambda b, j: (0, 0),
                               pipeline_mode=pl.Buffered(1))
    else:
        w2_spec = pl.BlockSpec((C, C), lambda b, j: (0, 0))
    out4 = pl.pallas_call(
        _bilinear_conv2_kernel,
        out_shape=jax.ShapeDtypeStruct((Bbs, t, W, C), jnp.bfloat16),
        grid=(B, t // tu),
        in_specs=[
            pl.BlockSpec((bs, tu, W, C), lambda b, j: (b, j, 0, 0)),
            pl.BlockSpec((1, bs, bs, C), lambda b, j: (b, 0, 0, 0)),
            pl.BlockSpec((1, bs, bs, C), lambda b, j: (b, 0, 0, 0)),
            w2_spec,
            pl.BlockSpec((1, C), lambda b, j: (0, 0)),
        ],
        out_specs=pl.BlockSpec((bs, tu, W, C), lambda b, j: (b, j, 0, 0)),
        compiler_params=pltpu.CompilerParams(
            dimension_semantics=("parallel", "parallel"),
            vmem_limit_bytes=_vmem_limit(need, hi_bytes)),
    )(x4, p_cc, q_cc, w2, b2.reshape(1, C))
    return out4


# ----------------------------------------------------------------------------
# parameters (matching the torch module's shapes; BN in eval mode)
# ----------------------------------------------------------------------------
def init_params(key, in_channels, groups, block_size):
    bs = block_size
    ks = jax.random.split(key, 16)

    def n(k, shape, sc=0.2):
        return sc * jax.random.normal(k, shape, dtype=jnp.float32)

    return dict(
        conv1_w=n(ks[0], (groups, in_channels)),                 # 1x1 conv (Cout, Cin)
        bn1_gamma=1.0 + n(ks[1], (groups,), 0.1),
        bn1_beta=n(ks[2], (groups,), 0.1),
        bn1_mean=n(ks[3], (groups,), 0.05),
        bn1_var=1.0 + jnp.abs(n(ks[4], (groups,), 0.1)),
        convp_w=n(ks[5], (bs * bs * groups, groups, bs, 1)),     # Conv2d(groups, bs*bs*G, (bs,1))
        convp_b=n(ks[6], (bs * bs * groups,), 0.05),
        convq_w=n(ks[7], (bs * bs * groups, groups, 1, bs)),     # Conv2d(groups, bs*bs*G, (1,bs))
        convq_b=n(ks[8], (bs * bs * groups,), 0.05),
        conv2_w=n(ks[9], (in_channels, in_channels)),            # 1x1 conv (Cout, Cin)
        bn2_gamma=1.0 + n(ks[10], (in_channels,), 0.1),
        bn2_beta=n(ks[11], (in_channels,), 0.1),
        bn2_mean=n(ks[12], (in_channels,), 0.05),
        bn2_var=1.0 + jnp.abs(n(ks[13], (in_channels,), 0.1)),
    )


# ----------------------------------------------------------------------------
# forward pass
# ----------------------------------------------------------------------------
def bilinear_attn_transform(x, params, block_size, groups):
    B, C, H, W = x.shape
    bs = block_size
    G = groups
    assert H % bs == 0 and W % bs == 0 and C % G == 0
    t = H // bs
    cpg = C // G
    eps = 1e-5

    vmem_cap = _tpu_vmem_capacity_bytes()
    hi = min(48 * 1024 * 1024, vmem_cap // 2)      # 32 MiB cap on v7x (64 MiB phys)

    # single layout change: NCHW -> NHWC (+ bf16 for the kernels' HBM reads)
    # TODO(synk): if the surrounding model can consume NHWC, both wrapper
    # transposes (and their HBM passes) can be dropped.
    x_nhwc = jnp.transpose(x, (0, 2, 3, 1)).astype(jnp.bfloat16)       # (B, H, W, C)
    x4 = x_nhwc.reshape(B * bs, t, W, C)                               # free reshape (a major)

    # decoupled tile budgets: kernel 1 streams (big tiles), kernel 2 carries
    # bf16/f32 temporaries (smaller tiles)
    per_u = bs * W * C * 2
    tu1 = _pick_tile(t, per_u, min(8 << 20, hi // 4))
    tu2 = _pick_tile(t, per_u, min(2 << 20, hi // 12))
    if B == 1 and t % 2 == 0:                       # keep both v7x cores busy
        if tu1 == t:
            tu1 = t // 2
        if tu2 == t:
            tu2 = t // 2
    nj1 = t // tu1
    n_split = 2 if (B == 1 and nj1 % 2 == 0 and nj1 >= 2) else 1

    # fold eval-mode BN scales into the 1x1 conv weights (bias + ReLU stay in-kernel)
    s1 = params["bn1_gamma"] * jax.lax.rsqrt(params["bn1_var"] + eps)
    b1 = params["bn1_beta"] - params["bn1_mean"] * s1
    s2 = params["bn2_gamma"] * jax.lax.rsqrt(params["bn2_var"] + eps)
    b2 = params["bn2_beta"] - params["bn2_mean"] * s2
    w1 = (params["conv1_w"] * s1[:, None]).T.astype(jnp.bfloat16)      # (C, G)
    w2 = (params["conv2_w"] * s2[:, None]).T.astype(jnp.bfloat16)      # (C, C)

    # ---- kernel 1: conv1 (+folded BN) + ReLU fused with both adaptive max pools ----
    rp, cp = conv1_pool(x4, w1, b1, bs, tu1, n_split, hi)              # (B, n_split, bs, G)
    rp = rp.max(axis=1)                                                # (B, bs, G)
    cp = cp.max(axis=1)

    # ---- tiny conv_p / conv_q (1x1 output spatial) + sigmoid + normalize ----
    rp_f = jnp.transpose(rp, (0, 2, 1)).reshape(B, G * bs)             # flat index g*bs + a
    cp_f = jnp.transpose(cp, (0, 2, 1)).reshape(B, G * bs)
    wp = params["convp_w"].reshape(bs * bs * G, G * bs)
    wq = params["convq_w"].reshape(bs * bs * G, G * bs)
    p = jax.nn.sigmoid((rp_f @ wp.T + params["convp_b"]).reshape(B, G, bs, bs))
    q = jax.nn.sigmoid((cp_f @ wq.T + params["convq_b"]).reshape(B, G, bs, bs))
    p = p / p.sum(axis=3, keepdims=True)
    q = q / q.sum(axis=2, keepdims=True)

    # per-channel (B, bs, bs, C) views (group g covers channels g*cpg..(g+1)*cpg-1)
    p_cc = jnp.repeat(jnp.transpose(p, (0, 2, 3, 1)), cpg, axis=-1).astype(jnp.bfloat16)
    q_cc = jnp.repeat(jnp.transpose(q, (0, 2, 3, 1)), cpg, axis=-1).astype(jnp.bfloat16)

    # ---- kernel 2: bilinear transform fused with conv2 (+folded BN) + ReLU ----
    out4 = bilinear_conv2(x4, p_cc, q_cc, w2, b2, bs, tu2, hi)         # (B*bs, t, W, C) bf16

    out_nhwc = out4.reshape(B, H, W, C)                                # bf16 transpose, cast last
    return jnp.transpose(out_nhwc, (0, 3, 1, 2)).astype(x.dtype)       # back to NCHW, f32


# ----------------------------------------------------------------------------
# plain-JAX f32 reference (mirrors the torch module) for a sanity check
# ----------------------------------------------------------------------------
def reference_forward(x, params, block_size, groups):
    B, C, H, W = x.shape
    bs, G = block_size, groups
    t, s = H // bs, W // bs
    cpg = C // G
    eps = 1e-5

    s1 = params["bn1_gamma"] / jnp.sqrt(params["bn1_var"] + eps)
    b1 = params["bn1_beta"] - params["bn1_mean"] * s1
    out = jnp.einsum("bchw,gc->bghw", x, params["conv1_w"])
    out = jax.nn.relu(out * s1[None, :, None, None] + b1[None, :, None, None])

    rp = out.reshape(B, G, bs, t, W).max(axis=(3, 4))                  # (B, G, bs)
    cp = out.reshape(B, G, H, bs, s).max(axis=(2, 4))                  # (B, G, bs)
    wp = params["convp_w"].reshape(bs * bs * G, G * bs)
    wq = params["convq_w"].reshape(bs * bs * G, G * bs)
    p = jax.nn.sigmoid((rp.reshape(B, G * bs) @ wp.T + params["convp_b"]).reshape(B, G, bs, bs))
    q = jax.nn.sigmoid((cp.reshape(B, G * bs) @ wq.T + params["convq_b"]).reshape(B, G, bs, bs))
    p = p / p.sum(axis=3, keepdims=True)
    q = q / q.sum(axis=2, keepdims=True)
    p = jnp.broadcast_to(p[:, :, None], (B, G, cpg, bs, bs)).reshape(B, C, bs, bs)
    q = jnp.broadcast_to(q[:, :, None], (B, G, cpg, bs, bs)).reshape(B, C, bs, bs)
    P = jnp.einsum("bcij,uv->bciujv", p, jnp.eye(t, dtype=x.dtype)).reshape(B, C, H, H)
    Q = jnp.einsum("bcij,uv->bciujv", q, jnp.eye(s, dtype=x.dtype)).reshape(B, C, W, W)
    y = jnp.matmul(jnp.matmul(P, x), Q)

    s2 = params["bn2_gamma"] / jnp.sqrt(params["bn2_var"] + eps)
    b2 = params["bn2_beta"] - params["bn2_mean"] * s2
    y = jnp.einsum("bchw,dc->bdhw", y, params["conv2_w"])
    return jax.nn.relu(y * s2[None, :, None, None] + b2[None, :, None, None])


if __name__ == "__main__":
    def run_case(B, C, H, W, block_size, groups):
        key = jax.random.PRNGKey(0)
        kx, kp = jax.random.split(key)
        x = jax.random.normal(kx, (B, C, H, W), dtype=jnp.float32)
        params = init_params(kp, C, groups, block_size)

        fwd = jax.jit(functools.partial(bilinear_attn_transform,
                                        block_size=block_size, groups=groups))
        y = fwd(x, params)
        jax.block_until_ready(y)

        assert y.shape == (B, C, H, W) and y.dtype == jnp.float32
        assert bool(jnp.all(jnp.isfinite(y)))

        # sanity check against the f32 reference (bf16 kernels -> loose tolerance)
        y_ref = reference_forward(x, params, block_size, groups)
        rel = float(jnp.sqrt(jnp.sum((y - y_ref) ** 2)) /
                    (jnp.sqrt(jnp.sum(y_ref ** 2)) + 1e-6))
        assert rel < 0.05, f"relative L2 error vs reference too large: {rel}"

    run_case(B=2, C=8, H=16, W=16, block_size=4, groups=2)
    # B == 1 exercises the split-reduction path that keeps both v7x cores busy.
    run_case(B=1, C=8, H=16, W=16, block_size=4, groups=2)
    print("KERNEL_OK")
</pallas_src>

<mosaic_0001>
module attributes {stable_mosaic.version = 11 : i64} {
  func.func @_conv1_pool_kernel(%arg0: i32, %arg1: i32, %arg2: i32, %arg3: memref<4x4x16x8xbf16, #tpu.memory_space<vmem>>, %arg4: memref<8x2xbf16, #tpu.memory_space<vmem>>, %arg5: memref<1x2xf32, #tpu.memory_space<vmem>>, %arg6: memref<1x1x4x2xf32, #tpu.memory_space<vmem>>, %arg7: memref<1x1x4x2xf32, #tpu.memory_space<vmem>>, %arg8: memref<4x2xf32, #tpu.memory_space<vmem>>, %arg9: memref<4x2xf32, #tpu.memory_space<vmem>>) attributes {dimension_semantics = [#tpu.dimension_semantics<parallel>, #tpu.dimension_semantics<parallel>, #tpu.dimension_semantics<arbitrary>], iteration_bounds = array<i64: 2, 1, 1>, scalar_prefetch = 0 : i64, scratch_operands = 2 : i64, tpu.core_type = #tpu.core_type<tc>, window_params = [{transform_indices = @transform_0, window_bounds = array<i64: 4, 4, 16, 8>}, {pipeline_mode = #tpu.pipeline_mode<synchronous>, transform_indices = @transform_1, window_bounds = array<i64: 8, 2>}, {pipeline_mode = #tpu.pipeline_mode<synchronous>, transform_indices = @transform_2, window_bounds = array<i64: 1, 2>}, {transform_indices = @transform_3, window_bounds = array<i64: 1, 1, 4, 2>}, {transform_indices = @transform_4, window_bounds = array<i64: 1, 1, 4, 2>}]} {
    %c0_i32 = arith.constant 0 : i32
    %0 = arith.cmpi eq, %arg2, %c0_i32 : i32
    %1 = arith.extui %0 : i1 to i32
    %c0_i32_0 = arith.constant 0 : i32
    %2 = arith.cmpi ne, %1, %c0_i32_0 : i32
    scf.if %2 {
      %cst_22 = arith.constant 0xFF800000 : f32
      %26 = vector.broadcast %cst_22 : f32 to vector<4x2xf32>
      %c0_23 = arith.constant 0 : index
      %c0_24 = arith.constant 0 : index
      %27 = vector.load %arg8[%c0_23, %c0_24] : memref<4x2xf32, #tpu.memory_space<vmem>>, vector<4x2xf32>
      tpu.vector_store %arg8[%c0_23, %c0_24], %26 {strides = array<i32>} : memref<4x2xf32, #tpu.memory_space<vmem>>, vector<4x2xf32>,
      %cst_25 = arith.constant 0xFF800000 : f32
      %28 = vector.broadcast %cst_25 : f32 to vector<4x2xf32>
      %c0_26 = arith.constant 0 : index
      %c0_27 = arith.constant 0 : index
      %29 = vector.load %arg9[%c0_26, %c0_27] : memref<4x2xf32, #tpu.memory_space<vmem>>, vector<4x2xf32>
      tpu.vector_store %arg9[%c0_26, %c0_27], %28 {strides = array<i32>} : memref<4x2xf32, #tpu.memory_space<vmem>>, vector<4x2xf32>,
    } else {
    }
    %c0 = arith.constant 0 : index
    %c0_1 = arith.constant 0 : index
    %c0_2 = arith.constant 0 : index
    %c0_3 = arith.constant 0 : index
    %3 = vector.load %arg3[%c0, %c0_1, %c0_2, %c0_3] : memref<4x4x16x8xbf16, #tpu.memory_space<vmem>>, vector<4x4x16x8xbf16>
    %4 = vector.shape_cast %3 : vector<4x4x16x8xbf16> to vector<256x8xbf16>
    %c0_4 = arith.constant 0 : index
    %c0_5 = arith.constant 0 : index
    %5 = vector.load %arg4[%c0_4, %c0_5] : memref<8x2xbf16, #tpu.memory_space<vmem>>, vector<8x2xbf16>
    %cst = arith.constant dense<0.000000e+00> : vector<256x2xf32>
    %6 = tpu.matmul %4, %5, %cst {dimension_numbers = #tpu.dot_dimension_numbers<[1], [0], [0], [1], [0, 0, 1, 1], [], []>} : vector<256x8xbf16>, vector<8x2xbf16>, vector<256x2xf32> -> vector<256x2xf32>
    %c0_6 = arith.constant 0 : index
    %c0_7 = arith.constant 0 : index
    %7 = vector.load %arg5[%c0_6, %c0_7] : memref<1x2xf32, #tpu.memory_space<vmem>>, vector<1x2xf32>
    %8 = vector.broadcast %7 : vector<1x2xf32> to vector<256x2xf32>
    %9 = arith.addf %6, %8 : vector<256x2xf32>
    %cst_8 = arith.constant 0.000000e+00 : f32
    %10 = vector.broadcast %cst_8 : f32 to vector<256x2xf32>
    %11 = arith.maximumf %9, %10 : vector<256x2xf32>
    %12 = vector.shape_cast %11 : vector<256x2xf32> to vector<4x64x2xf32>
    %cst_9 = arith.constant dense<0xFF800000> : vector<4x2xf32>
    %13 = vector.multi_reduction <maximumf>, %12, %cst_9 [1] : vector<4x64x2xf32> to vector<4x2xf32>
    %14 = vector.shape_cast %11 : vector<256x2xf32> to vector<16x4x4x2xf32>
    %cst_10 = arith.constant dense<0xFF800000> : vector<4x4x2xf32>
    %15 = vector.multi_reduction <maximumf>, %14, %cst_10 [0] : vector<16x4x4x2xf32> to vector<4x4x2xf32>
    %cst_11 = arith.constant dense<0xFF800000> : vector<4x2xf32>
    %16 = vector.multi_reduction <maximumf>, %15, %cst_11 [1] : vector<4x4x2xf32> to vector<4x2xf32>
    %c0_12 = arith.constant 0 : index
    %c0_13 = arith.constant 0 : index
    %17 = vector.load %arg8[%c0_12, %c0_13] : memref<4x2xf32, #tpu.memory_space<vmem>>, vector<4x2xf32>
    %18 = arith.maximumf %17, %13 : vector<4x2xf32>
    %c0_14 = arith.constant 0 : index
    %c0_15 = arith.constant 0 : index
    %19 = vector.load %arg8[%c0_14, %c0_15] : memref<4x2xf32, #tpu.memory_space<vmem>>, vector<4x2xf32>
    tpu.vector_store %arg8[%c0_14, %c0_15], %18 {strides = array<i32>} : memref<4x2xf32, #tpu.memory_space<vmem>>, vector<4x2xf32>,
    %c0_16 = arith.constant 0 : index
    %c0_17 = arith.constant 0 : index
    %20 = vector.load %arg9[%c0_16, %c0_17] : memref<4x2xf32, #tpu.memory_space<vmem>>, vector<4x2xf32>
    %21 = arith.maximumf %20, %16 : vector<4x2xf32>
    %c0_18 = arith.constant 0 : index
    %c0_19 = arith.constant 0 : index
    %22 = vector.load %arg9[%c0_18, %c0_19] : memref<4x2xf32, #tpu.memory_space<vmem>>, vector<4x2xf32>
    tpu.vector_store %arg9[%c0_18, %c0_19], %21 {strides = array<i32>} : memref<4x2xf32, #tpu.memory_space<vmem>>, vector<4x2xf32>,
    %c0_i32_20 = arith.constant 0 : i32
    %23 = arith.cmpi eq, %arg2, %c0_i32_20 : i32
    %24 = arith.extui %23 : i1 to i32
    %c0_i32_21 = arith.constant 0 : i32
    %25 = arith.cmpi ne, %24, %c0_i32_21 : i32
    scf.if %25 {
      %c0_22 = arith.constant 0 : index
      %c0_23 = arith.constant 0 : index
      %26 = vector.load %arg8[%c0_22, %c0_23] : memref<4x2xf32, #tpu.memory_space<vmem>>, vector<4x2xf32>
      %27 = vector.shape_cast %26 : vector<4x2xf32> to vector<1x1x4x2xf32>
      %c0_24 = arith.constant 0 : index
      %c0_25 = arith.constant 0 : index
      %c0_26 = arith.constant 0 : index
      %c0_27 = arith.constant 0 : index
      %28 = vector.load %arg6[%c0_24, %c0_25, %c0_26, %c0_27] : memref<1x1x4x2xf32, #tpu.memory_space<vmem>>, vector<1x1x4x2xf32>
      tpu.vector_store %arg6[%c0_24, %c0_25, %c0_26, %c0_27], %27 {strides = array<i32>} : memref<1x1x4x2xf32, #tpu.memory_space<vmem>>, vector<1x1x4x2xf32>,
      %c0_28 = arith.constant 0 : index
      %c0_29 = arith.constant 0 : index
      %29 = vector.load %arg9[%c0_28, %c0_29] : memref<4x2xf32, #tpu.memory_space<vmem>>, vector<4x2xf32>
      %30 = vector.shape_cast %29 : vector<4x2xf32> to vector<1x1x4x2xf32>
      %c0_30 = arith.constant 0 : index
      %c0_31 = arith.constant 0 : index
      %c0_32 = arith.constant 0 : index
      %c0_33 = arith.constant 0 : index
      %31 = vector.load %arg7[%c0_30, %c0_31, %c0_32, %c0_33] : memref<1x1x4x2xf32, #tpu.memory_space<vmem>>, vector<1x1x4x2xf32>
      tpu.vector_store %arg7[%c0_30, %c0_31, %c0_32, %c0_33], %30 {strides = array<i32>} : memref<1x1x4x2xf32, #tpu.memory_space<vmem>>, vector<1x1x4x2xf32>,
    } else {
    }
    return
  }
  func.func @transform_0(%arg0: i32, %arg1: i32, %arg2: i32) -> (i32, i32, i32, i32) {
    %c1_i32 = arith.constant 1 : i32
    %0 = arith.muli %arg1, %c1_i32 : i32
    %1 = arith.addi %0, %arg2 : i32
    %c0_i32 = arith.constant 0 : i32
    %c0_i32_0 = arith.constant 0 : i32
    %c0_i32_1 = arith.constant 0 : i32
    return %arg0, %1, %c0_i32, %c0_i32_0 : i32, i32, i32, i32
  }
  func.func @transform_1(%arg0: i32, %arg1: i32, %arg2: i32) -> (i32, i32) {
    %c0_i32 = arith.constant 0 : i32
    %c0_i32_0 = arith.constant 0 : i32
    %c0_i32_1 = arith.constant 0 : i32
    return %c0_i32, %c0_i32_0 : i32, i32
  }
  func.func @transform_2(%arg0: i32, %arg1: i32, %arg2: i32) -> (i32, i32) {
    %c0_i32 = arith.constant 0 : i32
    %c0_i32_0 = arith.constant 0 : i32
    %c0_i32_1 = arith.constant 0 : i32
    return %c0_i32, %c0_i32_0 : i32, i32
  }
  func.func @transform_3(%arg0: i32, %arg1: i32, %arg2: i32) -> (i32, i32, i32, i32) {
    %c0_i32 = arith.constant 0 : i32
    %c0_i32_0 = arith.constant 0 : i32
    %c0_i32_1 = arith.constant 0 : i32
    return %arg0, %arg1, %c0_i32, %c0_i32_0 : i32, i32, i32, i32
  }
  func.func @transform_4(%arg0: i32, %arg1: i32, %arg2: i32) -> (i32, i32, i32, i32) {
    %c0_i32 = arith.constant 0 : i32
    %c0_i32_0 = arith.constant 0 : i32
    %c0_i32_1 = arith.constant 0 : i32
    return %arg0, %arg1, %c0_i32, %c0_i32_0 : i32, i32, i32, i32
  }
}

module attributes {stable_mosaic.version = 11 : i64} {
  func.func @_bilinear_conv2_kernel(%arg0: i32, %arg1: i32, %arg2: memref<4x4x16x8xbf16, #tpu.memory_space<vmem>>, %arg3: memref<1x4x4x8xbf16, #tpu.memory_space<vmem>>, %arg4: memref<1x4x4x8xbf16, #tpu.memory_space<vmem>>, %arg5: memref<8x8xbf16, #tpu.memory_space<vmem>>, %arg6: memref<1x8xf32, #tpu.memory_space<vmem>>, %arg7: memref<4x4x16x8xbf16, #tpu.memory_space<vmem>>) attributes {dimension_semantics = [#tpu.dimension_semantics<parallel>, #tpu.dimension_semantics<parallel>], iteration_bounds = array<i64: 2, 1>, scalar_prefetch = 0 : i64, scratch_operands = 0 : i64, tpu.core_type = #tpu.core_type<tc>, window_params = [{transform_indices = @transform_0, window_bounds = array<i64: 4, 4, 16, 8>}, {transform_indices = @transform_1, window_bounds = array<i64: 1, 4, 4, 8>}, {transform_indices = @transform_2, window_bounds = array<i64: 1, 4, 4, 8>}, {pipeline_mode = #tpu.pipeline_mode<synchronous>, transform_indices = @transform_3, window_bounds = array<i64: 8, 8>}, {pipeline_mode = #tpu.pipeline_mode<synchronous>, transform_indices = @transform_4, window_bounds = array<i64: 1, 8>}, {transform_indices = @transform_5, window_bounds = array<i64: 4, 4, 16, 8>}]} {
    %c0 = arith.constant 0 : index
    %c0_0 = arith.constant 0 : index
    %c0_1 = arith.constant 0 : index
    %c0_2 = arith.constant 0 : index
    %0 = vector.load %arg3[%c0, %c0_0, %c0_1, %c0_2] : memref<1x4x4x8xbf16, #tpu.memory_space<vmem>>, vector<1x4x4x8xbf16>
    %1 = vector.shape_cast %0 : vector<1x4x4x8xbf16> to vector<4x4x8xbf16>
    %c0_3 = arith.constant 0 : index
    %c0_4 = arith.constant 0 : index
    %c0_5 = arith.constant 0 : index
    %c0_6 = arith.constant 0 : index
    %2 = vector.load %arg4[%c0_3, %c0_4, %c0_5, %c0_6] : memref<1x4x4x8xbf16, #tpu.memory_space<vmem>>, vector<1x4x4x8xbf16>
    %3 = vector.shape_cast %2 : vector<1x4x4x8xbf16> to vector<4x4x8xbf16>
    %c0_7 = arith.constant 0 : index
    %c0_8 = arith.constant 0 : index
    %4 = vector.load %arg5[%c0_7, %c0_8] : memref<8x8xbf16, #tpu.memory_space<vmem>>, vector<8x8xbf16>
    %c0_9 = arith.constant 0 : index
    %c0_10 = arith.constant 0 : index
    %5 = vector.load %arg6[%c0_9, %c0_10] : memref<1x8xf32, #tpu.memory_space<vmem>>, vector<1x8xf32>
    %6 = vector.extract_strided_slice %1 {offsets = [0, 0, 0], sizes = [1, 1, 8], strides = [1, 1, 1]} : vector<4x4x8xbf16> to vector<1x1x8xbf16>
    %7 = vector.shape_cast %6 : vector<1x1x8xbf16> to vector<8xbf16>
    %8 = vector.shape_cast %7 : vector<8xbf16> to vector<1x1x8xbf16>
    %c0_11 = arith.constant 0 : index
    %c0_12 = arith.constant 0 : index
    %c0_13 = arith.constant 0 : index
    %c0_14 = arith.constant 0 : index
    %9 = vector.load %arg2[%c0_11, %c0_12, %c0_13, %c0_14] : memref<4x4x16x8xbf16, #tpu.memory_space<vmem>>, vector<1x4x16x8xbf16>
    %10 = vector.shape_cast %9 : vector<1x4x16x8xbf16> to vector<4x16x8xbf16>
    %11 = vector.broadcast %8 : vector<1x1x8xbf16> to vector<4x16x8xbf16>
    %12 = arith.mulf %11, %10 : vector<4x16x8xbf16>
    %13 = vector.extract_strided_slice %1 {offsets = [0, 1, 0], sizes = [1, 1, 8], strides = [1, 1, 1]} : vector<4x4x8xbf16> to vector<1x1x8xbf16>
    %14 = vector.shape_cast %13 : vector<1x1x8xbf16> to vector<8xbf16>
    %15 = vector.shape_cast %14 : vector<8xbf16> to vector<1x1x8xbf16>
    %c1 = arith.constant 1 : index
    %c0_15 = arith.constant 0 : index
    %c0_16 = arith.constant 0 : index
    %c0_17 = arith.constant 0 : index
    %16 = vector.load %arg2[%c1, %c0_15, %c0_16, %c0_17] : memref<4x4x16x8xbf16, #tpu.memory_space<vmem>>, vector<1x4x16x8xbf16>
    %17 = vector.shape_cast %16 : vector<1x4x16x8xbf16> to vector<4x16x8xbf16>
    %18 = vector.broadcast %15 : vector<1x1x8xbf16> to vector<4x16x8xbf16>
    %19 = arith.mulf %18, %17 : vector<4x16x8xbf16>
    %20 = arith.addf %12, %19 : vector<4x16x8xbf16>
    %21 = vector.extract_strided_slice %1 {offsets = [0, 2, 0], sizes = [1, 1, 8], strides = [1, 1, 1]} : vector<4x4x8xbf16> to vector<1x1x8xbf16>
    %22 = vector.shape_cast %21 : vector<1x1x8xbf16> to vector<8xbf16>
    %23 = vector.shape_cast %22 : vector<8xbf16> to vector<1x1x8xbf16>
    %c2 = arith.constant 2 : index
    %c0_18 = arith.constant 0 : index
    %c0_19 = arith.constant 0 : index
    %c0_20 = arith.constant 0 : index
    %24 = vector.load %arg2[%c2, %c0_18, %c0_19, %c0_20] : memref<4x4x16x8xbf16, #tpu.memory_space<vmem>>, vector<1x4x16x8xbf16>
    %25 = vector.shape_cast %24 : vector<1x4x16x8xbf16> to vector<4x16x8xbf16>
    %26 = vector.broadcast %23 : vector<1x1x8xbf16> to vector<4x16x8xbf16>
    %27 = arith.mulf %26, %25 : vector<4x16x8xbf16>
    %28 = arith.addf %20, %27 : vector<4x16x8xbf16>
    %29 = vector.extract_strided_slice %1 {offsets = [0, 3, 0], sizes = [1, 1, 8], strides = [1, 1, 1]} : vector<4x4x8xbf16> to vector<1x1x8xbf16>
    %30 = vector.shape_cast %29 : vector<1x1x8xbf16> to vector<8xbf16>
    %31 = vector.shape_cast %30 : vector<8xbf16> to vector<1x1x8xbf16>
    %c3 = arith.constant 3 : index
    %c0_21 = arith.constant 0 : index
    %c0_22 = arith.constant 0 : index
    %c0_23 = arith.constant 0 : index
    %32 = vector.load %arg2[%c3, %c0_21, %c0_22, %c0_23] : memref<4x4x16x8xbf16, #tpu.memory_space<vmem>>, vector<1x4x16x8xbf16>
    %33 = vector.shape_cast %32 : vector<1x4x16x8xbf16> to vector<4x16x8xbf16>
    %34 = vector.broadcast %31 : vector<1x1x8xbf16> to vector<4x16x8xbf16>
    %35 = arith.mulf %34, %33 : vector<4x16x8xbf16>
    %36 = arith.addf %28, %35 : vector<4x16x8xbf16>
    %37 = vector.shape_cast %36 : vector<4x16x8xbf16> to vector<4x4x4x8xbf16>
    %38 = vector.extract_strided_slice %3 {offsets = [0, 0, 0], sizes = [1, 4, 8], strides = [1, 1, 1]} : vector<4x4x8xbf16> to vector<1x4x8xbf16>
    %39 = vector.shape_cast %38 : vector<1x4x8xbf16> to vector<4x8xbf16>
    %40 = vector.shape_cast %39 : vector<4x8xbf16> to vector<1x4x1x8xbf16>
    %41 = vector.extract_strided_slice %37 {offsets = [0, 0, 0, 0], sizes = [4, 1, 4, 8], strides = [1, 1, 1, 1]} : vector<4x4x4x8xbf16> to vector<4x1x4x8xbf16>
    %42 = vector.shape_cast %41 : vector<4x1x4x8xbf16> to vector<4x4x8xbf16>
    %43 = vector.shape_cast %42 : vector<4x4x8xbf16> to vector<4x1x4x8xbf16>
    %44 = vector.broadcast %40 : vector<1x4x1x8xbf16> to vector<4x4x4x8xbf16>
    %45 = vector.broadcast %43 : vector<4x1x4x8xbf16> to vector<4x4x4x8xbf16>
    %46 = arith.mulf %44, %45 : vector<4x4x4x8xbf16>
    %47 = vector.extract_strided_slice %3 {offsets = [1, 0, 0], sizes = [1, 4, 8], strides = [1, 1, 1]} : vector<4x4x8xbf16> to vector<1x4x8xbf16>
    %48 = vector.shape_cast %47 : vector<1x4x8xbf16> to vector<4x8xbf16>
    %49 = vector.shape_cast %48 : vector<4x8xbf16> to vector<1x4x1x8xbf16>
    %50 = vector.extract_strided_slice %37 {offsets = [0, 1, 0, 0], sizes = [4, 1, 4, 8], strides = [1, 1, 1, 1]} : vector<4x4x4x8xbf16> to vector<4x1x4x8xbf16>
    %51 = vector.shape_cast %50 : vector<4x1x4x8xbf16> to vector<4x4x8xbf16>
    %52 = vector.shape_cast %51 : vector<4x4x8xbf16> to vector<4x1x4x8xbf16>
    %53 = vector.broadcast %49 : vector<1x4x1x8xbf16> to vector<4x4x4x8xbf16>
    %54 = vector.broadcast %52 : vector<4x1x4x8xbf16> to vector<4x4x4x8xbf16>
    %55 = arith.mulf %53, %54 : vector<4x4x4x8xbf16>
    %56 = arith.addf %46, %55 : vector<4x4x4x8xbf16>
    %57 = vector.extract_strided_slice %3 {offsets = [2, 0, 0], sizes = [1, 4, 8], strides = [1, 1, 1]} : vector<4x4x8xbf16> to vector<1x4x8xbf16>
    %58 = vector.shape_cast %57 : vector<1x4x8xbf16> to vector<4x8xbf16>
    %59 = vector.shape_cast %58 : vector<4x8xbf16> to vector<1x4x1x8xbf16>
    %60 = vector.extract_strided_slice %37 {offsets = [0, 2, 0, 0], sizes = [4, 1, 4, 8], strides = [1, 1, 1, 1]} : vector<4x4x4x8xbf16> to vector<4x1x4x8xbf16>
    %61 = vector.shape_cast %60 : vector<4x1x4x8xbf16> to vector<4x4x8xbf16>
    %62 = vector.shape_cast %61 : vector<4x4x8xbf16> to vector<4x1x4x8xbf16>
    %63 = vector.broadcast %59 : vector<1x4x1x8xbf16> to vector<4x4x4x8xbf16>
    %64 = vector.broadcast %62 : vector<4x1x4x8xbf16> to vector<4x4x4x8xbf16>
    %65 = arith.mulf %63, %64 : vector<4x4x4x8xbf16>
    %66 = arith.addf %56, %65 : vector<4x4x4x8xbf16>
    %67 = vector.extract_strided_slice %3 {offsets = [3, 0, 0], sizes = [1, 4, 8], strides = [1, 1, 1]} : vector<4x4x8xbf16> to vector<1x4x8xbf16>
    %68 = vector.shape_cast %67 : vector<1x4x8xbf16> to vector<4x8xbf16>
    %69 = vector.shape_cast %68 : vector<4x8xbf16> to vector<1x4x1x8xbf16>
    %70 = vector.extract_strided_slice %37 {offsets = [0, 3, 0, 0], sizes = [4, 1, 4, 8], strides = [1, 1, 1, 1]} : vector<4x4x4x8xbf16> to vector<4x1x4x8xbf16>
    %71 = vector.shape_cast %70 : vector<4x1x4x8xbf16> to vector<4x4x8xbf16>
    %72 = vector.shape_cast %71 : vector<4x4x8xbf16> to vector<4x1x4x8xbf16>
    %73 = vector.broadcast %69 : vector<1x4x1x8xbf16> to vector<4x4x4x8xbf16>
    %74 = vector.broadcast %72 : vector<4x1x4x8xbf16> to vector<4x4x4x8xbf16>
    %75 = arith.mulf %73, %74 : vector<4x4x4x8xbf16>
    %76 = arith.addf %66, %75 : vector<4x4x4x8xbf16>
    %77 = vector.shape_cast %76 : vector<4x4x4x8xbf16> to vector<64x8xbf16>
    %cst = arith.constant dense<0.000000e+00> : vector<64x8xf32>
    %78 = tpu.matmul %77, %4, %cst {dimension_numbers = #tpu.dot_dimension_numbers<[1], [0], [0], [1], [0, 0, 1, 1], [], []>} : vector<64x8xbf16>, vector<8x8xbf16>, vector<64x8xf32> -> vector<64x8xf32>
    %79 = vector.broadcast %5 : vector<1x8xf32> to vector<64x8xf32>
    %80 = arith.addf %78, %79 : vector<64x8xf32>
    %cst_24 = arith.constant 0.000000e+00 : f32
    %81 = vector.broadcast %cst_24 : f32 to vector<64x8xf32>
    %82 = arith.maximumf %80, %81 : vector<64x8xf32>
    %83 = vector.shape_cast %82 : vector<64x8xf32> to vector<4x16x8xf32>
    %84 = arith.truncf %83 : vector<4x16x8xf32> to vector<4x16x8xbf16>
    %c0_25 = arith.constant 0 : index
    %c0_26 = arith.constant 0 : index
    %c0_27 = arith.constant 0 : index
    %c0_28 = arith.constant 0 : index
    %85 = vector.load %arg7[%c0_25, %c0_26, %c0_27, %c0_28] : memref<4x4x16x8xbf16, #tpu.memory_space<vmem>>, vector<1x4x16x8xbf16>
    %86 = vector.shape_cast %85 : vector<1x4x16x8xbf16> to vector<4x16x8xbf16>
    %87 = vector.shape_cast %84 : vector<4x16x8xbf16> to vector<1x4x16x8xbf16>
    tpu.vector_store %arg7[%c0_25, %c0_26, %c0_27, %c0_28], %87 {strides = array<i32>} : memref<4x4x16x8xbf16, #tpu.memory_space<vmem>>, vector<1x4x16x8xbf16>,
    %88 = vector.extract_strided_slice %1 {offsets = [1, 0, 0], sizes = [1, 1, 8], strides = [1, 1, 1]} : vector<4x4x8xbf16> to vector<1x1x8xbf16>
    %89 = vector.shape_cast %88 : vector<1x1x8xbf16> to vector<8xbf16>
    %90 = vector.shape_cast %89 : vector<8xbf16> to vector<1x1x8xbf16>
    %c0_29 = arith.constant 0 : index
    %c0_30 = arith.constant 0 : index
    %c0_31 = arith.constant 0 : index
    %c0_32 = arith.constant 0 : index
    %91 = vector.load %arg2[%c0_29, %c0_30, %c0_31, %c0_32] : memref<4x4x16x8xbf16, #tpu.memory_space<vmem>>, vector<1x4x16x8xbf16>
    %92 = vector.shape_cast %91 : vector<1x4x16x8xbf16> to vector<4x16x8xbf16>
    %93 = vector.broadcast %90 : vector<1x1x8xbf16> to vector<4x16x8xbf16>
    %94 = arith.mulf %93, %92 : vector<4x16x8xbf16>
    %95 = vector.extract_strided_slice %1 {offsets = [1, 1, 0], sizes = [1, 1, 8], strides = [1, 1, 1]} : vector<4x4x8xbf16> to vector<1x1x8xbf16>
    %96 = vector.shape_cast %95 : vector<1x1x8xbf16> to vector<8xbf16>
    %97 = vector.shape_cast %96 : vector<8xbf16> to vector<1x1x8xbf16>
    %c1_33 = arith.constant 1 : index
    %c0_34 = arith.constant 0 : index
    %c0_35 = arith.constant 0 : index
    %c0_36 = arith.constant 0 : index
    %98 = vector.load %arg2[%c1_33, %c0_34, %c0_35, %c0_36] : memref<4x4x16x8xbf16, #tpu.memory_space<vmem>>, vector<1x4x16x8xbf16>
    %99 = vector.shape_cast %98 : vector<1x4x16x8xbf16> to vector<4x16x8xbf16>
    %100 = vector.broadcast %97 : vector<1x1x8xbf16> to vector<4x16x8xbf16>
    %101 = arith.mulf %100, %99 : vector<4x16x8xbf16>
    %102 = arith.addf %94, %101 : vector<4x16x8xbf16>
    %103 = vector.extract_strided_slice %1 {offsets = [1, 2, 0], sizes = [1, 1, 8], strides = [1, 1, 1]} : vector<4x4x8xbf16> to vector<1x1x8xbf16>
    %104 = vector.shape_cast %103 : vector<1x1x8xbf16> to vector<8xbf16>
    %105 = vector.shape_cast %104 : vector<8xbf16> to vector<1x1x8xbf16>
    %c2_37 = arith.constant 2 : index
    %c0_38 = arith.constant 0 : index
    %c0_39 = arith.constant 0 : index
    %c0_40 = arith.constant 0 : index
    %106 = vector.load %arg2[%c2_37, %c0_38, %c0_39, %c0_40] : memref<4x4x16x8xbf16, #tpu.memory_space<vmem>>, vector<1x4x16x8xbf16>
    %107 = vector.shape_cast %106 : vector<1x4x16x8xbf16> to vector<4x16x8xbf16>
    %108 = vector.broadcast %105 : vector<1x1x8xbf16> to vector<4x16x8xbf16>
    %109 = arith.mulf %108, %107 : vector<4x16x8xbf16>
    %110 = arith.addf %102, %109 : vector<4x16x8xbf16>
    %111 = vector.extract_strided_slice %1 {offsets = [1, 3, 0], sizes = [1, 1, 8], strides = [1, 1, 1]} : vector<4x4x8xbf16> to vector<1x1x8xbf16>
    %112 = vector.shape_cast %111 : vector<1x1x8xbf16> to vector<8xbf16>
    %113 = vector.shape_cast %112 : vector<8xbf16> to vector<1x1x8xbf16>
    %c3_41 = arith.constant 3 : index
    %c0_42 = arith.constant 0 : index
    %c0_43 = arith.constant 0 : index
    %c0_44 = arith.constant 0 : index
    %114 = vector.load %arg2[%c3_41, %c0_42, %c0_43, %c0_44] : memref<4x4x16x8xbf16, #tpu.memory_space<vmem>>, vector<1x4x16x8xbf16>
    %115 = vector.shape_cast %114 : vector<1x4x16x8xbf16> to vector<4x16x8xbf16>
    %116 = vector.broadcast %113 : vector<1x1x8xbf16> to vector<4x16x8xbf16>
    %117 = arith.mulf %116, %115 : vector<4x16x8xbf16>
    %118 = arith.addf %110, %117 : vector<4x16x8xbf16>
    %119 = vector.shape_cast %118 : vector<4x16x8xbf16> to vector<4x4x4x8xbf16>
    %120 = vector.extract_strided_slice %3 {offsets = [0, 0, 0], sizes = [1, 4, 8], strides = [1, 1, 1]} : vector<4x4x8xbf16> to vector<1x4x8xbf16>
    %121 = vector.shape_cast %120 : vector<1x4x8xbf16> to vector<4x8xbf16>
    %122 = vector.shape_cast %121 : vector<4x8xbf16> to vector<1x4x1x8xbf16>
    %123 = vector.extract_strided_slice %119 {offsets = [0, 0, 0, 0], sizes = [4, 1, 4, 8], strides = [1, 1, 1, 1]} : vector<4x4x4x8xbf16> to vector<4x1x4x8xbf16>
    %124 = vector.shape_cast %123 : vector<4x1x4x8xbf16> to vector<4x4x8xbf16>
    %125 = vector.shape_cast %124 : vector<4x4x8xbf16> to vector<4x1x4x8xbf16>
    %126 = vector.broadcast %122 : vector<1x4x1x8xbf16> to vector<4x4x4x8xbf16>
    %127 = vector.broadcast %125 : vector<4x1x4x8xbf16> to vector<4x4x4x8xbf16>
    %128 = arith.mulf %126, %127 : vector<4x4x4x8xbf16>
    %129 = vector.extract_strided_slice %3 {offsets = [1, 0, 0], sizes = [1, 4, 8], strides = [1, 1, 1]} : vector<4x4x8xbf16> to vector<1x4x8xbf16>
    %130 = vector.shape_cast %129 : vector<1x4x8xbf16> to vector<4x8xbf16>
    %131 = vector.shape_cast %130 : vector<4x8xbf16> to vector<1x4x1x8xbf16>
    %132 = vector.extract_strided_slice %119 {offsets = [0, 1, 0, 0], sizes = [4, 1, 4, 8], strides = [1, 1, 1, 1]} : vector<4x4x4x8xbf16> to vector<4x1x4x8xbf16>
    %133 = vector.shape_cast %132 : vector<4x1x4x8xbf16> to vector<4x4x8xbf16>
    %134 = vector.shape_cast %133 : vector<4x4x8xbf16> to vector<4x1x4x8xbf16>
    %135 = vector.broadcast %131 : vector<1x4x1x8xbf16> to vector<4x4x4x8xbf16>
    %136 = vector.broadcast %134 : vector<4x1x4x8xbf16> to vector<4x4x4x8xbf16>
    %137 = arith.mulf %135, %136 : vector<4x4x4x8xbf16>
    %138 = arith.addf %128, %137 : vector<4x4x4x8xbf16>
    %139 = vector.extract_strided_slice %3 {offsets = [2, 0, 0], sizes = [1, 4, 8], strides = [1, 1, 1]} : vector<4x4x8xbf16> to vector<1x4x8xbf16>
    %140 = vector.shape_cast %139 : vector<1x4x8xbf16> to vector<4x8xbf16>
    %141 = vector.shape_cast %140 : vector<4x8xbf16> to vector<1x4x1x8xbf16>
    %142 = vector.extract_strided_slice %119 {offsets = [0, 2, 0, 0], sizes = [4, 1, 4, 8], strides = [1, 1, 1, 1]} : vector<4x4x4x8xbf16> to vector<4x1x4x8xbf16>
    %143 = vector.shape_cast %142 : vector<4x1x4x8xbf16> to vector<4x4x8xbf16>
    %144 = vector.shape_cast %143 : vector<4x4x8xbf16> to vector<4x1x4x8xbf16>
    %145 = vector.broadcast %141 : vector<1x4x1x8xbf16> to vector<4x4x4x8xbf16>
    %146 = vector.broadcast %144 : vector<4x1x4x8xbf16> to vector<4x4x4x8xbf16>
    %147 = arith.mulf %145, %146 : vector<4x4x4x8xbf16>
    %148 = arith.addf %138, %147 : vector<4x4x4x8xbf16>
    %149 = vector.extract_strided_slice %3 {offsets = [3, 0, 0], sizes = [1, 4, 8], strides = [1, 1, 1]} : vector<4x4x8xbf16> to vector<1x4x8xbf16>
    %150 = vector.shape_cast %149 : vector<1x4x8xbf16> to vector<4x8xbf16>
    %151 = vector.shape_cast %150 : vector<4x8xbf16> to vector<1x4x1x8xbf16>
    %152 = vector.extract_strided_slice %119 {offsets = [0, 3, 0, 0], sizes = [4, 1, 4, 8], strides = [1, 1, 1, 1]} : vector<4x4x4x8xbf16> to vector<4x1x4x8xbf16>
    %153 = vector.shape_cast %152 : vector<4x1x4x8xbf16> to vector<4x4x8xbf16>
    %154 = vector.shape_cast %153 : vector<4x4x8xbf16> to vector<4x1x4x8xbf16>
    %155 = vector.broadcast %151 : vector<1x4x1x8xbf16> to vector<4x4x4x8xbf16>
    %156 = vector.broadcast %154 : vector<4x1x4x8xbf16> to vector<4x4x4x8xbf16>
    %157 = arith.mulf %155, %156 : vector<4x4x4x8xbf16>
    %158 = arith.addf %148, %157 : vector<4x4x4x8xbf16>
    %159 = vector.shape_cast %158 : vector<4x4x4x8xbf16> to vector<64x8xbf16>
    %cst_45 = arith.constant dense<0.000000e+00> : vector<64x8xf32>
    %160 = tpu.matmul %159, %4, %cst_45 {dimension_numbers = #tpu.dot_dimension_numbers<[1], [0], [0], [1], [0, 0, 1, 1], [], []>} : vector<64x8xbf16>, vector<8x8xbf16>, vector<64x8xf32> -> vector<64x8xf32>
    %161 = vector.broadcast %5 : vector<1x8xf32> to vector<64x8xf32>
    %162 = arith.addf %160, %161 : vector<64x8xf32>
    %cst_46 = arith.constant 0.000000e+00 : f32
    %163 = vector.broadcast %cst_46 : f32 to vector<64x8xf32>
    %164 = arith.maximumf %162, %163 : vector<64x8xf32>
    %165 = vector.shape_cast %164 : vector<64x8xf32> to vector<4x16x8xf32>
    %166 = arith.truncf %165 : vector<4x16x8xf32> to vector<4x16x8xbf16>
    %c1_47 = arith.constant 1 : index
    %c0_48 = arith.constant 0 : index
    %c0_49 = arith.constant 0 : index
    %c0_50 = arith.constant 0 : index
    %167 = vector.load %arg7[%c1_47, %c0_48, %c0_49, %c0_50] : memref<4x4x16x8xbf16, #tpu.memory_space<vmem>>, vector<1x4x16x8xbf16>
    %168 = vector.shape_cast %167 : vector<1x4x16x8xbf16> to vector<4x16x8xbf16>
    %169 = vector.shape_cast %166 : vector<4x16x8xbf16> to vector<1x4x16x8xbf16>
    tpu.vector_store %arg7[%c1_47, %c0_48, %c0_49, %c0_50], %169 {strides = array<i32>} : memref<4x4x16x8xbf16, #tpu.memory_space<vmem>>, vector<1x4x16x8xbf16>,
    %170 = vector.extract_strided_slice %1 {offsets = [2, 0, 0], sizes = [1, 1, 8], strides = [1, 1, 1]} : vector<4x4x8xbf16> to vector<1x1x8xbf16>
    %171 = vector.shape_cast %170 : vector<1x1x8xbf16> to vector<8xbf16>
    %172 = vector.shape_cast %171 : vector<8xbf16> to vector<1x1x8xbf16>
    %c0_51 = arith.constant 0 : index
    %c0_52 = arith.constant 0 : index
    %c0_53 = arith.constant 0 : index
    %c0_54 = arith.constant 0 : index
    %173 = vector.load %arg2[%c0_51, %c0_52, %c0_53, %c0_54] : memref<4x4x16x8xbf16, #tpu.memory_space<vmem>>, vector<1x4x16x8xbf16>
    %174 = vector.shape_cast %173 : vector<1x4x16x8xbf16> to vector<4x16x8xbf16>
    %175 = vector.broadcast %172 : vector<1x1x8xbf16> to vector<4x16x8xbf16>
    %176 = arith.mulf %175, %174 : vector<4x16x8xbf16>
    %177 = vector.extract_strided_slice %1 {offsets = [2, 1, 0], sizes = [1, 1, 8], strides = [1, 1, 1]} : vector<4x4x8xbf16> to vector<1x1x8xbf16>
    %178 = vector.shape_cast %177 : vector<1x1x8xbf16> to vector<8xbf16>
    %179 = vector.shape_cast %178 : vector<8xbf16> to vector<1x1x8xbf16>
    %c1_55 = arith.constant 1 : index
    %c0_56 = arith.constant 0 : index
    %c0_57 = arith.constant 0 : index
    %c0_58 = arith.constant 0 : index
    %180 = vector.load %arg2[%c1_55, %c0_56, %c0_57, %c0_58] : memref<4x4x16x8xbf16, #tpu.memory_space<vmem>>, vector<1x4x16x8xbf16>
    %181 = vector.shape_cast %180 : vector<1x4x16x8xbf16> to vector<4x16x8xbf16>
    %182 = vector.broadcast %179 : vector<1x1x8xbf16> to vector<4x16x8xbf16>
    %183 = arith.mulf %182, %181 : vector<4x16x8xbf16>
    %184 = arith.addf %176, %183 : vector<4x16x8xbf16>
    %185 = vector.extract_strided_slice %1 {offsets = [2, 2, 0], sizes = [1, 1, 8], strides = [1, 1, 1]} : vector<4x4x8xbf16> to vector<1x1x8xbf16>
    %186 = vector.shape_cast %185 : vector<1x1x8xbf16> to vector<8xbf16>
    %187 = vector.shape_cast %186 : vector<8xbf16> to vector<1x1x8xbf16>
    %c2_59 = arith.constant 2 : index
    %c0_60 = arith.constant 0 : index
    %c0_61 = arith.constant 0 : index
    %c0_62 = arith.constant 0 : index
    %188 = vector.load %arg2[%c2_59, %c0_60, %c0_61, %c0_62] : memref<4x4x16x8xbf16, #tpu.memory_space<vmem>>, vector<1x4x16x8xbf16>
    %189 = vector.shape_cast %188 : vector<1x4x16x8xbf16> to vector<4x16x8xbf16>
    %190 = vector.broadcast %187 : vector<1x1x8xbf16> to vector<4x16x8xbf16>
    %191 = arith.mulf %190, %189 : vector<4x16x8xbf16>
    %192 = arith.addf %184, %191 : vector<4x16x8xbf16>
    %193 = vector.extract_strided_slice %1 {offsets = [2, 3, 0], sizes = [1, 1, 8], strides = [1, 1, 1]} : vector<4x4x8xbf16> to vector<1x1x8xbf16>
    %194 = vector.shape_cast %193 : vector<1x1x8xbf16> to vector<8xbf16>
    %195 = vector.shape_cast %194 : vector<8xbf16> to vector<1x1x8xbf16>
    %c3_63 = arith.constant 3 : index
    %c0_64 = arith.constant 0 : index
    %c0_65 = arith.constant 0 : index
    %c0_66 = arith.constant 0 : index
    %196 = vector.load %arg2[%c3_63, %c0_64, %c0_65, %c0_66] : memref<4x4x16x8xbf16, #tpu.memory_space<vmem>>, vector<1x4x16x8xbf16>
    %197 = vector.shape_cast %196 : vector<1x4x16x8xbf16> to vector<4x16x8xbf16>
    %198 = vector.broadcast %195 : vector<1x1x8xbf16> to vector<4x16x8xbf16>
    %199 = arith.mulf %198, %197 : vector<4x16x8xbf16>
    %200 = arith.addf %192, %199 : vector<4x16x8xbf16>
    %201 = vector.shape_cast %200 : vector<4x16x8xbf16> to vector<4x4x4x8xbf16>
    %202 = vector.extract_strided_slice %3 {offsets = [0, 0, 0], sizes = [1, 4, 8], strides = [1, 1, 1]} : vector<4x4x8xbf16> to vector<1x4x8xbf16>
    %203 = vector.shape_cast %202 : vector<1x4x8xbf16> to vector<4x8xbf16>
    %204 = vector.shape_cast %203 : vector<4x8xbf16> to vector<1x4x1x8xbf16>
    %205 = vector.extract_strided_slice %201 {offsets = [0, 0, 0, 0], sizes = [4, 1, 4, 8], strides = [1, 1, 1, 1]} : vector<4x4x4x8xbf16> to vector<4x1x4x8xbf16>
    %206 = vector.shape_cast %205 : vector<4x1x4x8xbf16> to vector<4x4x8xbf16>
    %207 = vector.shape_cast %206 : vector<4x4x8xbf16> to vector<4x1x4x8xbf16>
    %208 = vector.broadcast %204 : vector<1x4x1x8xbf16> to vector<4x4x4x8xbf16>
    %209 = vector.broadcast %207 : vector<4x1x4x8xbf16> to vector<4x4x4x8xbf16>
    %210 = arith.mulf %208, %209 : vector<4x4x4x8xbf16>
    %211 = vector.extract_strided_slice %3 {offsets = [1, 0, 0], sizes = [1, 4, 8], strides = [1, 1, 1]} : vector<4x4x8xbf16> to vector<1x4x8xbf16>
    %212 = vector.shape_cast %211 : vector<1x4x8xbf16> to vector<4x8xbf16>
    %213 = vector.shape_cast %212 : vector<4x8xbf16> to vector<1x4x1x8xbf16>
    %214 = vector.extract_strided_slice %201 {offsets = [0, 1, 0, 0], sizes = [4, 1, 4, 8], strides = [1, 1, 1, 1]} : vector<4x4x4x8xbf16> to vector<4x1x4x8xbf16>
    %215 = vector.shape_cast %214 : vector<4x1x4x8xbf16> to vector<4x4x8xbf16>
    %216 = vector.shape_cast %215 : vector<4x4x8xbf16> to vector<4x1x4x8xbf16>
    %217 = vector.broadcast %213 : vector<1x4x1x8xbf16> to vector<4x4x4x8xbf16>
    %218 = vector.broadcast %216 : vector<4x1x4x8xbf16> to vector<4x4x4x8xbf16>
    %219 = arith.mulf %217, %218 : vector<4x4x4x8xbf16>
    %220 = arith.addf %210, %219 : vector<4x4x4x8xbf16>
    %221 = vector.extract_strided_slice %3 {offsets = [2, 0, 0], sizes = [1, 4, 8], strides = [1, 1, 1]} : vector<4x4x8xbf16> to vector<1x4x8xbf16>
    %222 = vector.shape_cast %221 : vector<1x4x8xbf16> to vector<4x8xbf16>
    %223 = vector.shape_cast %222 : vector<4x8xbf16> to vector<1x4x1x8xbf16>
    %224 = vector.extract_strided_slice %201 {offsets = [0, 2, 0, 0], sizes = [4, 1, 4, 8], strides = [1, 1, 1, 1]} : vector<4x4x4x8xbf16> to vector<4x1x4x8xbf16>
    %225 = vector.shape_cast %224 : vector<4x1x4x8xbf16> to vector<4x4x8xbf16>
    %226 = vector.shape_cast %225 : vector<4x4x8xbf16> to vector<4x1x4x8xbf16>
    %227 = vector.broadcast %223 : vector<1x4x1x8xbf16> to vector<4x4x4x8xbf16>
    %228 = vector.broadcast %226 : vector<4x1x4x8xbf16> to vector<4x4x4x8xbf16>
    %229 = arith.mulf %227, %228 : vector<4x4x4x8xbf16>
    %230 = arith.addf %220, %229 : vector<4x4x4x8xbf16>
    %231 = vector.extract_strided_slice %3 {offsets = [3, 0, 0], sizes = [1, 4, 8], strides = [1, 1, 1]} : vector<4x4x8xbf16> to vector<1x4x8xbf16>
    %232 = vector.shape_cast %231 : vector<1x4x8xbf16> to vector<4x8xbf16>
    %233 = vector.shape_cast %232 : vector<4x8xbf16> to vector<1x4x1x8xbf16>
    %234 = vector.extract_strided_slice %201 {offsets = [0, 3, 0, 0], sizes = [4, 1, 4, 8], strides = [1, 1, 1, 1]} : vector<4x4x4x8xbf16> to vector<4x1x4x8xbf16>
    %235 = vector.shape_cast %234 : vector<4x1x4x8xbf16> to vector<4x4x8xbf16>
    %236 = vector.shape_cast %235 : vector<4x4x8xbf16> to vector<4x1x4x8xbf16>
    %237 = vector.broadcast %233 : vector<1x4x1x8xbf16> to vector<4x4x4x8xbf16>
    %238 = vector.broadcast %236 : vector<4x1x4x8xbf16> to vector<4x4x4x8xbf16>
    %239 = arith.mulf %237, %238 : vector<4x4x4x8xbf16>
    %240 = arith.addf %230, %239 : vector<4x4x4x8xbf16>
    %241 = vector.shape_cast %240 : vector<4x4x4x8xbf16> to vector<64x8xbf16>
    %cst_67 = arith.constant dense<0.000000e+00> : vector<64x8xf32>
    %242 = tpu.matmul %241, %4, %cst_67 {dimension_numbers = #tpu.dot_dimension_numbers<[1], [0], [0], [1], [0, 0, 1, 1], [], []>} : vector<64x8xbf16>, vector<8x8xbf16>, vector<64x8xf32> -> vector<64x8xf32>
    %243 = vector.broadcast %5 : vector<1x8xf32> to vector<64x8xf32>
    %244 = arith.addf %242, %243 : vector<64x8xf32>
    %cst_68 = arith.constant 0.000000e+00 : f32
    %245 = vector.broadcast %cst_68 : f32 to vector<64x8xf32>
    %246 = arith.maximumf %244, %245 : vector<64x8xf32>
    %247 = vector.shape_cast %246 : vector<64x8xf32> to vector<4x16x8xf32>
    %248 = arith.truncf %247 : vector<4x16x8xf32> to vector<4x16x8xbf16>
    %c2_69 = arith.constant 2 : index
    %c0_70 = arith.constant 0 : index
    %c0_71 = arith.constant 0 : index
    %c0_72 = arith.constant 0 : index
    %249 = vector.load %arg7[%c2_69, %c0_70, %c0_71, %c0_72] : memref<4x4x16x8xbf16, #tpu.memory_space<vmem>>, vector<1x4x16x8xbf16>
    %250 = vector.shape_cast %249 : vector<1x4x16x8xbf16> to vector<4x16x8xbf16>
    %251 = vector.shape_cast %248 : vector<4x16x8xbf16> to vector<1x4x16x8xbf16>
    tpu.vector_store %arg7[%c2_69, %c0_70, %c0_71, %c0_72], %251 {strides = array<i32>} : memref<4x4x16x8xbf16, #tpu.memory_space<vmem>>, vector<1x4x16x8xbf16>,
    %252 = vector.extract_strided_slice %1 {offsets = [3, 0, 0], sizes = [1, 1, 8], strides = [1, 1, 1]} : vector<4x4x8xbf16> to vector<1x1x8xbf16>
    %253 = vector.shape_cast %252 : vector<1x1x8xbf16> to vector<8xbf16>
    %254 = vector.shape_cast %253 : vector<8xbf16> to vector<1x1x8xbf16>
    %c0_73 = arith.constant 0 : index
    %c0_74 = arith.constant 0 : index
    %c0_75 = arith.constant 0 : index
    %c0_76 = arith.constant 0 : index
    %255 = vector.load %arg2[%c0_73, %c0_74, %c0_75, %c0_76] : memref<4x4x16x8xbf16, #tpu.memory_space<vmem>>, vector<1x4x16x8xbf16>
    %256 = vector.shape_cast %255 : vector<1x4x16x8xbf16> to vector<4x16x8xbf16>
    %257 = vector.broadcast %254 : vector<1x1x8xbf16> to vector<4x16x8xbf16>
    %258 = arith.mulf %257, %256 : vector<4x16x8xbf16>
    %259 = vector.extract_strided_slice %1 {offsets = [3, 1, 0], sizes = [1, 1, 8], strides = [1, 1, 1]} : vector<4x4x8xbf16> to vector<1x1x8xbf16>
    %260 = vector.shape_cast %259 : vector<1x1x8xbf16> to vector<8xbf16>
    %261 = vector.shape_cast %260 : vector<8xbf16> to vector<1x1x8xbf16>
    %c1_77 = arith.constant 1 : index
    %c0_78 = arith.constant 0 : index
    %c0_79 = arith.constant 0 : index
    %c0_80 = arith.constant 0 : index
    %262 = vector.load %arg2[%c1_77, %c0_78, %c0_79, %c0_80] : memref<4x4x16x8xbf16, #tpu.memory_space<vmem>>, vector<1x4x16x8xbf16>
    %263 = vector.shape_cast %262 : vector<1x4x16x8xbf16> to vector<4x16x8xbf16>
    %264 = vector.broadcast %261 : vector<1x1x8xbf16> to vector<4x16x8xbf16>
    %265 = arith.mulf %264, %263 : vector<4x16x8xbf16>
    %266 = arith.addf %258, %265 : vector<4x16x8xbf16>
    %267 = vector.extract_strided_slice %1 {offsets = [3, 2, 0], sizes = [1, 1, 8], strides = [1, 1, 1]} : vector<4x4x8xbf16> to vector<1x1x8xbf16>
    %268 = vector.shape_cast %267 : vector<1x1x8xbf16> to vector<8xbf16>
    %269 = vector.shape_cast %268 : vector<8xbf16> to vector<1x1x8xbf16>
    %c2_81 = arith.constant 2 : index
    %c0_82 = arith.constant 0 : index
    %c0_83 = arith.constant 0 : index
    %c0_84 = arith.constant 0 : index
    %270 = vector.load %arg2[%c2_81, %c0_82, %c0_83, %c0_84] : memref<4x4x16x8xbf16, #tpu.memory_space<vmem>>, vector<1x4x16x8xbf16>
    %271 = vector.shape_cast %270 : vector<1x4x16x8xbf16> to vector<4x16x8xbf16>
    %272 = vector.broadcast %269 : vector<1x1x8xbf16> to vector<4x16x8xbf16>
    %273 = arith.mulf %272, %271 : vector<4x16x8xbf16>
    %274 = arith.addf %266, %273 : vector<4x16x8xbf16>
    %275 = vector.extract_strided_slice %1 {offsets = [3, 3, 0], sizes = [1, 1, 8], strides = [1, 1, 1]} : vector<4x4x8xbf16> to vector<1x1x8xbf16>
    %276 = vector.shape_cast %275 : vector<1x1x8xbf16> to vector<8xbf16>
    %277 = vector.shape_cast %276 : vector<8xbf16> to vector<1x1x8xbf16>
    %c3_85 = arith.constant 3 : index
    %c0_86 = arith.constant 0 : index
    %c0_87 = arith.constant 0 : index
    %c0_88 = arith.constant 0 : index
    %278 = vector.load %arg2[%c3_85, %c0_86, %c0_87, %c0_88] : memref<4x4x16x8xbf16, #tpu.memory_space<vmem>>, vector<1x4x16x8xbf16>
    %279 = vector.shape_cast %278 : vector<1x4x16x8xbf16> to vector<4x16x8xbf16>
    %280 = vector.broadcast %277 : vector<1x1x8xbf16> to vector<4x16x8xbf16>
    %281 = arith.mulf %280, %279 : vector<4x16x8xbf16>
    %282 = arith.addf %274, %281 : vector<4x16x8xbf16>
    %283 = vector.shape_cast %282 : vector<4x16x8xbf16> to vector<4x4x4x8xbf16>
    %284 = vector.extract_strided_slice %3 {offsets = [0, 0, 0], sizes = [1, 4, 8], strides = [1, 1, 1]} : vector<4x4x8xbf16> to vector<1x4x8xbf16>
    %285 = vector.shape_cast %284 : vector<1x4x8xbf16> to vector<4x8xbf16>
    %286 = vector.shape_cast %285 : vector<4x8xbf16> to vector<1x4x1x8xbf16>
    %287 = vector.extract_strided_slice %283 {offsets = [0, 0, 0, 0], sizes = [4, 1, 4, 8], strides = [1, 1, 1, 1]} : vector<4x4x4x8xbf16> to vector<4x1x4x8xbf16>
    %288 = vector.shape_cast %287 : vector<4x1x4x8xbf16> to vector<4x4x8xbf16>
    %289 = vector.shape_cast %288 : vector<4x4x8xbf16> to vector<4x1x4x8xbf16>
    %290 = vector.broadcast %286 : vector<1x4x1x8xbf16> to vector<4x4x4x8xbf16>
    %291 = vector.broadcast %289 : vector<4x1x4x8xbf16> to vector<4x4x4x8xbf16>
    %292 = arith.mulf %290, %291 : vector<4x4x4x8xbf16>
    %293 = vector.extract_strided_slice %3 {offsets = [1, 0, 0], sizes = [1, 4, 8], strides = [1, 1, 1]} : vector<4x4x8xbf16> to vector<1x4x8xbf16>
    %294 = vector.shape_cast %293 : vector<1x4x8xbf16> to vector<4x8xbf16>
    %295 = vector.shape_cast %294 : vector<4x8xbf16> to vector<1x4x1x8xbf16>
    %296 = vector.extract_strided_slice %283 {offsets = [0, 1, 0, 0], sizes = [4, 1, 4, 8], strides = [1, 1, 1, 1]} : vector<4x4x4x8xbf16> to vector<4x1x4x8xbf16>
    %297 = vector.shape_cast %296 : vector<4x1x4x8xbf16> to vector<4x4x8xbf16>
    %298 = vector.shape_cast %297 : vector<4x4x8xbf16> to vector<4x1x4x8xbf16>
    %299 = vector.broadcast %295 : vector<1x4x1x8xbf16> to vector<4x4x4x8xbf16>
    %300 = vector.broadcast %298 : vector<4x1x4x8xbf16> to vector<4x4x4x8xbf16>
    %301 = arith.mulf %299, %300 : vector<4x4x4x8xbf16>
    %302 = arith.addf %292, %301 : vector<4x4x4x8xbf16>
    %303 = vector.extract_strided_slice %3 {offsets = [2, 0, 0], sizes = [1, 4, 8], strides = [1, 1, 1]} : vector<4x4x8xbf16> to vector<1x4x8xbf16>
    %304 = vector.shape_cast %303 : vector<1x4x8xbf16> to vector<4x8xbf16>
    %305 = vector.shape_cast %304 : vector<4x8xbf16> to vector<1x4x1x8xbf16>
    %306 = vector.extract_strided_slice %283 {offsets = [0, 2, 0, 0], sizes = [4, 1, 4, 8], strides = [1, 1, 1, 1]} : vector<4x4x4x8xbf16> to vector<4x1x4x8xbf16>
    %307 = vector.shape_cast %306 : vector<4x1x4x8xbf16> to vector<4x4x8xbf16>
    %308 = vector.shape_cast %307 : vector<4x4x8xbf16> to vector<4x1x4x8xbf16>
    %309 = vector.broadcast %305 : vector<1x4x1x8xbf16> to vector<4x4x4x8xbf16>
    %310 = vector.broadcast %308 : vector<4x1x4x8xbf16> to vector<4x4x4x8xbf16>
    %311 = arith.mulf %309, %310 : vector<4x4x4x8xbf16>
    %312 = arith.addf %302, %311 : vector<4x4x4x8xbf16>
    %313 = vector.extract_strided_slice %3 {offsets = [3, 0, 0], sizes = [1, 4, 8], strides = [1, 1, 1]} : vector<4x4x8xbf16> to vector<1x4x8xbf16>
    %314 = vector.shape_cast %313 : vector<1x4x8xbf16> to vector<4x8xbf16>
    %315 = vector.shape_cast %314 : vector<4x8xbf16> to vector<1x4x1x8xbf16>
    %316 = vector.extract_strided_slice %283 {offsets = [0, 3, 0, 0], sizes = [4, 1, 4, 8], strides = [1, 1, 1, 1]} : vector<4x4x4x8xbf16> to vector<4x1x4x8xbf16>
    %317 = vector.shape_cast %316 : vector<4x1x4x8xbf16> to vector<4x4x8xbf16>
    %318 = vector.shape_cast %317 : vector<4x4x8xbf16> to vector<4x1x4x8xbf16>
    %319 = vector.broadcast %315 : vector<1x4x1x8xbf16> to vector<4x4x4x8xbf16>
    %320 = vector.broadcast %318 : vector<4x1x4x8xbf16> to vector<4x4x4x8xbf16>
    %321 = arith.mulf %319, %320 : vector<4x4x4x8xbf16>
    %322 = arith.addf %312, %321 : vector<4x4x4x8xbf16>
    %323 = vector.shape_cast %322 : vector<4x4x4x8xbf16> to vector<64x8xbf16>
    %cst_89 = arith.constant dense<0.000000e+00> : vector<64x8xf32>
    %324 = tpu.matmul %323, %4, %cst_89 {dimension_numbers = #tpu.dot_dimension_numbers<[1], [0], [0], [1], [0, 0, 1, 1], [], []>} : vector<64x8xbf16>, vector<8x8xbf16>, vector<64x8xf32> -> vector<64x8xf32>
    %325 = vector.broadcast %5 : vector<1x8xf32> to vector<64x8xf32>
    %326 = arith.addf %324, %325 : vector<64x8xf32>
    %cst_90 = arith.constant 0.000000e+00 : f32
    %327 = vector.broadcast %cst_90 : f32 to vector<64x8xf32>
    %328 = arith.maximumf %326, %327 : vector<64x8xf32>
    %329 = vector.shape_cast %328 : vector<64x8xf32> to vector<4x16x8xf32>
    %330 = arith.truncf %329 : vector<4x16x8xf32> to vector<4x16x8xbf16>
    %c3_91 = arith.constant 3 : index
    %c0_92 = arith.constant 0 : index
    %c0_93 = arith.constant 0 : index
    %c0_94 = arith.constant 0 : index
    %331 = vector.load %arg7[%c3_91, %c0_92, %c0_93, %c0_94] : memref<4x4x16x8xbf16, #tpu.memory_space<vmem>>, vector<1x4x16x8xbf16>
    %332 = vector.shape_cast %331 : vector<1x4x16x8xbf16> to vector<4x16x8xbf16>
    %333 = vector.shape_cast %330 : vector<4x16x8xbf16> to vector<1x4x16x8xbf16>
    tpu.vector_store %arg7[%c3_91, %c0_92, %c0_93, %c0_94], %333 {strides = array<i32>} : memref<4x4x16x8xbf16, #tpu.memory_space<vmem>>, vector<1x4x16x8xbf16>,
    return
  }
  func.func @transform_0(%arg0: i32, %arg1: i32) -> (i32, i32, i32, i32) {
    %c0_i32 = arith.constant 0 : i32
    %c0_i32_0 = arith.constant 0 : i32
    %c0_i32_1 = arith.constant 0 : i32
    return %arg0, %arg1, %c0_i32, %c0_i32_0 : i32, i32, i32, i32
  }
  func.func @transform_1(%arg0: i32, %arg1: i32) -> (i32, i32, i32, i32) {
    %c0_i32 = arith.constant 0 : i32
    %c0_i32_0 = arith.constant 0 : i32
    %c0_i32_1 = arith.constant 0 : i32
    %c0_i32_2 = arith.constant 0 : i32
    return %arg0, %c0_i32, %c0_i32_0, %c0_i32_1 : i32, i32, i32, i32
  }
  func.func @transform_2(%arg0: i32, %arg1: i32) -> (i32, i32, i32, i32) {
    %c0_i32 = arith.constant 0 : i32
    %c0_i32_0 = arith.constant 0 : i32
    %c0_i32_1 = arith.constant 0 : i32
    %c0_i32_2 = arith.constant 0 : i32
    return %arg0, %c0_i32, %c0_i32_0, %c0_i32_1 : i32, i32, i32, i32
  }
  func.func @transform_3(%arg0: i32, %arg1: i32) -> (i32, i32) {
    %c0_i32 = arith.constant 0 : i32
    %c0_i32_0 = arith.constant 0 : i32
    %c0_i32_1 = arith.constant 0 : i32
    return %c0_i32, %c0_i32_0 : i32, i32
  }
  func.func @transform_4(%arg0: i32, %arg1: i32) -> (i32, i32) {
    %c0_i32 = arith.constant 0 : i32
    %c0_i32_0 = arith.constant 0 : i32
    %c0_i32_1 = arith.constant 0 : i32
    return %c0_i32, %c0_i32_0 : i32, i32
  }
  func.func @transform_5(%arg0: i32, %arg1: i32) -> (i32, i32, i32, i32) {
    %c0_i32 = arith.constant 0 : i32
    %c0_i32_0 = arith.constant 0 : i32
    %c0_i32_1 = arith.constant 0 : i32
    return %arg0, %arg1, %c0_i32, %c0_i32_0 : i32, i32, i32, i32
  }
}

</mosaic_0001>

<bundles_post_ra>
// kernel: bilinear_attn_transform.2
= control target key start
LH: loop header
LB: loop body
LE: loop exit
PB: predicated region body
PF: predicated region fallthrough
CT: control target
= control target key end

     0   :  { %s1329_s15 = smov 0   ;;  %s1331_s16 = smov 0   ;;  %s1754_s0 = inlined_call_operand.vmem [shape: bf16[8,4,16,8], index: 0, kind: input, shape index: {}]   ;;  %s1755_s1 = inlined_call_operand.vmem [shape: bf16[8,2], index: 1, kind: input, shape index: {}]   ;;  %s1756_s2 = inlined_call_operand.vmem [shape: f32[1,2], index: 2, kind: input, shape index: {}]   ;;  %s1757_s3 = inlined_call_operand.vmem [shape: f32[2,1,4,2], index: 3, kind: output, shape index: {0}]   ;;  %s1758_s4 = inlined_call_operand.vmem [shape: f32[2,1,4,2], index: 4, kind: output, shape index: {1}]  }
   0x1   :  { %s1333_s17 = smov 0  }
   0x2 LB: > { %s34_s18 = sadd.s32 1, %s1297_s16  ;;  %p1141_p0 = scmp.ge.s32.totalorder %s1301_s17, 1  ;;  %s1301_s17 = sphi %s1333_s17, %s15_s17   ;;  %s1297_s16 = sphi %s1331_s16, %s1760_s16   ;;  %s1293_s15 = sphi %s1329_s15, %s1759_s15  }
   0x3   : > { %p36_p1 = scmp.ge.s32.totalorder %s34_s18, 2  ;;  %p202_p2 = scmp.lt.s32.totalorder %s1301_s17, 3 }
   0x5   : > { %s1762_s18 = smov (%p36_p1, %s34_s18), 0  ;;  %p203_p3 = pnand %p1141_p0, %p202_p2 }
   0x6   : > { %v313_v0 = vld [vmem:[%s1755_s1] sm:$0xf] (!%p203_p3)  ;;  %vm450_vm0 = vcmask (!%p203_p3), 1043456   ;;  %s1142_s21 = sshll.u32 (!%p203_p3), %s1293_s15, 2  ;;  %vm401_vm1 = vcmask (!%p203_p3), 64512   ;;  %vm278_vm2 = vcmask (!%p203_p3), 11264  }
   0x7   : > { %206 = sbr.rel (%p203_p3) target bundleno = 338 (0x152), region = 32  ;;  %1236 = vmatprep.subr.msk.bf16.mxu0 (!%p203_p3), %vm450_vm0, %v313_v0  ;;  %v452_v1 = vsel (!%p203_p3), %vm450_vm0, %v313_v0, 0  ;;  %1237 = vmatprep.subr.msk.bf16.mxu1 (!%p203_p3), %vm450_vm0, %v313_v0  ;;  %p247_p4 = scmp.lt.s32.totalorder (!%p203_p3), %s1142_s21, 7  ;;  %v1303_v18 = vmov (!%p203_p3), -inf   ;;  %v1395_v19 = vld [vmem:[%s1756_s2] ss:$0 sm:$0xff] (!%p203_p3) }
   0x8   : > { %1201 = vmatpush3.bf16.msra.mxu0 (!%p203_p3), %v452_v1  ;;  %1235 = vmatpush3.bf16.msra.mxu1 (!%p203_p3), %v452_v1  ;;  %279 = vst.msk [vmem:[#allocation2] sm:$0xf] (!%p203_p3), %vm278_vm2, %v1303_v18  ;;  %280 = vst.msk [vmem:[#allocation3] sm:$0xf] (!%p203_p3), %vm278_vm2, %v1303_v18  ;;  %vm647_vm3 = vcmask (!%p203_p3), 15360   ;;  %vm986_vm4 = vcmask (!%p203_p3), 1041409  }
   0x9   : > { %vm988_vm5 = vcmask (!%p203_p3), 1042434   ;;  %p259_p5 = scmp.lt.s32.totalorder (!%p203_p3), %s1293_s15, 1  ;;  %vm990_vm6 = vcmask (!%p203_p3), 1043459  }
   0xe   : > { %s1764_s21 = smov (!%p247_p4, %s1142_s21), 7  ;;  %s1766_s15 = smov (!%p259_p5, %s1293_s15), 1 }
   0xf   : > { %s1182_s22 = sshll.u32 %s1764_s21, 5  ;;  %s1145_s28 = sshll.u32 %s1766_s15, 2 }
  0x10   : > { %s1356_s25 = scalar_lea.vmem %s1754_s0, %s1182_s22  ;;  %s265_s5 = scalar_lea.vmem %s1757_s3, %s1145_s28 }
  0x11   : > { %v1263_v2 = vld [vmem:[%s1356_s25] sm:$0xff]   ;;  %v1264_v3 = vld [vmem:[%s1356_s25 + $0x8] sm:$0xff]   ;;  %v1267_v6 = vld [vmem:[%s1356_s25 + $0x10] sm:$0xff]   ;;  %s272_s8 = scalar_lea.vmem %s1758_s4, %s1145_s28 }
  0x12   : > { %1202 = vmatprep.mubr.msk.bf16.mxu0 %vm401_vm1, %v1263_v2  ;;  %v1265_v4 = vld [vmem:[%s1356_s25 + $0x40] sm:$0xff]   ;;  %v1266_v5 = vld [vmem:[%s1356_s25 + $0x48] sm:$0xff]   ;;  %v1269_v7 = vld [vmem:[%s1356_s25 + $0x50] sm:$0xff]  }
  0x13   : > { %1203 = vmatmul.mubr.msk.bf16.vlgmr.msra.gmra.mrb[0].mxu0 %vm401_vm1, %v1264_v3  ;;  %1218 = vmatprep.mubr.msk.bf16.mxu1 %vm401_vm1, %v1265_v4  ;;  %v1268_v8 = vld [vmem:[%s1356_s25 + $0x18] sm:$0xff]   ;;  %v1271_v9 = vld [vmem:[%s1356_s25 + $0x20] sm:$0xff]   ;;  %v1272_v12 = vld [vmem:[%s1356_s25 + $0x28] sm:$0xff]  }
  0x14   : > { %1219 = vmatmul.mubr.msk.bf16.vlgmr.msra.gmra.mrb[0].mxu1 %vm401_vm1, %v1266_v5  ;;  %1206 = vmatprep.mubr.msk.bf16.mxu0 %vm401_vm1, %v1267_v6  ;;  %v1270_v10 = vld [vmem:[%s1356_s25 + $0x58] sm:$0xff]   ;;  %v1273_v11 = vld [vmem:[%s1356_s25 + $0x60] sm:$0xff]   ;;  %v1275_v13 = vld [vmem:[%s1356_s25 + $0x30] sm:$0xff]  }
  0x15   : > { %1222 = vmatprep.mubr.msk.bf16.mxu1 %vm401_vm1, %v1269_v7  ;;  %v1274_v14 = vld [vmem:[%s1356_s25 + $0x68] sm:$0xff]   ;;  %v1277_v15 = vld [vmem:[%s1356_s25 + $0x70] sm:$0xff]   ;;  %v1276_v16 = vld [vmem:[%s1356_s25 + $0x38] sm:$0xff]  }
  0x16   : > { %v1278_v17 = vld [vmem:[%s1356_s25 + $0x78] sm:$0xff]  }
  0x1b   : > { %1207 = vmatmul.mubr.msk.bf16.gmra.mrb[4].mxu0 %vm401_vm1, %v1268_v8 }
  0x1c   : > { %1210 = vmatprep.mubr.msk.bf16.mxu0 %vm401_vm1, %v1271_v9  ;;  %1223 = vmatmul.mubr.msk.bf16.gmra.mrb[4].mxu1 %vm401_vm1, %v1270_v10 }
  0x1d   : > { %1226 = vmatprep.mubr.msk.bf16.mxu1 %vm401_vm1, %v1273_v11 }
  0x23   : > { %1211 = vmatmul.mubr.msk.bf16.gmra.mrb[8].mxu0 %vm401_vm1, %v1272_v12 }
  0x24   : > { %1214 = vmatprep.mubr.msk.bf16.mxu0 %vm401_vm1, %v1275_v13  ;;  %1227 = vmatmul.mubr.msk.bf16.gmra.mrb[8].mxu1 %vm401_vm1, %v1274_v14 }
  0x25   : > { %1230 = vmatprep.mubr.msk.bf16.mxu1 %vm401_vm1, %v1277_v15 }
  0x2b   : > { %1215 = vmatmul.mubr.msk.bf16.gmra.mrb[12].mxu0 %vm401_vm1, %v1276_v16 }
  0x2c   : > { %1231 = vmatmul.mubr.msk.bf16.gmra.mrb[12].mxu1 %vm401_vm1, %v1278_v17 }
  0xe6   : > { %v1204_v20 = vpop.f32.mrb[0].mxu0 }
  0xe7   : > { %v497_v21 = vadd.f32 %v1204_v20, %v1395_v19  ;;  %v488_v22 = vpop.f32.mrb[1].mxu0  ;;  %v1220_v25 = vpop.f32.mrb[0].mxu1 }
  0xe8   : > { %v489_v23 = vadd.f32 %v1395_v19, %v488_v22  ;;  %v1205_v24 = vpop.f32.mrb[2].mxu0  ;;  %v552_v29 = vpop.f32.mrb[1].mxu1  ;;  %v561_v32 = vadd.f32 %v1220_v25, %v1395_v19 }
  0xe9   : > { %v617_v26 = vmax.f32 %v497_v21, 0.0  ;;  %v500_v27 = vadd.f32 %v1205_v24, %v1395_v19  ;;  %v491_v28 = vpop.f32.mrb[3].mxu0  ;;  %v1221_v33 = vpop.f32.mrb[2].mxu1  ;;  %v553_v37 = vadd.f32 %v1395_v19, %v552_v29 }
  0xea   : > { %v615_v30 = vmax.f32 %v489_v23, 0.0  ;;  %v492_v31 = vadd.f32 %v1395_v19, %v491_v28  ;;  %v555_v38 = vpop.f32.mrb[3].mxu1  ;;  %v633_v59 = vmax.f32 %v561_v32, 0.0  ;;  %v564_v1 = vadd.f32 %v1221_v33, %v1395_v19 }
  0xeb   : > { %v766_v34 = vcombine.high %v617_v26, %v617_v26  ;;  %v1403_v35 = vsel %vm278_vm2, %v617_v26, -inf  ;;  %v618_v36 = vmax.f32 %v500_v27, 0.0  ;;  %v651_v39 = vsel %vm647_vm3, %v617_v26, -inf }
  0xec   : > { %v764_v40 = vcombine.high %v615_v30, %v615_v30  ;;  %v1408_v41 = vsel %vm278_vm2, %v615_v30, -inf  ;;  %v616_v42 = vmax.f32 %v492_v31, 0.0  ;;  %v648_v44 = vsel %vm647_vm3, %v615_v30, -inf }
  0xed   : > { %v1411_v43 = vsel %vm278_vm2, %v766_v34, -inf  ;;  %v831_v45 = vmax.f32 %v1408_v41, %v1403_v35  ;;  %v767_v46 = vcombine.high %v618_v36, %v618_v36  ;;  %v1420_v48 = vsel %vm278_vm2, %v618_v36, -inf }
  0xee   : > { %v1417_v47 = vsel %vm278_vm2, %v764_v40, -inf  ;;  %v649_v49 = vsel %vm647_vm3, %v616_v42, -inf  ;;  %v765_v50 = vcombine.high %v616_v42, %v616_v42  ;;  %v1208_v51 = vpop.f32.mrb[4].mxu0  ;;  %v1429_v55 = vsel %vm278_vm2, %v616_v42, -inf }
  0xef   : > { %v862_v52 = vmax.f32 %v1417_v47, %v1411_v43  ;;  %v1426_v53 = vsel %vm278_vm2, %v767_v46, -inf  ;;  %v650_v54 = vmax.f32 %v648_v44, %v649_v49  ;;  %v504_v56 = vpop.f32.mrb[5].mxu0  ;;  %v893_v57 = vmax.f32 %v1429_v55, %v1420_v48  ;;  %v1224_v62 = vpop.f32.mrb[4].mxu1 }
  0xf0   : > { %v1434_v58 = vsel %vm278_vm2, %v765_v50, -inf  ;;  %v631_v60 = vmax.f32 %v553_v37, 0.0  ;;  %v1209_v61 = vpop.f32.mrb[6].mxu0  ;;  %v556_v2 = vadd.f32 %v1395_v19, %v555_v38  ;;  %v568_v4 = vpop.f32.mrb[5].mxu1  ;;  %v653_v5 = vsel %vm647_vm3, %v618_v36, -inf }
  0xf1   : > { %v652_v63 = vmax.f32 %v650_v54, %v651_v39  ;;  %v924_v0 = vmax.f32 %v1434_v58, %v1426_v53  ;;  %v507_v3 = vpop.f32.mrb[7].mxu0  ;;  %v1225_v6 = vpop.f32.mrb[6].mxu1  ;;  %v782_v7 = vcombine.high %v633_v59, %v633_v59  ;;  %v634_v12 = vmax.f32 %v564_v1, 0.0 }
  0xf2   : > { %v690_v8 = vsel %vm647_vm3, %v631_v60, -inf  ;;  %v780_v9 = vcombine.high %v631_v60, %v631_v60  ;;  %v632_v10 = vmax.f32 %v556_v2, 0.0  ;;  %v571_v11 = vpop.f32.mrb[7].mxu1  ;;  %v513_v13 = vadd.f32 %v1208_v51, %v1395_v19 }
  0xf3   : > { %v505_v14 = vadd.f32 %v1395_v19, %v504_v56  ;;  %v654_v15 = vmax.f32 %v652_v63, %v653_v5  ;;  %v693_v16 = vsel %vm647_vm3, %v633_v59, -inf  ;;  %v1446_v17 = vsel %vm278_vm2, %v633_v59, -inf }
  0xf4   : > { %v1449_v18 = vsel %vm278_vm2, %v631_v60, -inf  ;;  %v691_v20 = vsel %vm647_vm3, %v632_v10, -inf  ;;  %v621_v21 = vmax.f32 %v513_v13, 0.0  ;;  %v1453_v23 = vsel %vm278_vm2, %v782_v7, -inf }
  0xf5   : > { %v1456_v24 = vsel %vm278_vm2, %v780_v9, -inf  ;;  %v692_v25 = vmax.f32 %v690_v8, %v691_v20  ;;  %v619_v26 = vmax.f32 %v505_v14, 0.0  ;;  %v695_v28 = vsel %vm647_vm3, %v634_v12, -inf }
  0xf6   : > { %v1212_v22 = vpop.f32.mrb[8].mxu0  ;;  %v783_v29 = vcombine.high %v634_v12, %v634_v12  ;;  %v781_v30 = vcombine.high %v632_v10, %v632_v10  ;;  %v516_v31 = vadd.f32 %v1209_v61, %v1395_v19  ;;  %v1473_v40 = vsel %vm278_vm2, %v634_v12, -inf }
  0xf7   : > { %v1458_v27 = vpop.f32.mrb[9].mxu0  ;;  %v1464_v33 = vpop.f32.mrb[8].mxu1  ;;  %v694_v34 = vmax.f32 %v692_v25, %v693_v16  ;;  %v655_v35 = vsel %vm647_vm3, %v619_v26, -inf  ;;  %v768_v36 = vcombine.high %v619_v26, %v619_v26  ;;  %v832_v37 = vsel %vm278_vm2, %v619_v26, -inf }
  0xf8   : > { %v1462_v32 = vpop.f32.mrb[10].mxu0  ;;  %v1470_v39 = vpop.f32.mrb[9].mxu1  ;;  %v770_v41 = vcombine.high %v621_v21, %v621_v21  ;;  %v656_v42 = vmax.f32 %v654_v15, %v655_v35  ;;  %v1475_v44 = vmax.f32 %v831_v45, %v832_v37  ;;  %v1480_v49 = vsel %vm278_vm2, %v632_v10, -inf }
  0xf9   : > { %v1468_v38 = vpop.f32.mrb[11].mxu0  ;;  %v1477_v46 = vpop.f32.mrb[10].mxu1  ;;  %v863_v50 = vsel %vm278_vm2, %v768_v36, -inf  ;;  %v508_v51 = vadd.f32 %v1395_v19, %v507_v3  ;;  %v569_v54 = vadd.f32 %v1395_v19, %v568_v4  ;;  %v1488_v59 = vsel %vm278_vm2, %v783_v29, -inf }
  0xfa   : > { %v1485_v56 = vpop.f32.mrb[11].mxu1  ;;  %v1491_v60 = vsel %vm278_vm2, %v781_v30, -inf  ;;  %v1496_v45 = vmax.f32 %v862_v52, %v863_v50  ;;  %v622_v61 = vmax.f32 %v516_v31, 0.0  ;;  %v577_v1 = vadd.f32 %v1224_v62, %v1395_v19 }
  0xfb   : > { %v620_v63 = vmax.f32 %v508_v51, 0.0  ;;  %v635_v2 = vmax.f32 %v569_v54, 0.0  ;;  %v696_v3 = vmax.f32 %v694_v34, %v695_v28  ;;  %v659_v4 = vsel %vm647_vm3, %v621_v21, -inf }
  0xfc   : > { %v1501_v5 = vsel %vm278_vm2, %v621_v21, -inf  ;;  %v1504_v7 = vsel %vm278_vm2, %v770_v41, -inf  ;;  %v580_v8 = vadd.f32 %v1225_v6, %v1395_v19  ;;  %v572_v62 = vadd.f32 %v1395_v19, %v571_v11 }
  0xfd   : > { %v657_v43 = vsel %vm647_vm3, %v620_v63, -inf  ;;  %v769_v47 = vcombine.high %v620_v63, %v620_v63  ;;  %v894_v52 = vsel %vm278_vm2, %v620_v63, -inf  ;;  %v661_v12 = vsel %vm647_vm3, %v622_v61, -inf }
  0xfe   : > { %v1507_v9 = vpop.f32.mrb[12].mxu0  ;;  %v771_v13 = vcombine.high %v622_v61, %v622_v61  ;;  %v658_v14 = vmax.f32 %v656_v42, %v657_v43  ;;  %v1518_v15 = vmax.f32 %v893_v57, %v894_v52  ;;  %v1525_v20 = vsel %vm278_vm2, %v622_v61, -inf }
  0xff   : > { %v1512_v10 = vpop.f32.mrb[13].mxu0  ;;  %v1522_v16 = vpop.f32.mrb[12].mxu1  ;;  %v925_v11 = vsel %vm278_vm2, %v769_v47, -inf  ;;  %v637_v21 = vmax.f32 %v577_v1, 0.0  ;;  %v697_v25 = vsel %vm647_vm3, %v635_v2, -inf  ;;  %v529_v57 = vadd.f32 %v1212_v22, %v1395_v19 }
 0x100   : > { %v1520_v6 = vpop.f32.mrb[14].mxu0  ;;  %v1531_v28 = vpop.f32.mrb[13].mxu1  ;;  %v660_v29 = vmax.f32 %v658_v14, %v659_v4  ;;  %v1536_v48 = vmax.f32 %v924_v0, %v925_v11  ;;  %v698_v55 = vmax.f32 %v696_v3, %v697_v25  ;;  %v784_v34 = vcombine.high %v635_v2, %v635_v2 }
 0x101   : > { %v1529_v26 = vpop.f32.mrb[15].mxu0  ;;  %v1539_v30 = vpop.f32.mrb[14].mxu1  ;;  %v786_v31 = vcombine.high %v637_v21, %v637_v21  ;;  %v638_v35 = vmax.f32 %v580_v8, 0.0  ;;  %v636_v36 = vmax.f32 %v572_v62, 0.0  ;;  %v521_v42 = vadd.f32 %v1395_v19, %v1458_v27 }
 0x102   : > { %v1541_v37 = vpop.f32.mrb[15].mxu1  ;;  %v662_v41 = vmax.f32 %v660_v29, %v661_v12  ;;  %v835_v53 = vmax.f32 %v1475_v44, %v1501_v5  ;;  %v866_v58 = vmax.f32 %v1496_v45, %v1504_v7  ;;  %v927_v0 = vsel %vm278_vm2, %v771_v13, -inf }
 0x103   : > { %v701_v22 = vsel %vm647_vm3, %v637_v21, -inf  ;;  %v1552_v50 = vsel %vm278_vm2, %v637_v21, -inf  ;;  %v699_v51 = vsel %vm647_vm3, %v636_v36, -inf  ;;  %v1556_v61 = vsel %vm278_vm2, %v635_v2, -inf }
 0x104   : > { %v663_v54 = vrot.slane %v662_v41, 4  ;;  %v700_v27 = vmax.f32 %v698_v55, %v699_v51  ;;  %v625_v63 = vmax.f32 %v529_v57, 0.0  ;;  %v1559_v44 = vsel %vm278_vm2, %v786_v31, -inf }
 0x105   : > { %v1562_v45 = vsel %vm278_vm2, %v784_v34, -inf  ;;  %v703_v1 = vsel %vm647_vm3, %v638_v35, -inf  ;;  %v787_v3 = vcombine.high %v638_v35, %v638_v35  ;;  %v1566_v5 = vsel %vm278_vm2, %v638_v35, -inf }
 0x106   : > { %v664_v4 = vmax.f32 %v662_v41, %v663_v54  ;;  %v702_v7 = vmax.f32 %v700_v27, %v701_v22  ;;  %v623_v8 = vmax.f32 %v521_v42, 0.0  ;;  %v785_v43 = vcombine.high %v636_v36, %v636_v36 }
 0x107   : > { %v1569_v2 = vsel %vm278_vm2, %v636_v36, -inf  ;;  %v532_v47 = vadd.f32 %v1462_v32, %v1395_v19  ;;  %v524_v52 = vadd.f32 %v1395_v19, %v1468_v38  ;;  %v774_v12 = vcombine.high %v625_v63, %v625_v63 }
 0x108   : > { %v704_v62 = vmax.f32 %v702_v7, %v703_v1  ;;  %v772_v13 = vcombine.high %v623_v8, %v623_v8  ;;  %v593_v14 = vadd.f32 %v1464_v33, %v1395_v19  ;;  %v665_v11 = vrot.slane %v664_v4, 2 }
 0x109   : > { %v836_v21 = vsel %vm278_vm2, %v623_v8, -inf  ;;  %v626_v25 = vmax.f32 %v532_v47, 0.0  ;;  %v624_v29 = vmax.f32 %v524_v52, 0.0  ;;  %v1579_v55 = vsel %vm278_vm2, %v787_v3, -inf }
 0x10a   : > { %v705_v57 = vrot.slane %v704_v62, 4  ;;  %v1581_v31 = vmax.f32 %v835_v53, %v836_v21  ;;  %v867_v32 = vsel %vm278_vm2, %v772_v13, -inf  ;;  %v1585_v38 = vsel %vm278_vm2, %v785_v43, -inf }
 0x10b   : > { %v672_v34 = vsel %vm647_vm3, %v625_v63, -inf  ;;  %v1589_v33 = vsel %vm278_vm2, %v625_v63, -inf  ;;  %v1591_v35 = vmax.f32 %v866_v58, %v867_v32  ;;  %v1594_v41 = vsel %vm278_vm2, %v774_v12, -inf }
 0x10c   : > { %v706_v36 = vmax.f32 %v704_v62, %v705_v57  ;;  %v669_v42 = vsel %vm647_vm3, %v623_v8, -inf  ;;  %v641_v53 = vmax.f32 %v593_v14, 0.0  ;;  %v666_v22 = vmax.f32 %v664_v4, %v665_v11 }
 0x10d   : > { %v674_v51 = vsel %vm647_vm3, %v626_v25, -inf  ;;  %v670_v54 = vsel %vm647_vm3, %v624_v29, -inf  ;;  %v773_v27 = vcombine.high %v624_v29, %v624_v29  ;;  %v775_v3 = vcombine.high %v626_v25, %v626_v25 }
 0x10e   : > { %v707_v1 = vrot.slane %v706_v36, 2  ;;  %v1600_v63 = vsel %vm278_vm2, %v626_v25, -inf  ;;  %v671_v58 = vmax.f32 %v669_v42, %v670_v54  ;;  %v897_v7 = vmax.f32 %v1518_v15, %v1525_v20 }
 0x10f   : > { %v898_v43 = vsel %vm278_vm2, %v624_v29, -inf  ;;  %v928_v8 = vmax.f32 %v1536_v48, %v927_v0  ;;  %v929_v4 = vsel %vm278_vm2, %v773_v27, -inf  ;;  %v585_v62 = vadd.f32 %v1395_v19, %v1470_v39 }
 0x110   : > { %v708_v47 = vmax.f32 %v706_v36, %v707_v1  ;;  %v673_v52 = vmax.f32 %v671_v58, %v672_v34  ;;  %v596_v12 = vadd.f32 %v1477_v46, %v1395_v19  ;;  %v1611_v13 = vmax.f32 %v897_v7, %v898_v43 }
 0x111   : > { %v1613_v14 = vmax.f32 %v928_v8, %v929_v4  ;;  %v588_v15 = vadd.f32 %v1395_v19, %v1485_v56  ;;  %v545_v20 = vadd.f32 %v1507_v9, %v1395_v19  ;;  %v667_v48 = vrot.slane %v666_v22, 1 }
 0x112   : > { %v709_v0 = vrot.slane %v708_v47, 1  ;;  %v790_v11 = vcombine.high %v641_v53, %v641_v53  ;;  %v639_v21 = vmax.f32 %v585_v62, 0.0  ;;  %v642_v25 = vmax.f32 %v596_v12, 0.0 }
 0x113   : > { %v640_v29 = vmax.f32 %v588_v15, 0.0  ;;  %v675_v39 = vmax.f32 %v673_v52, %v674_v51  ;;  %v839_v46 = vmax.f32 %v1581_v31, %v1589_v33  ;;  %v714_v57 = vsel %vm647_vm3, %v641_v53, -inf }
 0x114   : > { %v711_v32 = vsel %vm647_vm3, %v639_v21, -inf  ;;  %v788_v34 = vcombine.high %v639_v21, %v639_v21  ;;  %v537_v56 = vadd.f32 %v1395_v19, %v1512_v10  ;;  %v931_v9 = vsel %vm278_vm2, %v775_v3, -inf }
 0x115   : > { %v1627_v36 = vsel %vm278_vm2, %v641_v53, -inf  ;;  %v712_v42 = vsel %vm647_vm3, %v640_v29, -inf  ;;  %v629_v54 = vmax.f32 %v545_v20, 0.0  ;;  %v1630_v51 = vmax.f32 %v666_v22, %v667_v48 }
 0x116   : > { %v1632_v27 = vmax.f32 %v708_v47, %v709_v0  ;;  %v1635_v31 = vsel %vm278_vm2, %v790_v11, -inf  ;;  %v713_v33 = vmax.f32 %v711_v32, %v712_v42  ;;  %v1638_v1 = vsel %vm278_vm2, %v639_v21, -inf }
 0x117   : > { %v716_v10 = vsel %vm647_vm3, %v642_v25, -inf  ;;  %v791_v3 = vcombine.high %v642_v25, %v642_v25  ;;  %v1642_v53 = vsel %vm278_vm2, %v642_v25, -inf  ;;  %v1645_v58 = vsel %vm278_vm2, %v788_v34, -inf }
 0x118   : > { %v715_v22 = vmax.f32 %v713_v33, %v714_v57  ;;  %v627_v7 = vmax.f32 %v537_v56, 0.0  ;;  %v870_v43 = vmax.f32 %v1591_v35, %v1594_v41  ;;  %v789_v8 = vcombine.high %v640_v29, %v640_v29 }
 0x119   : > { %v778_v4 = vcombine.high %v629_v54, %v629_v54  ;;  %v548_v47 = vadd.f32 %v1520_v6, %v1395_v19  ;;  %v540_v52 = vadd.f32 %v1395_v19, %v1529_v26  ;;  %v901_v20 = vmax.f32 %v1611_v13, %v1600_v63 }
 0x11a   : > { %v676_v62 = vsel %vm647_vm3, %v627_v7, -inf  ;;  %v776_v12 = vcombine.high %v627_v7, %v627_v7  ;;  %v840_v15 = vsel %vm278_vm2, %v627_v7, -inf  ;;  %v1658_v48 = vsel %vm278_vm2, %v640_v29, -inf }
 0x11b   : > { %v677_v35 = vmax.f32 %v675_v39, %v676_v62  ;;  %v841_v41 = vmax.f32 %v839_v46, %v840_v15  ;;  %v630_v0 = vmax.f32 %v548_v47, 0.0  ;;  %v842_v11 = vsel %vm278_vm2, %v629_v54, -inf }
 0x11c   : > { %v871_v6 = vsel %vm278_vm2, %v776_v12, -inf  ;;  %v628_v21 = vmax.f32 %v540_v52, 0.0  ;;  %v932_v26 = vmax.f32 %v1613_v14, %v931_v9  ;;  %v1664_v25 = vsel %vm278_vm2, %v791_v3, -inf }
 0x11d   : > { %v843_v57 = vmax.f32 %v841_v41, %v842_v11  ;;  %v872_v32 = vmax.f32 %v870_v43, %v871_v6  ;;  %v601_v63 = vadd.f32 %v1395_v19, %v1531_v28  ;;  %v1669_v13 = vsel %vm278_vm2, %v789_v8, -inf }
 0x11e   : > { %v680_v29 = vsel %vm647_vm3, %v629_v54, -inf  ;;  %v873_v39 = vsel %vm278_vm2, %v778_v4, -inf  ;;  %v609_v46 = vadd.f32 %v1522_v16, %v1395_v19  ;;  %v682_v56 = vsel %vm647_vm3, %v630_v0, -inf }
 0x11f   : > { %v845_v14 = vmax.f32 %v843_v57, %v1449_v18  ;;  %v874_v34 = vmax.f32 %v872_v32, %v873_v39  ;;  %v678_v9 = vsel %vm647_vm3, %v628_v21, -inf  ;;  %v779_v42 = vcombine.high %v630_v0, %v630_v0 }
 0x120   : > { %v679_v33 = vmax.f32 %v677_v35, %v678_v9  ;;  %v777_v28 = vcombine.high %v628_v21, %v628_v21  ;;  %v902_v3 = vsel %vm278_vm2, %v628_v21, -inf  ;;  %v643_v8 = vmax.f32 %v601_v63, 0.0 }
 0x121   : > { %v847_v7 = vmax.f32 %v845_v14, %v1446_v17  ;;  %v876_v54 = vmax.f32 %v874_v34, %v1456_v24  ;;  %v903_v43 = vmax.f32 %v901_v20, %v902_v3  ;;  %v904_v16 = vsel %vm278_vm2, %v630_v0, -inf }
 0x122   : > { %v681_v4 = vmax.f32 %v679_v33, %v680_v29  ;;  %v933_v18 = vsel %vm278_vm2, %v777_v28, -inf  ;;  %v717_v47 = vmax.f32 %v715_v22, %v716_v10  ;;  %v718_v15 = vsel %vm647_vm3, %v643_v8, -inf }
 0x123   : > { %v878_v52 = vmax.f32 %v876_v54, %v1453_v23  ;;  %v905_v62 = vmax.f32 %v903_v43, %v904_v16  ;;  %v934_v12 = vmax.f32 %v932_v26, %v933_v18  ;;  %v935_v35 = vsel %vm278_vm2, %v779_v42, -inf }
 0x124   : > { %v683_v41 = vmax.f32 %v681_v4, %v682_v56  ;;  %v719_v17 = vmax.f32 %v717_v47, %v718_v15  ;;  %v849_v24 = vmax.f32 %v847_v7, %v1556_v61  ;;  %v612_v10 = vadd.f32 %v1539_v30, %v1395_v19 }
 0x125   : > { %v907_v20 = vmax.f32 %v905_v62, %v1480_v49  ;;  %v936_v11 = vmax.f32 %v934_v12, %v935_v35  ;;  %v880_v0 = vmax.f32 %v878_v52, %v1562_v45  ;;  %v645_v22 = vmax.f32 %v609_v46, 0.0 }
 0x126   : > { %v684_v23 = vrot.slane %v683_v41, 4  ;;  %v792_v6 = vcombine.high %v643_v8, %v643_v8  ;;  %v851_v21 = vmax.f32 %v849_v24, %v1552_v50  ;;  %v604_v49 = vadd.f32 %v1395_v19, %v1541_v37 }
 0x127   : > { %v909_v26 = vmax.f32 %v907_v20, %v1473_v40  ;;  %v938_v57 = vmax.f32 %v936_v11, %v1491_v60  ;;  %v882_v61 = vmax.f32 %v880_v0, %v1559_v44  ;;  %v794_v32 = vcombine.high %v645_v22, %v645_v22 }
 0x128   : > { %v685_v45 = vmax.f32 %v683_v41, %v684_v23  ;;  %v853_v63 = vmax.f32 %v851_v21, %v1638_v1  ;;  %v856_v30 = vsel %vm278_vm2, %v643_v8, -inf  ;;  %v646_v40 = vmax.f32 %v612_v10, 0.0 }
 0x129   : > { %v940_v29 = vmax.f32 %v938_v57, %v1488_v59  ;;  %v884_v50 = vmax.f32 %v882_v61, %v1645_v58  ;;  %v644_v39 = vmax.f32 %v604_v49, 0.0  ;;  %v887_v44 = vsel %vm278_vm2, %v792_v6, -inf }
 0x12a   : > { %v686_v60 = vrot.slane %v685_v45, 2  ;;  %v855_v46 = vmax.f32 %v853_v63, %v1627_v36  ;;  %v911_v19 = vmax.f32 %v909_v26, %v1569_v2  ;;  %v722_v37 = vsel %vm647_vm3, %v645_v22, -inf }
 0x12b   : > { %v858_v1 = vsel %vm278_vm2, %v645_v22, -inf  ;;  %v886_v14 = vmax.f32 %v884_v50, %v1635_v31  ;;  %v720_v34 = vsel %vm647_vm3, %v644_v39, -inf  ;;  %v889_v42 = vsel %vm278_vm2, %v794_v32, -inf }
 0x12c   : > { %v687_v59 = vmax.f32 %v685_v45, %v686_v60  ;;  %v857_v56 = vmax.f32 %v855_v46, %v856_v30  ;;  %v721_v58 = vmax.f32 %v719_v17, %v720_v34  ;;  %v913_v9 = vmax.f32 %v911_v19, %v1566_v5 }
 0x12d   : > { %v888_v36 = vmax.f32 %v886_v14, %v887_v44  ;;  %v724_v33 = vsel %vm647_vm3, %v646_v40, -inf  ;;  %v942_v2 = vmax.f32 %v940_v29, %v1585_v38  ;;  %v795_v43 = vcombine.high %v646_v40, %v646_v40  ;;  %v981_v44 = vld [vmem:[#allocation2] sm:$0xf] }
 0x12e   : > { %v688_v28 = vrot.slane %v687_v59, 1  ;;  %v859_v3 = vmax.f32 %v857_v56, %v858_v1  ;;  %v723_v7 = vmax.f32 %v721_v58, %v722_v37  ;;  %v915_v54 = vmax.f32 %v913_v9, %v1658_v48 }
 0x12f   : > { %v890_v31 = vmax.f32 %v888_v36, %v889_v42  ;;  %v793_v8 = vcombine.high %v644_v39, %v644_v39  ;;  %v944_v16 = vmax.f32 %v942_v2, %v1579_v55  ;;  %v918_v38 = vsel %vm278_vm2, %v644_v39, -inf }
 0x130   : > { %v689_v4 = vmax.f32 %v687_v59, %v688_v28  ;;  %v953_v5 = vsel %vm278_vm2, %v859_v3, -inf  ;;  %v725_v18 = vmax.f32 %v723_v7, %v724_v33  ;;  %v917_v47 = vmax.f32 %v915_v54, %v1642_v53  ;;  %v995_v33 = vld [vmem:[#allocation3] sm:$0xf] }
 0x131   : > { %v954_v52 = vrot.slane %v953_v5, 4  ;;  %v960_v62 = vsel %vm278_vm2, %v890_v31, -inf  ;;  %v946_v12 = vmax.f32 %v944_v16, %v1669_v13  ;;  %v920_v17 = vsel %vm278_vm2, %v646_v40, -inf }
 0x132   : > { %v987_v48 = vsel %vm986_vm4, %v689_v4, %v1630_v51  ;;  %v961_v15 = vrot.slane %v960_v62, 4  ;;  %v726_v35 = vrot.slane %v725_v18, 4  ;;  %v919_v41 = vmax.f32 %v917_v47, %v918_v38 }
 0x133   : > { %v955_v55 = vmax.f32 %v953_v5, %v954_v52  ;;  %v948_v24 = vmax.f32 %v946_v12, %v1664_v25  ;;  %v989_v53 = vsel %vm988_vm5, %v1632_v27, %v987_v48  ;;  %v949_v10 = vsel %vm278_vm2, %v793_v8, -inf }
 0x134   : > { %v962_v20 = vmax.f32 %v960_v62, %v961_v15  ;;  %v727_v11 = vmax.f32 %v725_v18, %v726_v35  ;;  %v921_v0 = vmax.f32 %v919_v41, %v920_v17  ;;  %v951_v23 = vsel %vm278_vm2, %v795_v43, -inf }
 0x135   : > { %v956_v13 = vrot.slane %v955_v55, 2  ;;  %v950_v22 = vmax.f32 %v948_v24, %v949_v10 }
 0x136   : > { %v963_v51 = vrot.slane %v962_v20, 2  ;;  %v728_v6 = vrot.slane %v727_v11, 2  ;;  %v967_v21 = vsel %vm278_vm2, %v921_v0, -inf }
 0x137   : > { %v957_v26 = vmax.f32 %v955_v55, %v956_v13  ;;  %v952_v57 = vmax.f32 %v950_v22, %v951_v23  ;;  %v968_v25 = vrot.slane %v967_v21, 4 }
 0x138   : > { %v964_v61 = vmax.f32 %v962_v20, %v963_v51  ;;  %v729_v49 = vmax.f32 %v727_v11, %v728_v6 }
 0x139   : > { %v958_v27 = vrot.slane %v957_v26, 1  ;;  %v969_v32 = vmax.f32 %v967_v21, %v968_v25  ;;  %v974_v45 = vsel %vm278_vm2, %v952_v57, -inf }
 0x13a   : > { %v965_v63 = vrot.slane %v964_v61, 1  ;;  %v730_v30 = vrot.slane %v729_v49, 1  ;;  %v975_v29 = vrot.slane %v974_v45, 4 }
 0x13b   : > { %v970_v50 = vrot.slane %v969_v32, 2  ;;  %v959_v40 = vmax.f32 %v957_v26, %v958_v27 }
 0x13c   : > { %v966_v39 = vmax.f32 %v964_v61, %v965_v63  ;;  %v731_v60 = vmax.f32 %v729_v49, %v730_v30  ;;  %v976_v46 = vmax.f32 %v974_v45, %v975_v29 }
 0x13d   : > { %v971_v19 = vmax.f32 %v969_v32, %v970_v50 }
 0x13e   : > { %v1000_v37 = vsel %vm986_vm4, %v966_v39, %v959_v40  ;;  %v977_v1 = vrot.slane %v976_v46, 2  ;;  %v991_v14 = vsel %vm990_vm6, %v731_v60, %v989_v53 }
 0x13f   : > { %v972_v34 = vrot.slane %v971_v19, 1  ;;  %v993_v59 = vmax.f32 %v981_v44, %v991_v14 }
 0x140   : > { %v978_v56 = vmax.f32 %v976_v46, %v977_v1 }
 0x141   : > { %v973_v58 = vmax.f32 %v971_v19, %v972_v34  ;;  %994 = vst.msk [vmem:[#allocation2] sm:$0xf] %vm278_vm2, %v993_v59 }
 0x142   : > { %v979_v9 = vrot.slane %v978_v56, 1 }
 0x143   : > { %v1001_v42 = vsel %vm988_vm5, %v973_v58, %v1000_v37 }
 0x144   : > { %v980_v36 = vmax.f32 %v978_v56, %v979_v9 }
 0x146   : > { %v1002_v2 = vsel %vm990_vm6, %v980_v36, %v1001_v42 }
 0x147   : > { %v1004_v28 = vmax.f32 %v995_v33, %v1002_v2 }
 0x148   : > { %v1009_v3 = vld [vmem:[#allocation2] sm:$0xf] }
 0x149   : > { %1005 = vst.msk [vmem:[#allocation3] sm:$0xf] %vm278_vm2, %v1004_v28  ;;  %1010 = vst.msk [vmem:[%s265_s5] sm:$0xf] %vm278_vm2, %v1009_v3 }
 0x150   : > { %v1011_v7 = vld [vmem:[#allocation3] sm:$0xf] }
 0x151   : > { %1012 = vst.msk [vmem:[%s272_s8] sm:$0xf] %vm278_vm2, %v1011_v7 }
 0x152 PF: > { %s15_s17 = sadd.s32 1, %s1301_s17   ;;  %s1759_s15 = smov %s1297_s16 }
 0x153   : > { %p12_p6 = scmp.ge.s32.totalorder %s15_s17, 4   ;;  %s1760_s16 = smov %s1762_s18 }
 0x155   :  { %14 = sbr.rel (!%p12_p6) target bundleno = 2 (0x2), region = 82 }

// kernel: bilinear_attn_transform.3
= control target key start
LH: loop header
LB: loop body
LE: loop exit
PB: predicated region body
PF: predicated region fallthrough
CT: control target
= control target key end

     0   :  { %s3568_s18 = smov 0   ;;  %s3570_s19 = smov 0   ;;  %s4486_s0 = inlined_call_operand.vmem [shape: bf16[8,4,16,8], index: 0, kind: input, shape index: {}]   ;;  %s4487_s1 = inlined_call_operand.vmem [shape: bf16[2,4,4,8], index: 1, kind: input, shape index: {}]   ;;  %s4488_s2 = inlined_call_operand.vmem [shape: bf16[2,4,4,8], index: 2, kind: input, shape index: {}]   ;;  %s4489_s3 = inlined_call_operand.vmem [shape: bf16[8,8], index: 3, kind: input, shape index: {}]   ;;  %s4490_s4 = inlined_call_operand.vmem [shape: f32[1,8], index: 4, kind: input, shape index: {}]   ;;  %s4491_s5 = inlined_call_operand.vmem [shape: bf16[8,4,16,8], index: 5, kind: output, shape index: {}]  }
   0x1   :  { %s3572_s20 = smov 0  }
   0x2 LB: > { %s27_s21 = sadd.s32 1, %s3531_s19  ;;  %p3065_p0 = scmp.ge.s32.totalorder %s3535_s20, 1  ;;  %s3535_s20 = sphi %s3572_s20, %s15_s20   ;;  %s3531_s19 = sphi %s3570_s19, %s4511_s19   ;;  %s3527_s18 = sphi %s3568_s18, %s4510_s18  }
   0x3   : > { %p29_p1 = scmp.ge.s32.totalorder %s27_s21, 2  ;;  %p231_p2 = scmp.lt.s32.totalorder %s3535_s20, 3 }
   0x5   : > { %s4513_s21 = smov (%p29_p1, %s27_s21), 0  ;;  %p232_p3 = pnand %p3065_p0, %p231_p2 }
   0x7   : > { %235 = sbr.rel (%p232_p3) target bundleno = 463 (0x1cf), region = 40 }
   0xe   : > { %v326_v0 = vld [vmem:[%s4489_s3] sm:$0xf]  ;;  %vm1056_vm0 = vcmask 1043456   ;;  %s3066_s24 = sshll.u32 %s3527_s18, 2  ;;  %p294_p4 = scmp.lt.s32.totalorder %s3527_s18, 1  ;;  %v339_v1 = vlaneseq  ;;  %vm1043_vm1 = vcmask 64512  }
   0xf   : > { %3419 = vmatprep.subr.msk.bf16.mxu0 %vm1056_vm0, %v326_v0  ;;  %v3591_v2 = vsel %vm1056_vm0, %v326_v0, 0  ;;  %3420 = vmatprep.subr.msk.bf16.mxu1 %vm1056_vm0, %v326_v0  ;;  %p283_p5 = scmp.lt.s32.totalorder %s3066_s24, 7  ;;  %v3537_v4 = vmov 1983009808   ;;  %vm1165_vm2 = vcmask 60416  }
  0x10   : > { %3380 = vmatpush3.bf16.msra.mxu0 %v3591_v2  ;;  %3390 = vmatpush3.bf16.msra.mxu1 %v3591_v2  ;;  %s4515_s18 = smov (!%p294_p4, %s3527_s18), 1  ;;  %v340_v3 = vshrl.u32 %v339_v1, 7  ;;  %v515_v5 = vunpack.c.l.s4 %v3537_v4 }
  0x11   : > { %s4517_s24 = smov (!%p283_p5, %s3066_s24), 7  ;;  %3421 = vmatprep.subr.msk.bf16.mxu0 %vm1056_vm0, %v326_v0  ;;  %3422 = vmatprep.subr.msk.bf16.mxu1 %vm1056_vm0, %v326_v0  ;;  %s3324_s25 = sshll.u32 %s4515_s18, 3 }
  0x12   : > { %v516_v6 = vunpack.c.0.s8 %v515_v5  ;;  %s3323_s26 = sshll.u32 %s4517_s24, 5  ;;  %s3604_s29 = scalar_lea.vmem %s4487_s1, %s3324_s25  ;;  %v3606_v7 = vsub.s32 0, %v340_v3  ;;  %v3608_v8 = vsub.s32 1, %v340_v3 }
  0x13   : > { %s3615_s7 = scalar_lea.vmem %s4486_s0, %s3323_s26  ;;  %s3620_s10 = scalar_lea.vmem %s4488_s2, %s3324_s25  ;;  %v318_v9 = vld [vmem:[%s3604_s29] sm:$0x3]  ;;  %v3624_v10 = vld [vmem:[%s3604_s29 + $0x2] sm:$0x3]  ;;  %v320_v11 = vld [vmem:[%s3604_s29 + $0x4] sm:$0x3] }
  0x14   : > { %4497 = vst [vmem:[#allocation2_spill] sm:$0xff] %v3606_v7  ;;  %4498 = vst [vmem:[#allocation3_spill] sm:$0xff] %v3608_v8  ;;  %v3116_v12 = vld.sshfl [vmem:[%s3620_s10] sm:$0x11 pattern:$0x75316420]  ;;  %v337_v13 = vpack.i.b16 %v318_v9, %v318_v9  ;;  %v3628_v14 = vsub.s32 %v516_v6, %v340_v3  ;;  %v3632_v15 = vpack.i.b16 %v3624_v10, %v3624_v10  ;;  %s4382_s15 = scalar_lea.vmem %s4491_s5, %s3323_s26 }
  0x15   : > { %v3119_v16 = vld.sshfl [vmem:[%s3620_s10 + $0x2] sm:$0x11 pattern:$0x75316420]  ;;  %v605_v17 = vcombine.high %v3116_v12, %v3116_v12  ;;  %v607_v18 = vunpack.i.h.s16 %v3116_v12  ;;  %v3117_v19 = vpack.i.b16 %v3116_v12, %v3116_v12  ;;  %v3635_v20 = vpack.i.b16 %v320_v11, %v320_v11 }
  0x16   : > { %v3638_v21 = vrot.slane %v337_v13, %v3606_v7  ;;  %v3448_v22 = vld [vmem:[%s3615_s7] sm:$0xff]   ;;  %v380_v23 = vshrl.u32 %v318_v9, 16  ;;  %v3642_v24 = vrot.slane %v337_v13, %v3608_v8  ;;  %v682_v25 = vcombine.high %v3119_v16, %v3119_v16 }
  0x17   : > { %4499 = vst [vmem:[#allocation4_spill] sm:$0xff] %v3635_v20  ;;  %v609_v26 = vunpack.i.h.s16 %v605_v17  ;;  %v611_v27 = vpack.i.b16 %v607_v18, %v607_v18  ;;  %v3118_v28 = vpack.i.b16 %v605_v17, %v605_v17  ;;  %v617_v29 = vrot.slane %v3117_v19, %v3606_v7  ;;  %v3449_v32 = vld [vmem:[%s3615_s7 + $0x20] sm:$0xff]  }
  0x18   : > { %v367_v30 = vmul.bf16 %v3448_v22, %v3638_v21  ;;  %v381_v31 = vpack.i.b16 %v380_v23, %v380_v23  ;;  %v684_v33 = vunpack.i.h.s16 %v3119_v16  ;;  %v686_v34 = vunpack.i.h.s16 %v682_v25  ;;  %v3450_v35 = vld [vmem:[%s3615_s7 + $0x40] sm:$0xff]  }
  0x19   : > { %v613_v36 = vpack.i.b16 %v609_v26, %v609_v26  ;;  %v621_v37 = vrot.slane %v611_v27, %v3606_v7  ;;  %v625_v38 = vrot.slane %v3118_v28, %v3606_v7  ;;  %v631_v39 = vpack.i.b16 %v617_v29, %v617_v29  ;;  %v3122_v40 = vld.sshfl [vmem:[%s3620_s10 + $0x4] sm:$0x11 pattern:$0x75316420] }
  0x1a   : > { %v3652_v41 = vrot.slane %v381_v31, %v3606_v7  ;;  %v3655_v42 = vrot.slane %v381_v31, %v3608_v8  ;;  %v3451_v43 = vld [vmem:[%s3615_s7 + $0x60] sm:$0xff]   ;;  %v3120_v44 = vpack.i.b16 %v3119_v16, %v3119_v16  ;;  %v688_v45 = vpack.i.b16 %v684_v33, %v684_v33 }
  0x1b   : > { %v456_v46 = vmul.bf16 %v3450_v35, %v3642_v24  ;;  %v629_v47 = vrot.slane %v613_v36, %v3606_v7  ;;  %v3661_v48 = vrot.slane %v631_v39, %v3606_v7  ;;  %v638_v49 = vpack.i.b16 %v621_v37, %v621_v37  ;;  %v3675_v62 = vld.sshfl [vmem:[%s3620_s10 + $0x6] sm:$0x11 pattern:$0x75316420] }
  0x1c   : > { %v411_v50 = vmul.bf16 %v3449_v32, %v3652_v41  ;;  %v501_v51 = vmul.bf16 %v3451_v43, %v3655_v42  ;;  %v645_v52 = vpack.i.b16 %v625_v38, %v625_v38  ;;  %v3121_v53 = vpack.i.b16 %v682_v25, %v682_v25 }
  0x1d   : > { %v3666_v54 = vrot.slane %v638_v49, %v3606_v7  ;;  %v652_v55 = vpack.i.b16 %v629_v47, %v629_v47  ;;  %v690_v56 = vpack.i.b16 %v686_v34, %v686_v34  ;;  %v694_v57 = vrot.slane %v3120_v44, %v3606_v7 }
  0x1e   : > { %v415_v58 = vadd.bf16 %v411_v50, %v367_v30  ;;  %v3670_v59 = vrot.slane %v645_v52, %v3606_v7  ;;  %v698_v60 = vrot.slane %v688_v45, %v3606_v7  ;;  %v702_v61 = vrot.slane %v3121_v53, %v3606_v7 }
  0x1f   : > { %v3678_v63 = vrot.slane %v652_v55, %v3606_v7  ;;  %v706_v0 = vrot.slane %v690_v56, %v3606_v7  ;;  %v708_v1 = vpack.i.b16 %v694_v57, %v694_v57  ;;  %v775_v3 = vcombine.high %v3122_v40, %v3122_v40 }
  0x20   : > { %v460_v4 = vadd.bf16 %v456_v46, %v415_v58  ;;  %v715_v5 = vpack.i.b16 %v698_v60, %v698_v60  ;;  %v722_v6 = vpack.i.b16 %v702_v61, %v702_v61  ;;  %v777_v9 = vunpack.i.h.s16 %v3122_v40 }
  0x21   : > { %v3682_v11 = vrot.slane %v708_v1, %v3606_v7  ;;  %v729_v12 = vpack.i.b16 %v706_v0, %v706_v0  ;;  %v779_v13 = vunpack.i.h.s16 %v775_v3  ;;  %v3123_v16 = vpack.i.b16 %v3122_v40, %v3122_v40 }
  0x22   : > { %v505_v17 = vadd.bf16 %v501_v51, %v460_v4  ;;  %v3685_v18 = vrot.slane %v715_v5, %v3606_v7  ;;  %v3688_v19 = vrot.slane %v722_v6, %v3606_v7  ;;  %v781_v22 = vpack.i.b16 %v777_v9, %v777_v9 }
  0x23   : > { %v3691_v23 = vrot.slane %v729_v12, %v3606_v7  ;;  %v3124_v25 = vpack.i.b16 %v775_v3, %v775_v3  ;;  %v783_v26 = vpack.i.b16 %v779_v13, %v779_v13  ;;  %v787_v27 = vrot.slane %v3123_v16, %v3606_v7  ;;  %v3452_v12 = vld [vmem:[%s3615_s7] sm:$0xff]  }
  0x24   : > { %v513_v28 = vcombine.high %v505_v17, %v505_v17  ;;  %v520_v29 = vrot.slane %v505_v17, %v3628_v14  ;;  %v791_v30 = vrot.slane %v781_v22, %v3606_v7  ;;  %v868_v31 = vcombine.high %v3675_v62, %v3675_v62 }
  0x25   : > { %v795_v32 = vrot.slane %v3124_v25, %v3606_v7  ;;  %v799_v33 = vrot.slane %v783_v26, %v3606_v7  ;;  %v801_v34 = vpack.i.b16 %v787_v27, %v787_v27  ;;  %v870_v35 = vunpack.i.h.s16 %v3675_v62  ;;  %v3454_v25 = vld [vmem:[%s3615_s7 + $0x40] sm:$0xff]   ;;  %v3456_v26 = vld [vmem:[%s3615_s7 + $0x8] sm:$0xff]  }
  0x26   : > { %v527_v36 = vrot.slane %v513_v28, %v3628_v14  ;;  %v528_v37 = vcombine.high %v520_v29, %v520_v29  ;;  %v658_v38 = vmul.bf16 %v3661_v48, %v520_v29  ;;  %v659_v39 = vmul.bf16 %v3666_v54, %v520_v29 }
  0x27   : > { %v660_v40 = vmul.bf16 %v3670_v59, %v520_v29  ;;  %v661_v43 = vmul.bf16 %v3678_v63, %v520_v29  ;;  %v3707_v44 = vrot.slane %v801_v34, %v3606_v7  ;;  %v808_v45 = vpack.i.b16 %v791_v30, %v791_v30  ;;  %v3457_v30 = vld [vmem:[%s3615_s7 + $0x28] sm:$0xff]  }
  0x28   : > { %v3709_v46 = vcombine.high %v527_v36, %v527_v36  ;;  %v735_v47 = vmul.bf16 %v3682_v11, %v528_v37  ;;  %v736_v49 = vmul.bf16 %v3685_v18, %v528_v37  ;;  %v737_v50 = vmul.bf16 %v3688_v19, %v528_v37 }
  0x29   : > { %v738_v51 = vmul.bf16 %v3691_v23, %v528_v37  ;;  %v3716_v52 = vrot.slane %v808_v45, %v3606_v7  ;;  %v815_v53 = vpack.i.b16 %v795_v32, %v795_v32  ;;  %v822_v55 = vpack.i.b16 %v799_v33, %v799_v33  ;;  %v3458_v37 = vld [vmem:[%s3615_s7 + $0x48] sm:$0xff]  }
  0x2a   : > { %v751_v56 = vadd.bf16 %v735_v47, %v658_v38  ;;  %v752_v57 = vadd.bf16 %v736_v49, %v659_v39  ;;  %v753_v58 = vadd.bf16 %v737_v50, %v660_v40  ;;  %v828_v60 = vmul.bf16 %v3707_v44, %v527_v36  ;;  %v3459_v45 = vld [vmem:[%s3615_s7 + $0x68] sm:$0xff]  }
  0x2b   : > { %v754_v61 = vadd.bf16 %v738_v51, %v661_v43  ;;  %v3720_v0 = vrot.slane %v815_v53, %v3606_v7  ;;  %v3723_v1 = vrot.slane %v822_v55, %v3606_v7  ;;  %v829_v3 = vmul.bf16 %v3716_v52, %v527_v36  ;;  %v3460_v51 = vld [vmem:[%s3615_s7 + $0x8] sm:$0xff]  }
  0x2c   : > { %v844_v4 = vadd.bf16 %v828_v60, %v751_v56  ;;  %v872_v5 = vunpack.i.h.s16 %v868_v31  ;;  %v3126_v6 = vpack.i.b16 %v3675_v62, %v3675_v62  ;;  %v874_v9 = vpack.i.b16 %v870_v35, %v870_v35  ;;  %v3453_v35 = vld [vmem:[%s3615_s7 + $0x20] sm:$0xff]  }
  0x2d   : > { %v830_v13 = vmul.bf16 %v3720_v0, %v527_v36  ;;  %v831_v16 = vmul.bf16 %v3723_v1, %v527_v36  ;;  %v845_v17 = vadd.bf16 %v829_v3, %v752_v57  ;;  %v3127_v22 = vpack.i.b16 %v868_v31, %v868_v31  ;;  %v3455_v36 = vld [vmem:[%s3615_s7 + $0x60] sm:$0xff]  }
  0x2e   : > { %v876_v27 = vpack.i.b16 %v872_v5, %v872_v5  ;;  %v880_v28 = vrot.slane %v3126_v6, %v3606_v7  ;;  %v884_v29 = vrot.slane %v874_v9, %v3606_v7  ;;  %v3737_v62 = vrot.slane %v3632_v15, %v3606_v7  ;;  %v3462_v5 = vld [vmem:[%s3615_s7 + $0x48] sm:$0xff]  }
  0x2f   : > { %v846_v32 = vadd.bf16 %v830_v13, %v753_v58  ;;  %v847_v33 = vadd.bf16 %v831_v16, %v754_v61  ;;  %v888_v34 = vrot.slane %v3127_v22, %v3606_v7  ;;  %v1225_v31 = vshrl.u32 %v3624_v10, 16  ;;  %v3461_v58 = vld [vmem:[%s3615_s7 + $0x28] sm:$0xff]  }
  0x30   : > { %v892_v38 = vrot.slane %v876_v27, %v3606_v7  ;;  %v894_v39 = vpack.i.b16 %v880_v28, %v880_v28  ;;  %v901_v40 = vpack.i.b16 %v884_v29, %v884_v29  ;;  %v1213_v43 = vmul.bf16 %v3452_v12, %v3737_v62  ;;  %v3781_v16 = vld [vmem:[%s3615_s7 + $0x68] sm:$0xff]   ;;  %v3464_v28 = vld [vmem:[%s3615_s7 + $0x10] sm:$0xff]  }
  0x31   : > { %v908_v47 = vpack.i.b16 %v888_v34, %v888_v34  ;;  %v1226_v49 = vpack.i.b16 %v1225_v31, %v1225_v31  ;;  %v3750_v50 = vrot.slane %v3632_v15, %v3608_v8  ;;  %v368_v10 = vmul.bf16 %v3456_v26, %v3638_v21 }
  0x32   : > { %v3755_v53 = vrot.slane %v894_v39, %v3606_v7  ;;  %v3758_v55 = vrot.slane %v901_v40, %v3606_v7  ;;  %v915_v56 = vpack.i.b16 %v892_v38, %v892_v38  ;;  %v412_v57 = vmul.bf16 %v3457_v30, %v3652_v41  ;;  %v3465_v38 = vld [vmem:[%s3615_s7 + $0x30] sm:$0xff]  }
  0x33   : > { %v3763_v60 = vrot.slane %v908_v47, %v3606_v7  ;;  %v3766_v15 = vrot.slane %v1226_v49, %v3606_v7  ;;  %v1300_v61 = vmul.bf16 %v3454_v25, %v3750_v50  ;;  %v3770_v3 = vrot.slane %v1226_v49, %v3608_v8 }
  0x34   : > { %v3774_v6 = vrot.slane %v915_v56, %v3606_v7  ;;  %v921_v9 = vmul.bf16 %v3755_v53, %v3709_v46  ;;  %v922_v12 = vmul.bf16 %v3758_v55, %v3709_v46  ;;  %v416_v13 = vadd.bf16 %v412_v57, %v368_v10  ;;  %v3800_v57 = vld [vmem:[%s3615_s7 + $0x70] sm:$0xff]  }
  0x35   : > { %v923_v22 = vmul.bf16 %v3763_v60, %v3709_v46  ;;  %v1256_v25 = vmul.bf16 %v3453_v35, %v3766_v15  ;;  %v1344_v26 = vmul.bf16 %v3455_v36, %v3770_v3  ;;  %v457_v27 = vmul.bf16 %v3458_v37, %v3642_v24  ;;  %v3795_v35 = vld [vmem:[%s3615_s7 + $0x50] sm:$0xff]  }
  0x36   : > { %v924_v29 = vmul.bf16 %v3774_v6, %v3709_v46  ;;  %v937_v30 = vadd.bf16 %v921_v9, %v844_v4  ;;  %v938_v34 = vadd.bf16 %v922_v12, %v845_v17  ;;  %v502_v31 = vmul.bf16 %v3459_v45, %v3655_v42 }
  0x37   : > { %v939_v39 = vadd.bf16 %v923_v22, %v846_v32  ;;  %v1260_v40 = vadd.bf16 %v1256_v25, %v1213_v43  ;;  %v461_v47 = vadd.bf16 %v457_v27, %v416_v13  ;;  %v1214_v49 = vmul.bf16 %v3460_v51, %v3737_v62 }
  0x38   : > { %v940_v36 = vadd.bf16 %v924_v29, %v847_v33  ;;  %v975_v10 = vcombine.low %v937_v30, %v938_v34  ;;  %v1257_v37 = vmul.bf16 %v3461_v58, %v3766_v15  ;;  %v1301_v56 = vmul.bf16 %v3462_v5, %v3750_v50 }
  0x39   : > { %v1304_v46 = vadd.bf16 %v1300_v61, %v1260_v40  ;;  %v506_v4 = vadd.bf16 %v502_v31, %v461_v47  ;;  %v369_v32 = vmul.bf16 %v3464_v28, %v3638_v21  ;;  %v413_v33 = vmul.bf16 %v3465_v38, %v3652_v41 }
  0x3a   : > { %v976_v43 = vcombine.low %v939_v39, %v940_v36  ;;  %v983_v45 = vrot.slane %v975_v10, %v3628_v14  ;;  %v1261_v51 = vadd.bf16 %v1257_v37, %v1214_v49 }
  0x3b   : > { %v1348_v9 = vadd.bf16 %v1344_v26, %v1304_v46  ;;  %v530_v12 = vcombine.high %v506_v4, %v506_v4  ;;  %v537_v58 = vrot.slane %v506_v4, %v3628_v14  ;;  %v3813_v22 = vadd.bf16 %v413_v33, %v369_v32 }
  0x3c   : > { %v990_v61 = vrot.slane %v976_v43, %v3628_v14  ;;  %v3811_v13 = vadd.bf16 %v1301_v56, %v1261_v51 }
  0x3d   : > { %v1356_v27 = vcombine.high %v1348_v9, %v1348_v9  ;;  %v1363_v28 = vrot.slane %v1348_v9, %v3628_v14  ;;  %v3819_v26 = vrot.slane %v530_v12, %v3628_v14  ;;  %v545_v29 = vcombine.high %v537_v58, %v537_v58 }
  0x3e   : > { %v991_v30 = vcombine.low %v983_v45, %v990_v61  ;;  %v662_v34 = vmul.bf16 %v3661_v48, %v537_v58  ;;  %v663_v31 = vmul.bf16 %v3666_v54, %v537_v58  ;;  %v664_v38 = vmul.bf16 %v3670_v59, %v537_v58 }
  0x3f   : > { %v1370_v39 = vrot.slane %v1356_v27, %v3628_v14  ;;  %v1371_v40 = vcombine.high %v1363_v28, %v1363_v28  ;;  %v1440_v47 = vmul.bf16 %v1363_v28, %v3661_v48  ;;  %v1441_v49 = vmul.bf16 %v1363_v28, %v3666_v54 }
  0x40   : > { %3381 = vmatprep.mubr.msk.bf16.mxu0 %vm1043_vm1, %v991_v30  ;;  %v1442_v36 = vmul.bf16 %v1363_v28, %v3670_v59  ;;  %v1443_v10 = vmul.bf16 %v1363_v28, %v3678_v63  ;;  %v3832_v37 = vcombine.high %v3819_v26, %v3819_v26  ;;  %v665_v56 = vmul.bf16 %v3678_v63, %v537_v58 }
  0x41   : > { %v1372_v46 = vcombine.high %v1370_v39, %v1370_v39  ;;  %v1456_v4 = vmul.bf16 %v1371_v40, %v3682_v11  ;;  %v1457_v32 = vmul.bf16 %v1371_v40, %v3685_v18  ;;  %v1458_v43 = vmul.bf16 %v1371_v40, %v3688_v19 }
  0x42   : > { %v1459_v45 = vmul.bf16 %v1371_v40, %v3691_v23  ;;  %v1488_v51 = vmul.bf16 %v1370_v39, %v3707_v44  ;;  %v1489_v33 = vmul.bf16 %v1370_v39, %v3716_v52  ;;  %v1490_v9 = vmul.bf16 %v1370_v39, %v3720_v0 }
  0x43   : > { %v1472_v12 = vadd.bf16 %v1456_v4, %v1440_v47  ;;  %v1473_v61 = vadd.bf16 %v1457_v32, %v1441_v49  ;;  %v1474_v27 = vadd.bf16 %v1458_v43, %v1442_v36  ;;  %v1491_v58 = vmul.bf16 %v1370_v39, %v3723_v1 }
  0x44   : > { %v1475_v28 = vadd.bf16 %v1459_v45, %v1443_v10  ;;  %v1520_v30 = vmul.bf16 %v1372_v46, %v3755_v53  ;;  %v1521_v25 = vmul.bf16 %v1372_v46, %v3758_v55  ;;  %v1522_v5 = vmul.bf16 %v1372_v46, %v3763_v60 }
  0x45   : > { %v1504_v17 = vadd.bf16 %v1488_v51, %v1472_v12  ;;  %v1505_v40 = vadd.bf16 %v1489_v33, %v1473_v61  ;;  %v1506_v8 = vadd.bf16 %v1490_v9, %v1474_v27  ;;  %v1523_v20 = vmul.bf16 %v1372_v46, %v3774_v6 }
  0x46   : > { %v1507_v7 = vadd.bf16 %v1491_v58, %v1475_v28  ;;  %v739_v47 = vmul.bf16 %v3682_v11, %v545_v29  ;;  %v740_v49 = vmul.bf16 %v3685_v18, %v545_v29  ;;  %v741_v39 = vmul.bf16 %v3688_v19, %v545_v29 }
  0x47   : > { %v1536_v36 = vadd.bf16 %v1520_v30, %v1504_v17  ;;  %v1537_v10 = vadd.bf16 %v1521_v25, %v1505_v40  ;;  %v1538_v4 = vadd.bf16 %v1522_v5, %v1506_v8  ;;  %v742_v32 = vmul.bf16 %v3691_v23, %v545_v29  ;;  %v3856_v17 = vld [vmem:[%s3615_s7 + $0x10] sm:$0xff]  }
  0x48   : > { %v1539_v43 = vadd.bf16 %v1523_v20, %v1507_v7  ;;  %v755_v45 = vadd.bf16 %v739_v47, %v662_v34  ;;  %v756_v51 = vadd.bf16 %v740_v49, %v663_v31  ;;  %v757_v33 = vadd.bf16 %v741_v39, %v664_v38  ;;  %v3865_v5 = vld [vmem:[%s3615_s7 + $0x30] sm:$0xff]  }
  0x49   : > { %v1568_v46 = vcombine.low %v1536_v36, %v1537_v10  ;;  %v758_v9 = vadd.bf16 %v742_v32, %v665_v56  ;;  %v832_v12 = vmul.bf16 %v3707_v44, %v3819_v26  ;;  %v833_v61 = vmul.bf16 %v3716_v52, %v3819_v26  ;;  %v3871_v56 = vld [vmem:[%s3615_s7 + $0x50] sm:$0xff]  }
  0x4a   : > { %v1569_v25 = vcombine.low %v1538_v4, %v1539_v43  ;;  %v834_v8 = vmul.bf16 %v3720_v0, %v3819_v26  ;;  %v835_v7 = vmul.bf16 %v3723_v1, %v3819_v26  ;;  %v925_v20 = vmul.bf16 %v3755_v53, %v3832_v37  ;;  %v3877_v30 = vld [vmem:[%s3615_s7 + $0x70] sm:$0xff]  }
  0x4b   : > { %v1576_v29 = vrot.slane %v1568_v46, %v3628_v14  ;;  %v848_v34 = vadd.bf16 %v832_v12, %v755_v45  ;;  %v849_v31 = vadd.bf16 %v833_v61, %v756_v51  ;;  %v926_v38 = vmul.bf16 %v3758_v55, %v3832_v37 }
  0x4c   : > { %v1583_v27 = vrot.slane %v1569_v25, %v3628_v14  ;;  %v850_v58 = vadd.bf16 %v834_v8, %v757_v33  ;;  %v851_v28 = vadd.bf16 %v835_v7, %v758_v9  ;;  %v927_v26 = vmul.bf16 %v3763_v60, %v3832_v37 }
  0x4d   : > { %v928_v40 = vmul.bf16 %v3774_v6, %v3832_v37  ;;  %v941_v47 = vadd.bf16 %v925_v20, %v848_v34  ;;  %v942_v49 = vadd.bf16 %v926_v38, %v849_v31  ;;  %v4500_v39 = vmul.bf16 %v3781_v16, %v3770_v3 }
  0x4e   : > { %v1584_v10 = vcombine.low %v1576_v29, %v1583_v27  ;;  %v943_v4 = vadd.bf16 %v927_v26, %v850_v58  ;;  %v4501_v32 = vmul.bf16 %v3795_v35, %v3642_v24  ;;  %v1215_v45 = vmul.bf16 %v3856_v17, %v3737_v62 }
  0x4f   : > { %v1349_v36 = vadd.bf16 %v4500_v39, %v3811_v13  ;;  %v944_v51 = vadd.bf16 %v928_v40, %v851_v28  ;;  %v992_v33 = vcombine.low %v941_v47, %v942_v49  ;;  %v4502_v16 = vmul.bf16 %v3800_v57, %v3655_v42 }
  0x50   : > { %v462_v43 = vadd.bf16 %v4501_v32, %v3813_v22  ;;  %3391 = vmatprep.mubr.msk.bf16.mxu1 %vm1043_vm1, %v1584_v10  ;;  %v1258_v9 = vmul.bf16 %v3865_v5, %v3766_v15  ;;  %v1302_v35 = vmul.bf16 %v3871_v56, %v3750_v50  ;;  %v1346_v22 = vmul.bf16 %v3877_v30, %v3770_v3  ;;  %v3919_v32 = vld [vmem:[%s3615_s7 + $0x18] sm:$0xff]  }
  0x51   : > { %v1373_v37 = vcombine.high %v1349_v36, %v1349_v36  ;;  %v1380_v46 = vrot.slane %v1349_v36, %v3628_v14  ;;  %v993_v12 = vcombine.low %v943_v4, %v944_v51  ;;  %v1000_v61 = vrot.slane %v992_v33, %v3628_v14 }
  0x52   : > { %v507_v13 = vadd.bf16 %v4502_v16, %v462_v43 }
  0x53   : > { %v1387_v17 = vrot.slane %v1373_v37, %v3628_v14  ;;  %v1388_v25 = vcombine.high %v1380_v46, %v1380_v46  ;;  %v1444_v8 = vmul.bf16 %v1380_v46, %v3661_v48  ;;  %v1445_v57 = vmul.bf16 %v1380_v46, %v3666_v54 }
  0x54   : > { %v1446_v7 = vmul.bf16 %v1380_v46, %v3670_v59  ;;  %v1447_v20 = vmul.bf16 %v1380_v46, %v3678_v63  ;;  %v1007_v5 = vrot.slane %v993_v12, %v3628_v14 }
  0x55   : > { %v1389_v29 = vcombine.high %v1387_v17, %v1387_v17  ;;  %v1460_v34 = vmul.bf16 %v1388_v25, %v3682_v11  ;;  %v1461_v31 = vmul.bf16 %v1388_v25, %v3685_v18  ;;  %v1462_v38 = vmul.bf16 %v1388_v25, %v3688_v19 }
  0x56   : > { %v1463_v27 = vmul.bf16 %v1388_v25, %v3691_v23  ;;  %v1492_v58 = vmul.bf16 %v1387_v17, %v3707_v44  ;;  %v1493_v28 = vmul.bf16 %v1387_v17, %v3716_v52  ;;  %v1008_v26 = vcombine.low %v1000_v61, %v1007_v5 }
  0x57   : > { %v1476_v40 = vadd.bf16 %v1460_v34, %v1444_v8  ;;  %v1477_v47 = vadd.bf16 %v1461_v31, %v1445_v57  ;;  %v1494_v49 = vmul.bf16 %v1387_v17, %v3720_v0  ;;  %v1478_v39 = vadd.bf16 %v1462_v38, %v1446_v7 }
  0x58   : > { %v1479_v36 = vadd.bf16 %v1463_v27, %v1447_v20  ;;  %v1495_v10 = vmul.bf16 %v1387_v17, %v3723_v1  ;;  %v1524_v4 = vmul.bf16 %v1389_v29, %v3755_v53  ;;  %3382 = vmatmul.mubr.msk.bf16.vlgmr.msra.gmra.mrb[0].mxu0 %vm1043_vm1, %v1008_v26  ;;  %v1525_v33 = vmul.bf16 %v1389_v29, %v3758_v55 }
  0x59   : > { %v1508_v43 = vadd.bf16 %v1492_v58, %v1476_v40  ;;  %v1509_v51 = vadd.bf16 %v1493_v28, %v1477_v47  ;;  %v1526_v37 = vmul.bf16 %v1389_v29, %v3763_v60  ;;  %v1510_v46 = vadd.bf16 %v1494_v49, %v1478_v39  ;;  %3400 = vmatpush3.bf16.msra.mxu0 %v3591_v2 }
  0x5a   : > { %v1511_v16 = vadd.bf16 %v1495_v10, %v1479_v36  ;;  %v1527_v12 = vmul.bf16 %v1389_v29, %v3774_v6  ;;  %v547_v61 = vcombine.high %v507_v13, %v507_v13  ;;  %v554_v8 = vrot.slane %v507_v13, %v3628_v14 }
  0x5b   : > { %v1540_v17 = vadd.bf16 %v1524_v4, %v1508_v43  ;;  %v1541_v25 = vadd.bf16 %v1525_v33, %v1509_v51  ;;  %v1262_v57 = vadd.bf16 %v1258_v9, %v1215_v45  ;;  %v1542_v7 = vadd.bf16 %v1526_v37, %v1510_v46  ;;  %v3473_v51 = vld [vmem:[%s3615_s7 + $0x38] sm:$0xff]  }
  0x5c   : > { %v1543_v20 = vadd.bf16 %v1527_v12, %v1511_v16  ;;  %v561_v5 = vrot.slane %v547_v61, %v3628_v14  ;;  %v370_v34 = vmul.bf16 %v3919_v32, %v3638_v21  ;;  %v562_v38 = vcombine.high %v554_v8, %v554_v8  ;;  %v3474_v33 = vld [vmem:[%s3615_s7 + $0x58] sm:$0xff]  }
  0x5d   : > { %v1585_v31 = vcombine.low %v1540_v17, %v1541_v25  ;;  %v666_v27 = vmul.bf16 %v3661_v48, %v554_v8  ;;  %v667_v29 = vmul.bf16 %v3666_v54, %v554_v8  ;;  %v668_v13 = vmul.bf16 %v3670_v59, %v554_v8  ;;  %v3475_v61 = vld [vmem:[%s3615_s7 + $0x78] sm:$0xff]  }
  0x5e   : > { %v1586_v58 = vcombine.low %v1542_v7, %v1543_v20  ;;  %v563_v28 = vcombine.high %v561_v5, %v561_v5  ;;  %v669_v45 = vmul.bf16 %v3678_v63, %v554_v8  ;;  %v743_v26 = vmul.bf16 %v3682_v11, %v562_v38  ;;  %v3476_v20 = vld [vmem:[%s3615_s7 + $0x18] sm:$0xff]  }
  0x5f   : > { %v1593_v9 = vrot.slane %v1585_v31, %v3628_v14  ;;  %v744_v21 = vmul.bf16 %v3685_v18, %v562_v38  ;;  %v745_v40 = vmul.bf16 %v3688_v19, %v562_v38  ;;  %v746_v49 = vmul.bf16 %v3691_v23, %v562_v38  ;;  %v3477_v31 = vld [vmem:[%s3615_s7 + $0x38] sm:$0xff]  }
  0x60   : > { %v1600_v47 = vrot.slane %v1586_v58, %v3628_v14  ;;  %v836_v39 = vmul.bf16 %v3707_v44, %v561_v5  ;;  %v837_v36 = vmul.bf16 %v3716_v52, %v561_v5  ;;  %v759_v10 = vadd.bf16 %v743_v26, %v666_v27  ;;  %v3478_v58 = vld [vmem:[%s3615_s7 + $0x58] sm:$0xff]  }
  0x61   : > { %v760_v4 = vadd.bf16 %v744_v21, %v667_v29  ;;  %v761_v32 = vadd.bf16 %v745_v40, %v668_v13  ;;  %v838_v43 = vmul.bf16 %v3720_v0, %v561_v5  ;;  %v762_v46 = vadd.bf16 %v746_v49, %v669_v45  ;;  %v3962_v21 = vld [vmem:[%s3615_s7 + $0x78] sm:$0xff]  }
  0x62   : > { %v1601_v37 = vcombine.low %v1593_v9, %v1600_v47  ;;  %v839_v16 = vmul.bf16 %v3723_v1, %v561_v5  ;;  %v929_v12 = vmul.bf16 %v3755_v53, %v563_v28  ;;  %v852_v17 = vadd.bf16 %v836_v39, %v759_v10 }
  0x63   : > { %v853_v25 = vadd.bf16 %v837_v36, %v760_v4  ;;  %v854_v8 = vadd.bf16 %v838_v43, %v761_v32  ;;  %v930_v7 = vmul.bf16 %v3758_v55, %v563_v28  ;;  %v931_v27 = vmul.bf16 %v3763_v60, %v563_v28 }
  0x64   : > { %3392 = vmatmul.mubr.msk.bf16.vlgmr.msra.gmra.mrb[0].mxu1 %vm1043_vm1, %v1601_v37  ;;  %v855_v38 = vadd.bf16 %v839_v16, %v762_v46  ;;  %v932_v29 = vmul.bf16 %v3774_v6, %v563_v28  ;;  %v1306_v5 = vadd.bf16 %v1302_v35, %v1262_v57  ;;  %v945_v13 = vadd.bf16 %v929_v12, %v852_v17 }
  0x65   : > { %3410 = vmatpush3.bf16.msra.mxu1 %v3591_v2  ;;  %v946_v45 = vadd.bf16 %v930_v7, %v853_v25  ;;  %v414_v9 = vmul.bf16 %v3473_v51, %v3652_v41  ;;  %v459_v26 = vmul.bf16 %v3474_v33, %v3642_v24  ;;  %v947_v40 = vadd.bf16 %v931_v27, %v854_v8 }
  0x66   : > { %v948_v47 = vadd.bf16 %v932_v29, %v855_v38  ;;  %v1350_v28 = vadd.bf16 %v1346_v22, %v1306_v5  ;;  %v504_v56 = vmul.bf16 %v3475_v61, %v3655_v42  ;;  %v1216_v2 = vmul.bf16 %v3476_v20, %v3737_v62 }
  0x67   : > { %v1009_v35 = vcombine.low %v945_v13, %v946_v45  ;;  %v418_v57 = vadd.bf16 %v414_v9, %v370_v34  ;;  %v1259_v49 = vmul.bf16 %v3477_v31, %v3766_v15  ;;  %v1303_v36 = vmul.bf16 %v3478_v58, %v3750_v50 }
  0x68   : > { %v1010_v39 = vcombine.low %v947_v40, %v948_v47  ;;  %v1390_v41 = vcombine.high %v1350_v28, %v1350_v28  ;;  %v1397_v24 = vrot.slane %v1350_v28, %v3628_v14  ;;  %v1347_v30 = vmul.bf16 %v3962_v21, %v3770_v3 }
  0x69   : > { %v1017_v10 = vrot.slane %v1009_v35, %v3628_v14  ;;  %v463_v4 = vadd.bf16 %v459_v26, %v418_v57  ;;  %v1263_v32 = vadd.bf16 %v1259_v49, %v1216_v2  ;;  %v4503_v2 = vld [vmem:[#allocation2_spill] sm:$0xff]  ;;  %v4504_v49 = vld [vmem:[#allocation4_spill] sm:$0xff] }
  0x6a   : > { %v1024_v42 = vrot.slane %v1010_v39, %v3628_v14  ;;  %v1404_v22 = vrot.slane %v1390_v41, %v3628_v14  ;;  %v1405_v62 = vcombine.high %v1397_v24, %v1397_v24  ;;  %v1448_v15 = vmul.bf16 %v1397_v24, %v3661_v48 }
  0x6b   : > { %v1449_v34 = vmul.bf16 %v1397_v24, %v3666_v54  ;;  %v1450_v43 = vmul.bf16 %v1397_v24, %v3670_v59  ;;  %v1451_v50 = vmul.bf16 %v1397_v24, %v3678_v63  ;;  %v508_v51 = vadd.bf16 %v504_v56, %v463_v4 }
  0x6c   : > { %v1025_v33 = vcombine.low %v1017_v10, %v1024_v42  ;;  %v1406_v37 = vcombine.high %v1404_v22, %v1404_v22  ;;  %v1464_v46 = vmul.bf16 %v1405_v62, %v3682_v11  ;;  %v1465_v16 = vmul.bf16 %v1405_v62, %v3685_v18 }
  0x6d   : > { %v1466_v12 = vmul.bf16 %v1405_v62, %v3688_v19  ;;  %v1467_v61 = vmul.bf16 %v1405_v62, %v3691_v23  ;;  %v1496_v17 = vmul.bf16 %v1404_v22, %v3707_v44  ;;  %v1497_v25 = vmul.bf16 %v1404_v22, %v3716_v52 }
  0x6e   : > { %3385 = vmatprep.mubr.msk.bf16.mxu0 %vm1043_vm1, %v1025_v33  ;;  %v1480_v8 = vadd.bf16 %v1464_v46, %v1448_v15  ;;  %v1481_v7 = vadd.bf16 %v1465_v16, %v1449_v34  ;;  %v1498_v20 = vmul.bf16 %v1404_v22, %v3720_v0  ;;  %v1499_v31 = vmul.bf16 %v1404_v22, %v3723_v1 }
  0x6f   : > { %v1482_v38 = vadd.bf16 %v1466_v12, %v1450_v43  ;;  %v1483_v27 = vadd.bf16 %v1467_v61, %v1451_v50  ;;  %v1528_v29 = vmul.bf16 %v1406_v37, %v3755_v53  ;;  %v1529_v5 = vmul.bf16 %v1406_v37, %v3758_v55 }
  0x70   : > { %v1512_v58 = vadd.bf16 %v1496_v17, %v1480_v8  ;;  %v1513_v13 = vadd.bf16 %v1497_v25, %v1481_v7  ;;  %v1530_v45 = vmul.bf16 %v1406_v37, %v3763_v60  ;;  %v1531_v9 = vmul.bf16 %v1406_v37, %v3774_v6 }
  0x71   : > { %v1514_v26 = vadd.bf16 %v1498_v20, %v1482_v38  ;;  %v1515_v40 = vadd.bf16 %v1499_v31, %v1483_v27  ;;  %v564_v47 = vcombine.high %v508_v51, %v508_v51  ;;  %v571_v28 = vrot.slane %v508_v51, %v3628_v14  ;;  %v4014_v20 = vld [vmem:[%s3615_s7] sm:$0xff]  }
  0x72   : > { %v1544_v56 = vadd.bf16 %v1528_v29, %v1512_v58  ;;  %v1545_v35 = vadd.bf16 %v1529_v5, %v1513_v13  ;;  %v1307_v57 = vadd.bf16 %v1303_v36, %v1263_v32  ;;  %v3997_v39 = vrot.slane %v4504_v49, %v4503_v2 }
  0x73   : > { %v1546_v41 = vadd.bf16 %v1530_v45, %v1514_v26  ;;  %v1547_v24 = vadd.bf16 %v1531_v9, %v1515_v40  ;;  %v578_v10 = vrot.slane %v564_v47, %v3628_v14  ;;  %v579_v4 = vcombine.high %v571_v28, %v571_v28 }
  0x74   : > { %v1602_v42 = vcombine.low %v1544_v56, %v1545_v35  ;;  %v670_v22 = vmul.bf16 %v3661_v48, %v571_v28  ;;  %v671_v62 = vmul.bf16 %v3666_v54, %v571_v28  ;;  %v672_v15 = vmul.bf16 %v3670_v59, %v571_v28 }
  0x75   : > { %v1603_v34 = vcombine.low %v1546_v41, %v1547_v24  ;;  %v580_v43 = vcombine.high %v578_v10, %v578_v10  ;;  %v673_v36 = vmul.bf16 %v3678_v63, %v571_v28  ;;  %v747_v32 = vmul.bf16 %v3682_v11, %v579_v4  ;;  %v4026_v28 = vld [vmem:[%s3604_s29 + $0x6] sm:$0x3]  ;;  %v3512_v24 = vld [vmem:[%s3604_s29 + $0x4] sm:$0x3] }
  0x76   : > { %v1610_v50 = vrot.slane %v1602_v42, %v3628_v14  ;;  %v748_v51 = vmul.bf16 %v3685_v18, %v579_v4  ;;  %v749_v33 = vmul.bf16 %v3688_v19, %v579_v4  ;;  %v750_v37 = vmul.bf16 %v3691_v23, %v579_v4 }
  0x77   : > { %v1617_v46 = vrot.slane %v1603_v34, %v3628_v14  ;;  %v763_v16 = vadd.bf16 %v747_v32, %v670_v22  ;;  %v840_v12 = vmul.bf16 %v3707_v44, %v578_v10  ;;  %v841_v61 = vmul.bf16 %v3716_v52, %v578_v10 }
  0x78   : > { %v764_v17 = vadd.bf16 %v748_v51, %v671_v62  ;;  %v765_v25 = vadd.bf16 %v749_v33, %v672_v15  ;;  %v766_v8 = vadd.bf16 %v750_v37, %v673_v36  ;;  %v842_v7 = vmul.bf16 %v3720_v0, %v578_v10  ;;  %v4505_v62 = vld [vmem:[#allocation3_spill] sm:$0xff] }
  0x79   : > { %v1618_v31 = vcombine.low %v1610_v50, %v1617_v46  ;;  %v843_v38 = vmul.bf16 %v3723_v1, %v578_v10  ;;  %v856_v27 = vadd.bf16 %v840_v12, %v763_v16  ;;  %v933_v29 = vmul.bf16 %v3755_v53, %v580_v43 }
  0x7a   : > { %v857_v5 = vadd.bf16 %v841_v61, %v764_v17  ;;  %v858_v58 = vadd.bf16 %v842_v7, %v765_v25  ;;  %v934_v13 = vmul.bf16 %v3758_v55, %v580_v43  ;;  %v935_v45 = vmul.bf16 %v3763_v60, %v580_v43 }
  0x7b   : > { %3395 = vmatprep.mubr.msk.bf16.mxu1 %vm1043_vm1, %v1618_v31  ;;  %v859_v9 = vadd.bf16 %v843_v38, %v766_v8  ;;  %v936_v26 = vmul.bf16 %v3774_v6, %v580_v43  ;;  %v949_v40 = vadd.bf16 %v933_v29, %v856_v27  ;;  %v1351_v47 = vadd.bf16 %v1347_v30, %v1307_v57  ;;  %v3482_v29 = vld [vmem:[%s3615_s7 + $0x40] sm:$0xff]  }
  0x7c   : > { %v950_v56 = vadd.bf16 %v934_v13, %v857_v5  ;;  %v951_v35 = vadd.bf16 %v935_v45, %v858_v58  ;;  %v1801_v41 = vmul.bf16 %v4014_v20, %v3997_v39  ;;  %v1813_v10 = vshrl.u32 %v3512_v24, 16  ;;  %v4101_v20 = vld [vmem:[%s3615_s7 + $0x48] sm:$0xff]  }
  0x7d   : > { %v952_v4 = vadd.bf16 %v936_v26, %v859_v9  ;;  %v1407_v42 = vcombine.high %v1351_v47, %v1351_v47  ;;  %v1414_v22 = vrot.slane %v1351_v47, %v3628_v14  ;;  %v4034_v15 = vrot.slane %v4504_v49, %v4505_v62  ;;  %v3481_v9 = vld [vmem:[%s3615_s7 + $0x20] sm:$0xff]  }
  0x7e   : > { %v1026_v34 = vcombine.low %v949_v40, %v950_v56  ;;  %v1814_v3 = vpack.i.b16 %v1813_v10, %v1813_v10  ;;  %v2359_v21 = vpack.i.b16 %v4026_v28, %v4026_v28  ;;  %v2401_v30 = vshrl.u32 %v4026_v28, 16  ;;  %v3483_v56 = vld [vmem:[%s3615_s7 + $0x60] sm:$0xff]  }
  0x7f   : > { %v1027_v57 = vcombine.low %v951_v35, %v952_v4  ;;  %v1421_v43 = vrot.slane %v1407_v42, %v3628_v14  ;;  %v1422_v36 = vcombine.high %v1414_v22, %v1414_v22  ;;  %v1452_v32 = vmul.bf16 %v1414_v22, %v3661_v48  ;;  %v3484_v42 = vld [vmem:[%s3615_s7] sm:$0xff]  }
  0x80   : > { %v1034_v50 = vrot.slane %v1026_v34, %v3628_v14  ;;  %v1453_v51 = vmul.bf16 %v1414_v22, %v3666_v54  ;;  %v1454_v49 = vmul.bf16 %v1414_v22, %v3670_v59  ;;  %v1455_v33 = vmul.bf16 %v1414_v22, %v3678_v63  ;;  %v3488_v22 = vld [vmem:[%s3615_s7 + $0x8] sm:$0xff]  }
  0x81   : > { %v1041_v37 = vrot.slane %v1027_v57, %v3628_v14  ;;  %v1423_v46 = vcombine.high %v1421_v43, %v1421_v43  ;;  %v1468_v16 = vmul.bf16 %v1422_v36, %v3682_v11  ;;  %v1469_v12 = vmul.bf16 %v1422_v36, %v3685_v18 }
  0x82   : > { %v1470_v61 = vmul.bf16 %v1422_v36, %v3688_v19  ;;  %v1471_v17 = vmul.bf16 %v1422_v36, %v3691_v23  ;;  %v1500_v25 = vmul.bf16 %v1421_v43, %v3707_v44  ;;  %v1501_v8 = vmul.bf16 %v1421_v43, %v3716_v52 }
  0x83   : > { %v1042_v7 = vcombine.low %v1034_v50, %v1041_v37  ;;  %v1484_v31 = vadd.bf16 %v1468_v16, %v1452_v32  ;;  %v1485_v38 = vadd.bf16 %v1469_v12, %v1453_v51  ;;  %v1502_v27 = vmul.bf16 %v1421_v43, %v3720_v0  ;;  %v3486_v32 = vld [vmem:[%s3615_s7 + $0x40] sm:$0xff]   ;;  %v3490_v16 = vld [vmem:[%s3615_s7 + $0x48] sm:$0xff]  }
  0x84   : > { %v1486_v5 = vadd.bf16 %v1470_v61, %v1454_v49  ;;  %v1487_v58 = vadd.bf16 %v1471_v17, %v1455_v33  ;;  %v1503_v13 = vmul.bf16 %v1421_v43, %v3723_v1  ;;  %v1532_v45 = vmul.bf16 %v1423_v46, %v3755_v53  ;;  %v3485_v37 = vld [vmem:[%s3615_s7 + $0x20] sm:$0xff]  }
  0x85   : > { %3386 = vmatmul.mubr.msk.bf16.gmra.mrb[4].mxu0 %vm1043_vm1, %v1042_v7  ;;  %v1516_v26 = vadd.bf16 %v1500_v25, %v1484_v31  ;;  %v1517_v40 = vadd.bf16 %v1501_v8, %v1485_v38  ;;  %v1533_v47 = vmul.bf16 %v1423_v46, %v3758_v55  ;;  %v1534_v28 = vmul.bf16 %v1423_v46, %v3763_v60  ;;  %v3487_v25 = vld [vmem:[%s3615_s7 + $0x60] sm:$0xff]   ;;  %v3491_v8 = vld [vmem:[%s3615_s7 + $0x68] sm:$0xff]  }
  0x86   : > { %v1518_v35 = vadd.bf16 %v1502_v27, %v1486_v5  ;;  %v1519_v24 = vadd.bf16 %v1503_v13, %v1487_v58  ;;  %v1535_v10 = vmul.bf16 %v1423_v46, %v3774_v6  ;;  %v4063_v4 = vrot.slane %v1814_v3, %v4503_v2  ;;  %v3489_v46 = vld [vmem:[%s3615_s7 + $0x28] sm:$0xff]  }
  0x87   : > { %v1548_v34 = vadd.bf16 %v1532_v45, %v1516_v26  ;;  %v1549_v57 = vadd.bf16 %v1533_v47, %v1517_v40  ;;  %v1888_v43 = vmul.bf16 %v3482_v29, %v4034_v15  ;;  %v4069_v36 = vrot.slane %v1814_v3, %v4505_v62  ;;  %v3492_v7 = vld [vmem:[%s3615_s7 + $0x8] sm:$0xff]   ;;  %v4107_v45 = vld [vmem:[%s3615_s7 + $0x10] sm:$0xff]  }
  0x88   : > { %v1550_v50 = vadd.bf16 %v1534_v28, %v1518_v35  ;;  %v1551_v51 = vadd.bf16 %v1535_v10, %v1519_v24  ;;  %v1844_v49 = vmul.bf16 %v3481_v9, %v4063_v4  ;;  %v4074_v33 = vrot.slane %v2359_v21, %v4503_v2  ;;  %v3493_v5 = vld [vmem:[%s3615_s7 + $0x28] sm:$0xff]   ;;  %v4117_v35 = vld [vmem:[%s3615_s7 + $0x30] sm:$0xff]  }
  0x89   : > { %v1619_v12 = vcombine.low %v1548_v34, %v1549_v57  ;;  %v1932_v61 = vmul.bf16 %v3483_v56, %v4069_v36  ;;  %v2402_v17 = vpack.i.b16 %v2401_v30, %v2401_v30  ;;  %v4081_v3 = vrot.slane %v2359_v21, %v4505_v62  ;;  %v4120_v24 = vld [vmem:[%s3615_s7 + $0x50] sm:$0xff]  }
  0x8a   : > { %v1620_v31 = vcombine.low %v1550_v50, %v1551_v51  ;;  %v1848_v38 = vadd.bf16 %v1844_v49, %v1801_v41  ;;  %v2389_v27 = vmul.bf16 %v3484_v42, %v4074_v33  ;;  %v1802_v29 = vmul.bf16 %v3488_v22, %v3997_v39  ;;  %v4104_v41 = vld [vmem:[%s3615_s7 + $0x68] sm:$0xff]   ;;  %v4123_v10 = vld [vmem:[%s3615_s7 + $0x70] sm:$0xff]  }
  0x8b   : > { %v1627_v30 = vrot.slane %v1619_v12, %v3628_v14  ;;  %v4094_v21 = vrot.slane %v2402_v17, %v4503_v2  ;;  %v2476_v58 = vmul.bf16 %v3486_v32, %v4081_v3  ;;  %v4098_v13 = vrot.slane %v2402_v17, %v4505_v62 }
  0x8c   : > { %v1634_v9 = vrot.slane %v1620_v31, %v3628_v14  ;;  %v1892_v26 = vadd.bf16 %v1888_v43, %v1848_v38  ;;  %v1845_v40 = vmul.bf16 %v3489_v46, %v4063_v4  ;;  %v1889_v2 = vmul.bf16 %v3490_v16, %v4034_v15 }
  0x8d   : > { %v2432_v47 = vmul.bf16 %v3485_v37, %v4094_v21  ;;  %v2520_v28 = vmul.bf16 %v3487_v25, %v4098_v13  ;;  %v1933_v62 = vmul.bf16 %v3491_v8, %v4069_v36  ;;  %v2390_v56 = vmul.bf16 %v3492_v7, %v4074_v33 }
  0x8e   : > { %v1635_v42 = vcombine.low %v1627_v30, %v1634_v9  ;;  %v1936_v22 = vadd.bf16 %v1932_v61, %v1892_v26  ;;  %v1849_v34 = vadd.bf16 %v1845_v40, %v1802_v29  ;;  %v2433_v57 = vmul.bf16 %v3493_v5, %v4094_v21 }
  0x8f   : > { %v2436_v43 = vadd.bf16 %v2432_v47, %v2389_v27  ;;  %v2477_v32 = vmul.bf16 %v4101_v20, %v4081_v3  ;;  %v1803_v51 = vmul.bf16 %v4107_v45, %v3997_v39  ;;  %v4508_v45 = vmul.bf16 %v4120_v24, %v4034_v15 }
  0x90   : > { %3396 = vmatmul.mubr.msk.bf16.gmra.mrb[4].mxu1 %vm1043_vm1, %v1635_v42  ;;  %v1944_v49 = vcombine.high %v1936_v22, %v1936_v22  ;;  %v1951_v37 = vrot.slane %v1936_v22, %v3628_v14  ;;  %v1893_v46 = vadd.bf16 %v1889_v2, %v1849_v34  ;;  %v4134_v16 = vadd.bf16 %v2433_v57, %v2390_v56 }
  0x91   : > { %v2480_v12 = vadd.bf16 %v2476_v58, %v2436_v43 }
  0x92   : > { %v1958_v8 = vrot.slane %v1944_v49, %v3628_v14  ;;  %v1959_v7 = vcombine.high %v1951_v37, %v1951_v37  ;;  %v2028_v31 = vmul.bf16 %v1951_v37, %v3661_v48  ;;  %v2029_v38 = vmul.bf16 %v1951_v37, %v3666_v54 }
  0x93   : > { %v2030_v27 = vmul.bf16 %v1951_v37, %v3670_v59  ;;  %v2031_v29 = vmul.bf16 %v1951_v37, %v3678_v63  ;;  %v2524_v5 = vadd.bf16 %v2520_v28, %v2480_v12  ;;  %v4147_v30 = vadd.bf16 %v1933_v62, %v1893_v46 }
  0x94   : > { %v1960_v58 = vcombine.high %v1958_v8, %v1958_v8  ;;  %v2044_v9 = vmul.bf16 %v1959_v7, %v3682_v11  ;;  %v2045_v26 = vmul.bf16 %v1959_v7, %v3685_v18  ;;  %v2046_v40 = vmul.bf16 %v1959_v7, %v3688_v19 }
  0x95   : > { %v2047_v2 = vmul.bf16 %v1959_v7, %v3691_v23  ;;  %v2076_v47 = vmul.bf16 %v1958_v8, %v3707_v44  ;;  %v2077_v56 = vmul.bf16 %v1958_v8, %v3716_v52  ;;  %v2078_v42 = vmul.bf16 %v1958_v8, %v3720_v0 }
  0x96   : > { %v2060_v22 = vadd.bf16 %v2044_v9, %v2028_v31  ;;  %v2061_v34 = vadd.bf16 %v2045_v26, %v2029_v38  ;;  %v2062_v28 = vadd.bf16 %v2046_v40, %v2030_v27  ;;  %v2079_v62 = vmul.bf16 %v1958_v8, %v3723_v1 }
  0x97   : > { %v2063_v57 = vadd.bf16 %v2047_v2, %v2031_v29  ;;  %v2108_v43 = vmul.bf16 %v1960_v58, %v3755_v53  ;;  %v2109_v49 = vmul.bf16 %v1960_v58, %v3758_v55  ;;  %v2110_v37 = vmul.bf16 %v1960_v58, %v3763_v60 }
  0x98   : > { %v2092_v46 = vadd.bf16 %v2076_v47, %v2060_v22  ;;  %v2093_v12 = vadd.bf16 %v2077_v56, %v2061_v34  ;;  %v2094_v7 = vadd.bf16 %v2078_v42, %v2062_v28  ;;  %v2111_v25 = vmul.bf16 %v1960_v58, %v3774_v6 }
  0x99   : > { %v2095_v17 = vadd.bf16 %v2079_v62, %v2063_v57  ;;  %v2532_v50 = vcombine.high %v2524_v5, %v2524_v5  ;;  %v2539_v31 = vrot.slane %v2524_v5, %v3628_v14  ;;  %v1961_v38 = vcombine.high %v4147_v30, %v4147_v30 }
  0x9a   : > { %v2124_v8 = vadd.bf16 %v2108_v43, %v2092_v46  ;;  %v2125_v27 = vadd.bf16 %v2109_v49, %v2093_v12  ;;  %v2126_v29 = vadd.bf16 %v2110_v37, %v2094_v7  ;;  %v1968_v9 = vrot.slane %v4147_v30, %v3628_v14 }
  0x9b   : > { %v2127_v26 = vadd.bf16 %v2111_v25, %v2095_v17  ;;  %v2546_v40 = vrot.slane %v2532_v50, %v3628_v14  ;;  %v2547_v2 = vcombine.high %v2539_v31, %v2539_v31  ;;  %v2616_v47 = vmul.bf16 %v2539_v31, %v3661_v48 }
  0x9c   : > { %v2156_v58 = vcombine.low %v2124_v8, %v2125_v27  ;;  %v2617_v56 = vmul.bf16 %v2539_v31, %v3666_v54  ;;  %v2618_v5 = vmul.bf16 %v2539_v31, %v3670_v59  ;;  %v2619_v42 = vmul.bf16 %v2539_v31, %v3678_v63 }
  0x9d   : > { %v2157_v22 = vcombine.low %v2126_v29, %v2127_v26  ;;  %v2548_v34 = vcombine.high %v2546_v40, %v2546_v40  ;;  %v2632_v28 = vmul.bf16 %v2547_v2, %v3682_v11  ;;  %v2633_v62 = vmul.bf16 %v2547_v2, %v3685_v18 }
  0x9e   : > { %v2164_v17 = vrot.slane %v2156_v58, %v3628_v14  ;;  %v2634_v50 = vmul.bf16 %v2547_v2, %v3688_v19  ;;  %v2635_v25 = vmul.bf16 %v2547_v2, %v3691_v23  ;;  %v2664_v30 = vmul.bf16 %v2546_v40, %v3707_v44 }
  0x9f   : > { %v2171_v57 = vrot.slane %v2157_v22, %v3628_v14  ;;  %v2648_v43 = vadd.bf16 %v2632_v28, %v2616_v47  ;;  %v2649_v49 = vadd.bf16 %v2633_v62, %v2617_v56  ;;  %v2665_v37 = vmul.bf16 %v2546_v40, %v3716_v52 }
  0xa0   : > { %v2650_v46 = vadd.bf16 %v2634_v50, %v2618_v5  ;;  %v2651_v12 = vadd.bf16 %v2635_v25, %v2619_v42  ;;  %v2666_v7 = vmul.bf16 %v2546_v40, %v3720_v0  ;;  %v2667_v31 = vmul.bf16 %v2546_v40, %v3723_v1 }
  0xa1   : > { %v2172_v8 = vcombine.low %v2164_v17, %v2171_v57  ;;  %v2680_v27 = vadd.bf16 %v2664_v30, %v2648_v43  ;;  %v2681_v29 = vadd.bf16 %v2665_v37, %v2649_v49  ;;  %v2696_v26 = vmul.bf16 %v2548_v34, %v3755_v53 }
  0xa2   : > { %v2682_v2 = vadd.bf16 %v2666_v7, %v2650_v46  ;;  %v2683_v58 = vadd.bf16 %v2667_v31, %v2651_v12  ;;  %v2697_v61 = vmul.bf16 %v2548_v34, %v3758_v55  ;;  %v2698_v47 = vmul.bf16 %v2548_v34, %v3763_v60 }
  0xa3   : > { %3401 = vmatprep.mubr.msk.bf16.mxu0 %vm1043_vm1, %v2172_v8  ;;  %v2699_v56 = vmul.bf16 %v2548_v34, %v3774_v6  ;;  %v2712_v5 = vadd.bf16 %v2696_v26, %v2680_v27  ;;  %v1975_v42 = vrot.slane %v1961_v38, %v3628_v14  ;;  %v1976_v22 = vcombine.high %v1968_v9, %v1968_v9 }
  0xa4   : > { %v2713_v40 = vadd.bf16 %v2697_v61, %v2681_v29  ;;  %v2714_v28 = vadd.bf16 %v2698_v47, %v2682_v2  ;;  %v2032_v62 = vmul.bf16 %v1968_v9, %v3661_v48  ;;  %v2033_v17 = vmul.bf16 %v1968_v9, %v3666_v54  ;;  %v3501_v47 = vld [vmem:[%s3615_s7 + $0x30] sm:$0xff]  }
  0xa5   : > { %v2715_v50 = vadd.bf16 %v2699_v56, %v2683_v58  ;;  %v1977_v25 = vcombine.high %v1975_v42, %v1975_v42  ;;  %v2034_v30 = vmul.bf16 %v1968_v9, %v3670_v59  ;;  %v2035_v57 = vmul.bf16 %v1968_v9, %v3678_v63  ;;  %v3500_v58 = vld [vmem:[%s3615_s7 + $0x10] sm:$0xff]  }
  0xa6   : > { %v2744_v43 = vcombine.low %v2712_v5, %v2713_v40  ;;  %v2048_v34 = vmul.bf16 %v1976_v22, %v3682_v11  ;;  %v2049_v38 = vmul.bf16 %v1976_v22, %v3685_v18  ;;  %v2050_v61 = vmul.bf16 %v1976_v22, %v3688_v19 }
  0xa7   : > { %v2745_v49 = vcombine.low %v2714_v28, %v2715_v50  ;;  %v2051_v37 = vmul.bf16 %v1976_v22, %v3691_v23  ;;  %v2080_v46 = vmul.bf16 %v1975_v42, %v3707_v44  ;;  %v2081_v12 = vmul.bf16 %v1975_v42, %v3716_v52  ;;  %v3502_v28 = vld [vmem:[%s3615_s7 + $0x50] sm:$0xff]  }
  0xa8   : > { %v2752_v7 = vrot.slane %v2744_v43, %v3628_v14  ;;  %v2064_v9 = vadd.bf16 %v2048_v34, %v2032_v62  ;;  %v2065_v31 = vadd.bf16 %v2049_v38, %v2033_v17  ;;  %v2066_v8 = vadd.bf16 %v2050_v61, %v2034_v30  ;;  %v4211_v43 = vld [vmem:[%s3615_s7 + $0x18] sm:$0xff]  }
  0xa9   : > { %v2759_v27 = vrot.slane %v2745_v49, %v3628_v14  ;;  %v2067_v29 = vadd.bf16 %v2051_v37, %v2035_v57  ;;  %v2082_v26 = vmul.bf16 %v1975_v42, %v3720_v0  ;;  %v2083_v2 = vmul.bf16 %v1975_v42, %v3723_v1  ;;  %v4208_v57 = vld [vmem:[%s3615_s7 + $0x70] sm:$0xff]  }
  0xaa   : > { %v2096_v56 = vadd.bf16 %v2080_v46, %v2064_v9  ;;  %v2097_v5 = vadd.bf16 %v2081_v12, %v2065_v31  ;;  %v2112_v22 = vmul.bf16 %v1977_v25, %v3755_v53  ;;  %v2113_v40 = vmul.bf16 %v1977_v25, %v3758_v55  ;;  %v4229_v9 = vld [vmem:[%s3615_s7 + $0x58] sm:$0xff]  }
  0xab   : > { %v2760_v62 = vcombine.low %v2752_v7, %v2759_v27  ;;  %v2098_v17 = vadd.bf16 %v2082_v26, %v2066_v8  ;;  %v2099_v50 = vadd.bf16 %v2083_v2, %v2067_v29  ;;  %v2114_v30 = vmul.bf16 %v1977_v25, %v3763_v60  ;;  %v3505_v7 = vld [vmem:[%s3615_s7 + $0x38] sm:$0xff]  }
  0xac   : > { %v2115_v42 = vmul.bf16 %v1977_v25, %v3774_v6  ;;  %v2128_v34 = vadd.bf16 %v2112_v22, %v2096_v56  ;;  %v2129_v38 = vadd.bf16 %v2113_v40, %v2097_v5  ;;  %v2481_v61 = vadd.bf16 %v2477_v32, %v4134_v16 }
  0xad   : > { %3411 = vmatprep.mubr.msk.bf16.mxu1 %vm1043_vm1, %v2760_v62  ;;  %v2130_v49 = vadd.bf16 %v2114_v30, %v2098_v17  ;;  %v4506_v37 = vmul.bf16 %v4117_v35, %v4063_v4  ;;  %v2391_v12 = vmul.bf16 %v3500_v58, %v4074_v33  ;;  %v2434_v25 = vmul.bf16 %v3501_v47, %v4094_v21 }
  0xae   : > { %v2131_v31 = vadd.bf16 %v2115_v42, %v2099_v50  ;;  %v2173_v20 = vcombine.low %v2128_v34, %v2129_v38  ;;  %v4507_v32 = vmul.bf16 %v4104_v41, %v4098_v13  ;;  %v2478_v8 = vmul.bf16 %v3502_v28, %v4081_v3 }
  0xaf   : > { %v1850_v46 = vadd.bf16 %v4506_v37, %v1803_v51  ;;  %v2438_v51 = vadd.bf16 %v2434_v25, %v2391_v12  ;;  %v2522_v27 = vmul.bf16 %v4208_v57, %v4098_v13  ;;  %v1804_v29 = vmul.bf16 %v4211_v43, %v3997_v39 }
  0xb0   : > { %v2525_v16 = vadd.bf16 %v4507_v32, %v2481_v61  ;;  %v2174_v26 = vcombine.low %v2130_v49, %v2131_v31  ;;  %v2181_v2 = vrot.slane %v2173_v20, %v3628_v14  ;;  %v4509_v47 = vmul.bf16 %v4123_v10, %v4069_v36 }
  0xb1   : > { %v1894_v35 = vadd.bf16 %v4508_v45, %v1850_v46  ;;  %v2482_v5 = vadd.bf16 %v2478_v8, %v2438_v51  ;;  %v1847_v24 = vmul.bf16 %v3505_v7, %v4063_v4  ;;  %v1891_v22 = vmul.bf16 %v4229_v9, %v4034_v15 }
  0xb2   : > { %v2549_v58 = vcombine.high %v2525_v16, %v2525_v16  ;;  %v2556_v41 = vrot.slane %v2525_v16, %v3628_v14  ;;  %v2188_v40 = vrot.slane %v2174_v26, %v3628_v14 }
  0xb3   : > { %v1938_v56 = vadd.bf16 %v4509_v47, %v1894_v35 }
  0xb4   : > { %v2563_v39 = vrot.slane %v2549_v58, %v3628_v14  ;;  %v2564_v28 = vcombine.high %v2556_v41, %v2556_v41  ;;  %v2620_v62 = vmul.bf16 %v2556_v41, %v3661_v48  ;;  %v2621_v17 = vmul.bf16 %v2556_v41, %v3666_v54 }
  0xb5   : > { %v2622_v50 = vmul.bf16 %v2556_v41, %v3670_v59  ;;  %v2623_v10 = vmul.bf16 %v2556_v41, %v3678_v63  ;;  %v1978_v30 = vcombine.high %v1938_v56, %v1938_v56  ;;  %v2189_v57 = vcombine.low %v2181_v2, %v2188_v40 }
  0xb6   : > { %v2565_v43 = vcombine.high %v2563_v39, %v2563_v39  ;;  %v2636_v4 = vmul.bf16 %v2564_v28, %v3682_v11  ;;  %v2637_v42 = vmul.bf16 %v2564_v28, %v3685_v18  ;;  %v2638_v34 = vmul.bf16 %v2564_v28, %v3688_v19 }
  0xb7   : > { %v2639_v38 = vmul.bf16 %v2564_v28, %v3691_v23  ;;  %v2668_v61 = vmul.bf16 %v2563_v39, %v3707_v44  ;;  %v2669_v49 = vmul.bf16 %v2563_v39, %v3716_v52  ;;  %3402 = vmatmul.mubr.msk.bf16.vlgmr.msra.gmra.mrb[8].mxu0 %vm1043_vm1, %v2189_v57  ;;  %v2670_v12 = vmul.bf16 %v2563_v39, %v3720_v0 }
  0xb8   : > { %v2652_v37 = vadd.bf16 %v2636_v4, %v2620_v62  ;;  %v2653_v46 = vadd.bf16 %v2637_v42, %v2621_v17  ;;  %v2671_v25 = vmul.bf16 %v2563_v39, %v3723_v1  ;;  %v2654_v7 = vadd.bf16 %v2638_v34, %v2622_v50 }
  0xb9   : > { %v2655_v31 = vadd.bf16 %v2639_v38, %v2623_v10  ;;  %v2700_v20 = vmul.bf16 %v2565_v43, %v3755_v53  ;;  %v2701_v32 = vmul.bf16 %v2565_v43, %v3758_v55  ;;  %v2702_v45 = vmul.bf16 %v2565_v43, %v3763_v60 }
  0xba   : > { %v2684_v16 = vadd.bf16 %v2668_v61, %v2652_v37  ;;  %v2685_v8 = vadd.bf16 %v2669_v49, %v2653_v46  ;;  %v2703_v35 = vmul.bf16 %v2565_v43, %v3774_v6  ;;  %v2686_v51 = vadd.bf16 %v2670_v12, %v2654_v7 }
  0xbb   : > { %v2687_v26 = vadd.bf16 %v2671_v25, %v2655_v31  ;;  %v1985_v2 = vrot.slane %v1938_v56, %v3628_v14  ;;  %v1992_v58 = vrot.slane %v1978_v30, %v3628_v14  ;;  %v2526_v40 = vadd.bf16 %v2522_v27, %v2482_v5  ;;  %v3507_v31 = vld [vmem:[%s3615_s7 + $0x78] sm:$0xff]  }
  0xbc   : > { %v2716_v41 = vadd.bf16 %v2700_v20, %v2684_v16  ;;  %v2717_v47 = vadd.bf16 %v2701_v32, %v2685_v8  ;;  %v1851_v39 = vadd.bf16 %v1847_v24, %v1804_v29  ;;  %v2718_v28 = vadd.bf16 %v2702_v45, %v2686_v51 }
  0xbd   : > { %v2719_v62 = vadd.bf16 %v2703_v35, %v2687_v26  ;;  %v1993_v17 = vcombine.high %v1985_v2, %v1985_v2  ;;  %v1994_v50 = vcombine.high %v1992_v58, %v1992_v58  ;;  %v2036_v57 = vmul.bf16 %v1985_v2, %v3661_v48 }
  0xbe   : > { %v2761_v10 = vcombine.low %v2716_v41, %v2717_v47  ;;  %v2037_v4 = vmul.bf16 %v1985_v2, %v3666_v54  ;;  %v2038_v43 = vmul.bf16 %v1985_v2, %v3670_v59  ;;  %v2039_v56 = vmul.bf16 %v1985_v2, %v3678_v63 }
  0xbf   : > { %v2762_v42 = vcombine.low %v2718_v28, %v2719_v62  ;;  %v2052_v30 = vmul.bf16 %v1993_v17, %v3682_v11  ;;  %v2053_v27 = vmul.bf16 %v1993_v17, %v3685_v18  ;;  %v2054_v5 = vmul.bf16 %v1993_v17, %v3688_v19 }
  0xc0   : > { %v2769_v29 = vrot.slane %v2761_v10, %v3628_v14  ;;  %v2055_v24 = vmul.bf16 %v1993_v17, %v3691_v23  ;;  %v2084_v34 = vmul.bf16 %v1992_v58, %v3707_v44  ;;  %v2085_v37 = vmul.bf16 %v1992_v58, %v3716_v52 }
  0xc1   : > { %v2776_v38 = vrot.slane %v2762_v42, %v3628_v14  ;;  %v2068_v61 = vadd.bf16 %v2052_v30, %v2036_v57  ;;  %v2069_v49 = vadd.bf16 %v2053_v27, %v2037_v4  ;;  %v2070_v46 = vadd.bf16 %v2054_v5, %v2038_v43 }
  0xc2   : > { %v2071_v12 = vadd.bf16 %v2055_v24, %v2039_v56  ;;  %v2086_v25 = vmul.bf16 %v1992_v58, %v3720_v0  ;;  %v2087_v7 = vmul.bf16 %v1992_v58, %v3723_v1  ;;  %v2116_v8 = vmul.bf16 %v1994_v50, %v3755_v53 }
  0xc3   : > { %v2777_v20 = vcombine.low %v2769_v29, %v2776_v38  ;;  %v2100_v32 = vadd.bf16 %v2084_v34, %v2068_v61  ;;  %v2101_v16 = vadd.bf16 %v2085_v37, %v2069_v49  ;;  %v2117_v51 = vmul.bf16 %v1994_v50, %v3758_v55  ;;  %v3508_v49 = vld [vmem:[%s3615_s7 + $0x18] sm:$0xff]  }
  0xc4   : > { %v2102_v45 = vadd.bf16 %v2086_v25, %v2070_v46  ;;  %v2103_v35 = vadd.bf16 %v2087_v7, %v2071_v12  ;;  %v2118_v26 = vmul.bf16 %v1994_v50, %v3763_v60  ;;  %v2119_v2 = vmul.bf16 %v1994_v50, %v3774_v6  ;;  %v3509_v7 = vld [vmem:[%s3615_s7 + $0x38] sm:$0xff]  }
  0xc5   : > { %3412 = vmatmul.mubr.msk.bf16.vlgmr.msra.gmra.mrb[8].mxu1 %vm1043_vm1, %v2777_v20  ;;  %v2132_v41 = vadd.bf16 %v2116_v8, %v2100_v32  ;;  %v2566_v47 = vcombine.high %v2526_v40, %v2526_v40  ;;  %v2573_v58 = vrot.slane %v2526_v40, %v3628_v14  ;;  %v2133_v28 = vadd.bf16 %v2117_v51, %v2101_v16 }
  0xc6   : > { %v2134_v62 = vadd.bf16 %v2118_v26, %v2102_v45  ;;  %v1895_v17 = vadd.bf16 %v1891_v22, %v1851_v39  ;;  %v1935_v10 = vmul.bf16 %v3507_v31, %v4069_v36  ;;  %v2135_v57 = vadd.bf16 %v2119_v2, %v2103_v35  ;;  %v3510_v26 = vld [vmem:[%s3615_s7 + $0x58] sm:$0xff]  }
  0xc7   : > { %v2580_v4 = vrot.slane %v2566_v47, %v3628_v14  ;;  %v2581_v43 = vcombine.high %v2573_v58, %v2573_v58  ;;  %v2624_v42 = vmul.bf16 %v2573_v58, %v3661_v48  ;;  %v2190_v56 = vcombine.low %v2132_v41, %v2133_v28  ;;  %v3511_v2 = vld [vmem:[%s3615_s7 + $0x78] sm:$0xff]  }
  0xc8   : > { %v2625_v50 = vmul.bf16 %v2573_v58, %v3666_v54  ;;  %v2626_v40 = vmul.bf16 %v2573_v58, %v3670_v59  ;;  %v2627_v30 = vmul.bf16 %v2573_v58, %v3678_v63  ;;  %v2191_v27 = vcombine.low %v2134_v62, %v2135_v57 }
  0xc9   : > { %v2582_v29 = vcombine.high %v2580_v4, %v2580_v4  ;;  %v2640_v15 = vmul.bf16 %v2581_v43, %v3682_v11  ;;  %v2641_v36 = vmul.bf16 %v2581_v43, %v3685_v18  ;;  %v2198_v9 = vrot.slane %v2190_v56, %v3628_v14 }
  0xca   : > { %v2642_v22 = vmul.bf16 %v2581_v43, %v3688_v19  ;;  %v2643_v39 = vmul.bf16 %v2581_v43, %v3691_v23  ;;  %v2672_v5 = vmul.bf16 %v2580_v4, %v3707_v44  ;;  %v2205_v24 = vrot.slane %v2191_v27, %v3628_v14 }
  0xcb   : > { %v2656_v34 = vadd.bf16 %v2640_v15, %v2624_v42  ;;  %v2657_v38 = vadd.bf16 %v2641_v36, %v2625_v50  ;;  %v2673_v61 = vmul.bf16 %v2580_v4, %v3716_v52  ;;  %v2674_v12 = vmul.bf16 %v2580_v4, %v3720_v0 }
  0xcc   : > { %v2658_v37 = vadd.bf16 %v2642_v22, %v2626_v40  ;;  %v2659_v46 = vadd.bf16 %v2643_v39, %v2627_v30  ;;  %v2675_v25 = vmul.bf16 %v2580_v4, %v3723_v1  ;;  %v2206_v31 = vcombine.low %v2198_v9, %v2205_v24 }
  0xcd   : > { %v2688_v20 = vadd.bf16 %v2672_v5, %v2656_v34  ;;  %v2689_v32 = vadd.bf16 %v2673_v61, %v2657_v38  ;;  %v2704_v16 = vmul.bf16 %v2582_v29, %v3755_v53  ;;  %v2705_v35 = vmul.bf16 %v2582_v29, %v3758_v55 }
  0xce   : > { %v2690_v8 = vadd.bf16 %v2674_v12, %v2658_v37  ;;  %v2691_v45 = vadd.bf16 %v2675_v25, %v2659_v46  ;;  %v2706_v51 = vmul.bf16 %v2582_v29, %v3763_v60  ;;  %3405 = vmatprep.mubr.msk.bf16.mxu0 %vm1043_vm1, %v2206_v31  ;;  %v2707_v41 = vmul.bf16 %v2582_v29, %v3774_v6 }
  0xcf   : > { %v2720_v47 = vadd.bf16 %v2704_v16, %v2688_v20  ;;  %v1939_v58 = vadd.bf16 %v1935_v10, %v1895_v17  ;;  %v2392_v28 = vmul.bf16 %v3508_v49, %v4074_v33  ;;  %v2721_v62 = vadd.bf16 %v2705_v35, %v2689_v32 }
  0xd0   : > { %v2722_v57 = vadd.bf16 %v2706_v51, %v2690_v8  ;;  %v2435_v4 = vmul.bf16 %v3509_v7, %v4094_v21  ;;  %v2723_v43 = vadd.bf16 %v2707_v41, %v2691_v45  ;;  %v2479_v30 = vmul.bf16 %v3510_v26, %v4081_v3 }
  0xd1   : > { %v1995_v42 = vcombine.high %v1939_v58, %v1939_v58  ;;  %v2002_v56 = vrot.slane %v1939_v58, %v3628_v14  ;;  %v2778_v50 = vcombine.low %v2720_v47, %v2721_v62  ;;  %v2523_v27 = vmul.bf16 %v3511_v2, %v4098_v13 }
  0xd2   : > { %v2439_v40 = vadd.bf16 %v2435_v4, %v2392_v28  ;;  %v2779_v15 = vcombine.low %v2722_v57, %v2723_v43 }
  0xd3   : > { %v2009_v29 = vrot.slane %v1995_v42, %v3628_v14  ;;  %v2010_v17 = vcombine.high %v2002_v56, %v2002_v56  ;;  %v2040_v33 = vmul.bf16 %v2002_v56, %v3661_v48  ;;  %v2786_v10 = vrot.slane %v2778_v50, %v3628_v14 }
  0xd4   : > { %v2041_v21 = vmul.bf16 %v2002_v56, %v3666_v54  ;;  %v2042_v36 = vmul.bf16 %v2002_v56, %v3670_v59  ;;  %v2043_v9 = vmul.bf16 %v2002_v56, %v3678_v63  ;;  %v2793_v22 = vrot.slane %v2779_v15, %v3628_v14 }
  0xd5   : > { %v2011_v39 = vcombine.high %v2009_v29, %v2009_v29  ;;  %v2056_v3 = vmul.bf16 %v2010_v17, %v3682_v11  ;;  %v2057_v13 = vmul.bf16 %v2010_v17, %v3685_v18  ;;  %v2058_v5 = vmul.bf16 %v2010_v17, %v3688_v19 }
  0xd6   : > { %v2059_v24 = vmul.bf16 %v2010_v17, %v3691_v23  ;;  %v2088_v34 = vmul.bf16 %v2009_v29, %v3707_v44  ;;  %v2089_v38 = vmul.bf16 %v2009_v29, %v3716_v52  ;;  %v2794_v61 = vcombine.low %v2786_v10, %v2793_v22 }
  0xd7   : > { %v2072_v49 = vadd.bf16 %v2056_v3, %v2040_v33  ;;  %v2073_v37 = vadd.bf16 %v2057_v13, %v2041_v21  ;;  %v2090_v46 = vmul.bf16 %v2009_v29, %v3720_v0  ;;  %v2074_v12 = vadd.bf16 %v2058_v5, %v2042_v36 }
  0xd8   : > { %v2075_v25 = vadd.bf16 %v2059_v24, %v2043_v9  ;;  %v2091_v7 = vmul.bf16 %v2009_v29, %v3723_v1  ;;  %v2120_v31 = vmul.bf16 %v2011_v39, %v3755_v53  ;;  %3415 = vmatprep.mubr.msk.bf16.mxu1 %vm1043_vm1, %v2794_v61  ;;  %v2121_v16 = vmul.bf16 %v2011_v39, %v3758_v55 }
  0xd9   : > { %v2104_v20 = vadd.bf16 %v2088_v34, %v2072_v49  ;;  %v2105_v32 = vadd.bf16 %v2089_v38, %v2073_v37  ;;  %v2122_v8 = vmul.bf16 %v2011_v39, %v3763_v60  ;;  %v2106_v45 = vadd.bf16 %v2090_v46, %v2074_v12 }
  0xda   : > { %v2107_v35 = vadd.bf16 %v2091_v7, %v2075_v25  ;;  %v2123_v51 = vmul.bf16 %v2011_v39, %v3774_v6  ;;  %v2483_v26 = vadd.bf16 %v2479_v30, %v2439_v40 }
  0xdb   : > { %v2136_v2 = vadd.bf16 %v2120_v31, %v2104_v20  ;;  %v2137_v41 = vadd.bf16 %v2121_v16, %v2105_v32  ;;  %v2138_v47 = vadd.bf16 %v2122_v8, %v2106_v45 }
  0xdc   : > { %v2139_v58 = vadd.bf16 %v2123_v51, %v2107_v35  ;;  %v2527_v28 = vadd.bf16 %v2523_v27, %v2483_v26 }
  0xdd   : > { %v2207_v62 = vcombine.low %v2136_v2, %v2137_v41 }
  0xde   : > { %v2208_v57 = vcombine.low %v2138_v47, %v2139_v58  ;;  %v2583_v4 = vcombine.high %v2527_v28, %v2527_v28  ;;  %v2590_v43 = vrot.slane %v2527_v28, %v3628_v14 }
  0xdf   : > { %v2215_v42 = vrot.slane %v2207_v62, %v3628_v14 }
  0xe0   : > { %v2222_v56 = vrot.slane %v2208_v57, %v3628_v14  ;;  %v2597_v50 = vrot.slane %v2583_v4, %v3628_v14  ;;  %v2598_v15 = vcombine.high %v2590_v43, %v2590_v43  ;;  %v2628_v29 = vmul.bf16 %v2590_v43, %v3661_v48 }
  0xe1   : > { %v2629_v40 = vmul.bf16 %v2590_v43, %v3666_v54  ;;  %v2630_v30 = vmul.bf16 %v2590_v43, %v3670_v59  ;;  %v2631_v27 = vmul.bf16 %v2590_v43, %v3678_v63 }
  0xe2   : > { %v2223_v17 = vcombine.low %v2215_v42, %v2222_v56  ;;  %v2599_v33 = vcombine.high %v2597_v50, %v2597_v50  ;;  %v2644_v10 = vmul.bf16 %v2598_v15, %v3682_v11  ;;  %v2645_v21 = vmul.bf16 %v2598_v15, %v3685_v18 }
  0xe3   : > { %v2646_v36 = vmul.bf16 %v2598_v15, %v3688_v19  ;;  %v2647_v9 = vmul.bf16 %v2598_v15, %v3691_v23  ;;  %v2676_v22 = vmul.bf16 %v2597_v50, %v3707_v44  ;;  %v2677_v48 = vmul.bf16 %v2597_v50, %v3716_v52 }
  0xe4   : > { %3406 = vmatmul.mubr.msk.bf16.gmra.mrb[12].mxu0 %vm1043_vm1, %v2223_v17  ;;  %v2660_v54 = vadd.bf16 %v2644_v10, %v2628_v29  ;;  %v2661_v59 = vadd.bf16 %v2645_v21, %v2629_v40  ;;  %v2678_v63 = vmul.bf16 %v2597_v50, %v3720_v0  ;;  %v2679_v39 = vmul.bf16 %v2597_v50, %v3723_v1 }
  0xe5   : > { %v2662_v3 = vadd.bf16 %v2646_v36, %v2630_v30  ;;  %v2663_v11 = vadd.bf16 %v2647_v9, %v2631_v27  ;;  %v2708_v18 = vmul.bf16 %v2599_v33, %v3755_v53  ;;  %v2709_v19 = vmul.bf16 %v2599_v33, %v3758_v55 }
  0xe6   : > { %v2692_v13 = vadd.bf16 %v2676_v22, %v2660_v54  ;;  %v2693_v23 = vadd.bf16 %v2677_v48, %v2661_v59  ;;  %v2710_v44 = vmul.bf16 %v2599_v33, %v3763_v60  ;;  %v2711_v52 = vmul.bf16 %v2599_v33, %v3774_v6  ;;  %v4372_v60 = vld [vmem:[%s4490_s4] ss:$0 sm:$0xff] }
  0xe7   : > { %v2694_v5 = vadd.bf16 %v2678_v63, %v2662_v3  ;;  %v2695_v24 = vadd.bf16 %v2679_v39, %v2663_v11 }
  0xe8   : > { %v2724_v34 = vadd.bf16 %v2708_v18, %v2692_v13  ;;  %v2725_v38 = vadd.bf16 %v2709_v19, %v2693_v23 }
  0xe9   : > { %v2726_v61 = vadd.bf16 %v2710_v44, %v2694_v5  ;;  %v2727_v0 = vadd.bf16 %v2711_v52, %v2695_v24 }
  0xea   : > { %v2795_v1 = vcombine.low %v2724_v34, %v2725_v38 }
  0xeb   : > { %v2796_v49 = vcombine.low %v2726_v61, %v2727_v0 }
  0xec   : > { %v2803_v37 = vrot.slane %v2795_v1, %v3628_v14 }
  0xed   : > { %v2810_v53 = vrot.slane %v2796_v49, %v3628_v14 }
  0xef   : > { %v2811_v55 = vcombine.low %v2803_v37, %v2810_v53 }
  0xf1   : > { %3416 = vmatmul.mubr.msk.bf16.gmra.mrb[12].mxu1 %vm1043_vm1, %v2811_v55 }
 0x12b   : > { %v3383_v6 = vpop.f32.mrb[0].mxu0 }
 0x12c   : > { %v1103_v46 = vadd.f32 %v3383_v6, %v4372_v60  ;;  %v1094_v12 = vpop.f32.mrb[1].mxu0 }
 0x12d   : > { %v1095_v25 = vadd.f32 %v4372_v60, %v1094_v12  ;;  %v3384_v7 = vpop.f32.mrb[2].mxu0 }
 0x12e   : > { %v1127_v31 = vmax.f32 %v1103_v46, 0.0  ;;  %v1106_v20 = vadd.f32 %v3384_v7, %v4372_v60  ;;  %v1097_v32 = vpop.f32.mrb[3].mxu0 }
 0x12f   : > { %v1125_v14 = vmax.f32 %v1095_v25, 0.0  ;;  %v1098_v16 = vadd.f32 %v4372_v60, %v1097_v32 }
 0x130   : > { %v3329_v8 = vpack.c.bf16 %v1127_v31, %v1127_v31  ;;  %v1128_v45 = vmax.f32 %v1106_v20, 0.0 }
 0x131   : > { %v3327_v35 = vpack.c.bf16 %v1125_v14, %v1125_v14  ;;  %v1126_v51 = vmax.f32 %v1098_v16, 0.0 }
 0x132   : > { %1168 = vst.msk [vmem:[%s4382_s15 + $0x8] sm:$0xf] %vm1165_vm2, %v3329_v8  ;;  %v3330_v26 = vpack.c.bf16 %v1128_v45, %v1128_v45 }
 0x133   : > { %1166 = vst.msk [vmem:[%s4382_s15] sm:$0xf] %vm1165_vm2, %v3327_v35  ;;  %v3328_v2 = vpack.c.bf16 %v1126_v51, %v1126_v51 }
 0x134   : > { %1169 = vst.msk [vmem:[%s4382_s15 + $0xc] sm:$0xf] %vm1165_vm2, %v3330_v26 }
 0x135   : > { %1167 = vst.msk [vmem:[%s4382_s15 + $0x4] sm:$0xf] %vm1165_vm2, %v3328_v2 }
 0x137   : > { %v3393_v41 = vpop.f32.mrb[0].mxu1 }
 0x138   : > { %v1691_v47 = vadd.f32 %v3393_v41, %v4372_v60  ;;  %v1682_v58 = vpop.f32.mrb[1].mxu1 }
 0x139   : > { %v1683_v28 = vadd.f32 %v4372_v60, %v1682_v58  ;;  %v3394_v62 = vpop.f32.mrb[2].mxu1 }
 0x13a   : > { %v1715_v57 = vmax.f32 %v1691_v47, 0.0  ;;  %v1694_v4 = vadd.f32 %v3394_v62, %v4372_v60  ;;  %v1685_v43 = vpop.f32.mrb[3].mxu1 }
 0x13b   : > { %v1713_v42 = vmax.f32 %v1683_v28, 0.0  ;;  %v1686_v56 = vadd.f32 %v4372_v60, %v1685_v43 }
 0x13c   : > { %v3337_v50 = vpack.c.bf16 %v1715_v57, %v1715_v57  ;;  %v1716_v15 = vmax.f32 %v1694_v4, 0.0 }
 0x13d   : > { %v3335_v29 = vpack.c.bf16 %v1713_v42, %v1713_v42  ;;  %v1714_v40 = vmax.f32 %v1686_v56, 0.0 }
 0x13e   : > { %3195 = vst.msk [vmem:[%s4382_s15 + $0x28] sm:$0xf] %vm1165_vm2, %v3337_v50  ;;  %v3338_v30 = vpack.c.bf16 %v1716_v15, %v1716_v15 }
 0x13f   : > { %3193 = vst.msk [vmem:[%s4382_s15 + $0x20] sm:$0xf] %vm1165_vm2, %v3335_v29  ;;  %v3336_v27 = vpack.c.bf16 %v1714_v40, %v1714_v40 }
 0x140   : > { %3196 = vst.msk [vmem:[%s4382_s15 + $0x2c] sm:$0xf] %vm1165_vm2, %v3338_v30 }
 0x141   : > { %3194 = vst.msk [vmem:[%s4382_s15 + $0x24] sm:$0xf] %vm1165_vm2, %v3336_v27 }
 0x158   : > { %v3387_v17 = vpop.f32.mrb[4].mxu0 }
 0x159   : > { %v1119_v33 = vadd.f32 %v3387_v17, %v4372_v60  ;;  %v1110_v10 = vpop.f32.mrb[5].mxu0 }
 0x15a   : > { %v1111_v21 = vadd.f32 %v4372_v60, %v1110_v10  ;;  %v3388_v36 = vpop.f32.mrb[6].mxu0 }
 0x15b   : > { %v1131_v9 = vmax.f32 %v1119_v33, 0.0  ;;  %v1122_v22 = vadd.f32 %v3388_v36, %v4372_v60  ;;  %v1113_v48 = vpop.f32.mrb[7].mxu0 }
 0x15c   : > { %v1129_v54 = vmax.f32 %v1111_v21, 0.0  ;;  %v1114_v59 = vadd.f32 %v4372_v60, %v1113_v48 }
 0x15d   : > { %v3333_v63 = vpack.c.bf16 %v1131_v9, %v1131_v9  ;;  %v1132_v39 = vmax.f32 %v1122_v22, 0.0 }
 0x15e   : > { %v3331_v3 = vpack.c.bf16 %v1129_v54, %v1129_v54  ;;  %v1130_v11 = vmax.f32 %v1114_v59, 0.0 }
 0x15f   : > { %1172 = vst.msk [vmem:[%s4382_s15 + $0x18] sm:$0xf] %vm1165_vm2, %v3333_v63  ;;  %v3334_v18 = vpack.c.bf16 %v1132_v39, %v1132_v39 }
 0x160   : > { %1170 = vst.msk [vmem:[%s4382_s15 + $0x10] sm:$0xf] %vm1165_vm2, %v3331_v3  ;;  %v3332_v19 = vpack.c.bf16 %v1130_v11, %v1130_v11 }
 0x161   : > { %1173 = vst.msk [vmem:[%s4382_s15 + $0x1c] sm:$0xf] %vm1165_vm2, %v3334_v18 }
 0x162   : > { %1171 = vst.msk [vmem:[%s4382_s15 + $0x14] sm:$0xf] %vm1165_vm2, %v3332_v19 }
 0x163   : > { %v3397_v13 = vpop.f32.mrb[4].mxu1 }
 0x164   : > { %v1707_v23 = vadd.f32 %v3397_v13, %v4372_v60  ;;  %v1698_v44 = vpop.f32.mrb[5].mxu1 }
 0x165   : > { %v1699_v52 = vadd.f32 %v4372_v60, %v1698_v44  ;;  %v3398_v5 = vpop.f32.mrb[6].mxu1 }
 0x166   : > { %v1719_v24 = vmax.f32 %v1707_v23, 0.0  ;;  %v1710_v34 = vadd.f32 %v3398_v5, %v4372_v60  ;;  %v1701_v38 = vpop.f32.mrb[7].mxu1 }
 0x167   : > { %v1717_v61 = vmax.f32 %v1699_v52, 0.0  ;;  %v1702_v0 = vadd.f32 %v4372_v60, %v1701_v38 }
 0x168   : > { %v3341_v1 = vpack.c.bf16 %v1719_v24, %v1719_v24  ;;  %v1720_v49 = vmax.f32 %v1710_v34, 0.0 }
 0x169   : > { %v3339_v37 = vpack.c.bf16 %v1717_v61, %v1717_v61  ;;  %v1718_v53 = vmax.f32 %v1702_v0, 0.0 }
 0x16a   : > { %3199 = vst.msk [vmem:[%s4382_s15 + $0x38] sm:$0xf] %vm1165_vm2, %v3341_v1  ;;  %v3342_v55 = vpack.c.bf16 %v1720_v49, %v1720_v49 }
 0x16b   : > { %3197 = vst.msk [vmem:[%s4382_s15 + $0x30] sm:$0xf] %vm1165_vm2, %v3339_v37  ;;  %v3340_v6 = vpack.c.bf16 %v1718_v53, %v1718_v53 }
 0x16c   : > { %3200 = vst.msk [vmem:[%s4382_s15 + $0x3c] sm:$0xf] %vm1165_vm2, %v3342_v55 }
 0x16d   : > { %3198 = vst.msk [vmem:[%s4382_s15 + $0x34] sm:$0xf] %vm1165_vm2, %v3340_v6 }
 0x18a   : > { %v3403_v46 = vpop.f32.mrb[8].mxu0 }
 0x18b   : > { %v2279_v12 = vadd.f32 %v3403_v46, %v4372_v60  ;;  %v2270_v25 = vpop.f32.mrb[9].mxu0 }
 0x18c   : > { %v2271_v7 = vadd.f32 %v4372_v60, %v2270_v25  ;;  %v3404_v31 = vpop.f32.mrb[10].mxu0 }
 0x18d   : > { %v2303_v20 = vmax.f32 %v2279_v12, 0.0  ;;  %v2282_v32 = vadd.f32 %v3404_v31, %v4372_v60  ;;  %v2273_v14 = vpop.f32.mrb[11].mxu0 }
 0x18e   : > { %v2301_v16 = vmax.f32 %v2271_v7, 0.0  ;;  %v2274_v8 = vadd.f32 %v4372_v60, %v2273_v14 }
 0x18f   : > { %v3345_v45 = vpack.c.bf16 %v2303_v20, %v2303_v20  ;;  %v2304_v35 = vmax.f32 %v2282_v32, 0.0 }
 0x190   : > { %v3343_v51 = vpack.c.bf16 %v2301_v16, %v2301_v16  ;;  %v2302_v26 = vmax.f32 %v2274_v8, 0.0 }
 0x191   : > { %3255 = vst.msk [vmem:[%s4382_s15 + $0x48] sm:$0xf] %vm1165_vm2, %v3345_v45  ;;  %v3346_v2 = vpack.c.bf16 %v2304_v35, %v2304_v35 }
 0x192   : > { %3253 = vst.msk [vmem:[%s4382_s15 + $0x40] sm:$0xf] %vm1165_vm2, %v3343_v51  ;;  %v3344_v41 = vpack.c.bf16 %v2302_v26, %v2302_v26 }
 0x193   : > { %3256 = vst.msk [vmem:[%s4382_s15 + $0x4c] sm:$0xf] %vm1165_vm2, %v3346_v2 }
 0x194   : > { %3254 = vst.msk [vmem:[%s4382_s15 + $0x44] sm:$0xf] %vm1165_vm2, %v3344_v41 }
 0x198   : > { %v3413_v47 = vpop.f32.mrb[8].mxu1 }
 0x199   : > { %v2867_v58 = vadd.f32 %v3413_v47, %v4372_v60  ;;  %v2858_v28 = vpop.f32.mrb[9].mxu1 }
 0x19a   : > { %v2859_v62 = vadd.f32 %v4372_v60, %v2858_v28  ;;  %v3414_v57 = vpop.f32.mrb[10].mxu1 }
 0x19b   : > { %v2891_v4 = vmax.f32 %v2867_v58, 0.0  ;;  %v2870_v43 = vadd.f32 %v3414_v57, %v4372_v60  ;;  %v2861_v42 = vpop.f32.mrb[11].mxu1 }
 0x19c   : > { %v2889_v56 = vmax.f32 %v2859_v62, 0.0  ;;  %v2862_v50 = vadd.f32 %v4372_v60, %v2861_v42 }
 0x19d   : > { %v3353_v15 = vpack.c.bf16 %v2891_v4, %v2891_v4  ;;  %v2892_v29 = vmax.f32 %v2870_v43, 0.0 }
 0x19e   : > { %v3351_v40 = vpack.c.bf16 %v2889_v56, %v2889_v56  ;;  %v2890_v30 = vmax.f32 %v2862_v50, 0.0 }
 0x19f   : > { %3315 = vst.msk [vmem:[%s4382_s15 + $0x68] sm:$0xf] %vm1165_vm2, %v3353_v15  ;;  %v3354_v27 = vpack.c.bf16 %v2892_v29, %v2892_v29 }
 0x1a0   : > { %3313 = vst.msk [vmem:[%s4382_s15 + $0x60] sm:$0xf] %vm1165_vm2, %v3351_v40  ;;  %v3352_v17 = vpack.c.bf16 %v2890_v30, %v2890_v30 }
 0x1a1   : > { %3316 = vst.msk [vmem:[%s4382_s15 + $0x6c] sm:$0xf] %vm1165_vm2, %v3354_v27 }
 0x1a2   : > { %3314 = vst.msk [vmem:[%s4382_s15 + $0x64] sm:$0xf] %vm1165_vm2, %v3352_v17 }
 0x1b7   : > { %v3407_v33 = vpop.f32.mrb[12].mxu0 }
 0x1b8   : > { %v2295_v10 = vadd.f32 %v3407_v33, %v4372_v60  ;;  %v2286_v21 = vpop.f32.mrb[13].mxu0 }
 0x1b9   : > { %v2287_v36 = vadd.f32 %v4372_v60, %v2286_v21  ;;  %v3408_v9 = vpop.f32.mrb[14].mxu0 }
 0x1ba   : > { %v2307_v22 = vmax.f32 %v2295_v10, 0.0  ;;  %v2298_v48 = vadd.f32 %v3408_v9, %v4372_v60  ;;  %v2289_v54 = vpop.f32.mrb[15].mxu0 }
 0x1bb   : > { %v2305_v59 = vmax.f32 %v2287_v36, 0.0  ;;  %v2290_v63 = vadd.f32 %v4372_v60, %v2289_v54 }
 0x1bc   : > { %v3349_v39 = vpack.c.bf16 %v2307_v22, %v2307_v22  ;;  %v2308_v3 = vmax.f32 %v2298_v48, 0.0 }
 0x1bd   : > { %v3347_v11 = vpack.c.bf16 %v2305_v59, %v2305_v59  ;;  %v2306_v18 = vmax.f32 %v2290_v63, 0.0 }
 0x1be   : > { %3259 = vst.msk [vmem:[%s4382_s15 + $0x58] sm:$0xf] %vm1165_vm2, %v3349_v39  ;;  %v3350_v19 = vpack.c.bf16 %v2308_v3, %v2308_v3 }
 0x1bf   : > { %3257 = vst.msk [vmem:[%s4382_s15 + $0x50] sm:$0xf] %vm1165_vm2, %v3347_v11  ;;  %v3348_v13 = vpack.c.bf16 %v2306_v18, %v2306_v18 }
 0x1c0   : > { %3260 = vst.msk [vmem:[%s4382_s15 + $0x5c] sm:$0xf] %vm1165_vm2, %v3350_v19 }
 0x1c1   : > { %3258 = vst.msk [vmem:[%s4382_s15 + $0x54] sm:$0xf] %vm1165_vm2, %v3348_v13 }
 0x1c4   : > { %v3417_v23 = vpop.f32.mrb[12].mxu1 }
 0x1c5   : > { %v2883_v44 = vadd.f32 %v3417_v23, %v4372_v60  ;;  %v2874_v52 = vpop.f32.mrb[13].mxu1 }
 0x1c6   : > { %v2875_v5 = vadd.f32 %v4372_v60, %v2874_v52  ;;  %v3418_v24 = vpop.f32.mrb[14].mxu1 }
 0x1c7   : > { %v2895_v34 = vmax.f32 %v2883_v44, 0.0  ;;  %v2886_v38 = vadd.f32 %v3418_v24, %v4372_v60  ;;  %v2877_v61 = vpop.f32.mrb[15].mxu1 }
 0x1c8   : > { %v2893_v0 = vmax.f32 %v2875_v5, 0.0  ;;  %v2878_v1 = vadd.f32 %v4372_v60, %v2877_v61 }
 0x1c9   : > { %v3357_v49 = vpack.c.bf16 %v2895_v34, %v2895_v34  ;;  %v2896_v37 = vmax.f32 %v2886_v38, 0.0 }
 0x1ca   : > { %v3355_v53 = vpack.c.bf16 %v2893_v0, %v2893_v0  ;;  %v2894_v55 = vmax.f32 %v2878_v1, 0.0 }
 0x1cb   : > { %3319 = vst.msk [vmem:[%s4382_s15 + $0x78] sm:$0xf] %vm1165_vm2, %v3357_v49  ;;  %v3358_v6 = vpack.c.bf16 %v2896_v37, %v2896_v37 }
 0x1cc   : > { %3317 = vst.msk [vmem:[%s4382_s15 + $0x70] sm:$0xf] %vm1165_vm2, %v3355_v53  ;;  %v3356_v46 = vpack.c.bf16 %v2894_v55, %v2894_v55 }
 0x1cd   : > { %3320 = vst.msk [vmem:[%s4382_s15 + $0x7c] sm:$0xf] %vm1165_vm2, %v3358_v6 }
 0x1ce   : > { %3318 = vst.msk [vmem:[%s4382_s15 + $0x74] sm:$0xf] %vm1165_vm2, %v3356_v46 }
 0x1cf PF: > { %s15_s20 = sadd.s32 1, %s3535_s20   ;;  %s4510_s18 = smov %s3531_s19 }
 0x1d0   : > { %p12_p6 = scmp.ge.s32.totalorder %s15_s20, 4   ;;  %s4511_s19 = smov %s4513_s21 }
 0x1d2   :  { %14 = sbr.rel (!%p12_p6) target bundleno = 2 (0x2), region = 82 }

</bundles_post_ra>
